<compile_context>
chip_gen: v5e
topology: v5e:2x2
jax: 0.10.0
libtpu: 0.0.40
codegen_flags: <defaults>
</compile_context>

<pallas_src>
import functools

import jax
import jax.numpy as jnp
from jax.experimental import pallas as pl
from jax.experimental.pallas import tpu as pltpu


# ----------------------------------------------------------------------------
# VMEM budget / tile choosers
# ----------------------------------------------------------------------------
def _vmem_limit_bytes():
    cap = 64 * 1024 * 1024
    try:
        info = pltpu.get_tpu_info()
        cap = int(getattr(info, "vmem_capacity_bytes", cap))
    except Exception:
        pass
    if cap >= 128 * 1024 * 1024:          # v5e / v6e
        return 96 * 1024 * 1024
    return min(cap * 3 // 4, 48 * 1024 * 1024)   # v7x-class (64 MiB physical)


def _check_budget(name, need_bytes, hard_limit):
    if need_bytes > hard_limit:
        raise ValueError(
            f"{name}: estimated per-step VMEM {need_bytes / 2**20:.1f} MiB exceeds "
            f"the {hard_limit / 2**20:.1f} MiB limit; use more divisible shapes or "
            "compute_dtype=jnp.bfloat16.")


def _pick_row_tile(n_rows, row_bytes, *, multiple=128, target_bytes=4 << 20):
    """Largest tile that is a multiple of `multiple`, divides n_rows and stays
    near target_bytes; falls back to the (always legal) full dimension."""
    if n_rows <= multiple or n_rows % multiple:
        return n_rows
    t = max(multiple, (target_bytes // max(1, row_bytes)) // multiple * multiple)
    t = min(t, n_rows)
    while t > multiple and n_rows % t:
        t -= multiple
    if n_rows % t:
        return n_rows
    return t


def _pick_conv_channel_tile(c_out, h, w, c_in, n_out, itemsize,
                            soft_budget, hard_limit):
    base = 2 * h * w * c_in * itemsize                    # double-buffered input

    def need(ct):
        cw = n_out * ct
        return (base
                + 2 * n_out * h * w * ct * itemsize       # double-buffered outputs
                + (h + 2) * (w + 2) * cw * itemsize       # halo scratch
                + h * w * cw * 4                          # f32 accumulator temps
                + 2 * (c_in + 10) * cw * itemsize)        # weights / biases

    ct = c_out
    if c_out > 128 and c_out % 128 == 0:
        while ct > 128 and (c_out % ct or need(ct) > soft_budget):
            ct -= 128
        if c_out % ct:
            ct = c_out
    _check_budget("fused 1x1+dw conv", need(ct), hard_limit)
    return ct


# ----------------------------------------------------------------------------
# Kernel 1: fused 1x1 conv (+bias) -> depthwise 3x3 conv (+bias), channels-last
#   grid = (batch, out-channel-tiles); n_out outputs share one halo scratch so
#   the kv branch does the pointwise matmul once for both k and v.
# ----------------------------------------------------------------------------
def _fused_pw_dw_kernel(x_ref, w_ref, b_ref, dww_ref, dwb_ref, *refs, n_out):
    out_refs, pad_ref = refs[:n_out], refs[n_out]
    hh = out_refs[0].shape[1]
    ww = out_refs[0].shape[2]
    cw = pad_ref.shape[-1]
    ct = cw // n_out

    # (Re)zero only the 1-pixel halo border; the interior is overwritten below.
    zrow = jnp.zeros((1, ww + 2, cw), pad_ref.dtype)
    zcol = jnp.zeros((hh + 2, 1, cw), pad_ref.dtype)
    pad_ref[0:1, :, :] = zrow
    pad_ref[hh + 1:hh + 2, :, :] = zrow
    pad_ref[:, 0:1, :] = zcol
    pad_ref[:, ww + 1:ww + 2, :] = zcol

    # 1x1 conv: (HW, Cin) @ (Cin, n_out*ct) on the MXU, f32 accumulation.
    y = jnp.dot(x_ref[0], w_ref[0], preferred_element_type=jnp.float32)
    y = (y + b_ref[0].astype(jnp.float32)).astype(pad_ref.dtype)
    pad_ref[1:hh + 1, 1:ww + 1, :] = y.reshape(hh, ww, cw)

    # depthwise 3x3: nine shifted taps; channel axis stays on the 128 lanes.
    acc = jnp.zeros((hh, ww, cw), jnp.float32)
    for dy in range(3):
        for dx in range(3):
            tap = dww_ref[0, dy * 3 + dx].astype(jnp.float32)        # (cw,)
            acc = acc + pad_ref[dy:dy + hh, dx:dx + ww, :].astype(jnp.float32) * tap
    res = acc + dwb_ref[0].astype(jnp.float32)
    for n in range(n_out):
        out_refs[n][0] = res[:, :, n * ct:(n + 1) * ct].astype(out_refs[n].dtype)


def _stack_tiles(parts, ct):
    c = parts[0].shape[-1]
    tiles = [jnp.concatenate([p[..., t * ct:(t + 1) * ct] for p in parts], axis=-1)
             for t in range(c // ct)]
    return jnp.stack(tiles, axis=0)


def fused_pw_dw_conv(x_b_hw_c, hw_shape, w_parts, b_parts, dww_parts, dwb_parts,
                     *, out_dtype, vmem_limit):
    """x: (B, H*W, Cin) channels-last; returns n_out arrays of shape (B,H,W,Cout)."""
    b, hw, cin = x_b_hw_c.shape
    h, w = hw_shape
    assert h * w == hw
    n_out = len(w_parts)
    c_out = w_parts[0].shape[-1]
    isz = jnp.dtype(out_dtype).itemsize
    ct = _pick_conv_channel_tile(c_out, h, w, cin, n_out, isz,
                                 soft_budget=int(0.6 * vmem_limit),
                                 hard_limit=vmem_limit)
    cw = n_out * ct
    cast = lambda a: a.astype(out_dtype)
    w_s = _stack_tiles([cast(p) for p in w_parts], ct)                     # (nt,cin,cw)
    b_s = _stack_tiles([cast(p).reshape(1, -1) for p in b_parts], ct)      # (nt,1,cw)
    dww_s = _stack_tiles([cast(p) for p in dww_parts], ct)                 # (nt,9,cw)
    dwb_s = _stack_tiles([cast(p).reshape(1, -1) for p in dwb_parts], ct)  # (nt,1,cw)

    out_shape = tuple(jax.ShapeDtypeStruct((b, h, w, c_out), out_dtype)
                      for _ in range(n_out))
    out_specs = tuple(pl.BlockSpec((1, h, w, ct), lambda i, j: (i, 0, 0, j))
                      for _ in range(n_out))
    outs = pl.pallas_call(
        functools.partial(_fused_pw_dw_kernel, n_out=n_out),
        out_shape=out_shape,
        grid=(b, c_out // ct),
        in_specs=[
            pl.BlockSpec((1, hw, cin), lambda i, j: (i, 0, 0)),
            pl.BlockSpec((1, cin, cw), lambda i, j: (j, 0, 0)),
            pl.BlockSpec((1, 1, cw), lambda i, j: (j, 0, 0)),
            pl.BlockSpec((1, 9, cw), lambda i, j: (j, 0, 0)),
            pl.BlockSpec((1, 1, cw), lambda i, j: (j, 0, 0)),
        ],
        out_specs=out_specs,
        scratch_shapes=[pltpu.VMEM((h + 2, w + 2, cw), out_dtype)],
        compiler_params=pltpu.CompilerParams(
            dimension_semantics=("parallel", "parallel"),
            vmem_limit_bytes=vmem_limit),
    )(x_b_hw_c, w_s, b_s, dww_s, dwb_s)
    if not isinstance(outs, (list, tuple)):
        outs = (outs,)
    return list(outs)


# ----------------------------------------------------------------------------
# Kernel 2: per-(batch) channel attention, HW streamed ("arbitrary" last axis).
#   Accumulates per-head Gram + squared norms, then normalizes (F.normalize eps),
#   softmaxes, and FOLDS project_out into a single (C, C) matrix M^T.
# ----------------------------------------------------------------------------
def _attn_fold_kernel(t_ref, q_ref, k_ref, w_ref, m_ref, gram_ref, qsq_ref, ksq_ref,
                      *, num_heads, approx_recip):
    j = pl.program_id(1)
    c = q_ref.shape[-1]
    cph = c // num_heads

    @pl.when(j == 0)
    def _init():
        gram_ref[...] = jnp.zeros_like(gram_ref)
        qsq_ref[...] = jnp.zeros_like(qsq_ref)
        ksq_ref[...] = jnp.zeros_like(ksq_ref)

    q = q_ref[0]                                      # (hwt, C) compute dtype
    k = k_ref[0]
    qf = q.astype(jnp.float32)
    kf = k.astype(jnp.float32)
    qsq_ref[...] += jnp.sum(qf * qf, axis=0, keepdims=True)
    ksq_ref[...] += jnp.sum(kf * kf, axis=0, keepdims=True)

    dn = (((0,), (0,)), ((), ()))                     # contract the spatial axis
    for h in range(num_heads):
        sl = slice(h * cph, (h + 1) * cph)
        gram_ref[h] += jax.lax.dot_general(q[:, sl], k[:, sl], dn,
                                           preferred_element_type=jnp.float32)

    @pl.when(j == pl.num_programs(1) - 1)
    def _finalize():
        # 1/max(||x||, 1e-12) == rsqrt(max(sum x^2, 1e-24))  (F.normalize eps)
        inv_q = jax.lax.rsqrt(jnp.maximum(qsq_ref[...], 1e-24))    # (1, C)
        inv_k = jax.lax.rsqrt(jnp.maximum(ksq_ref[...], 1e-24))
        wp = w_ref[...].astype(jnp.float32)                        # (C, C)
        for h in range(num_heads):
            sl = slice(h * cph, (h + 1) * cph)
            logits = (gram_ref[h] * jnp.transpose(inv_q[:, sl]) * inv_k[:, sl]
                      * t_ref[h])
            mrow = jnp.max(logits, axis=-1, keepdims=True)
            e = jnp.exp(logits - mrow)
            s = jnp.sum(e, axis=-1, keepdims=True)
            if approx_recip:
                attn = e * pl.reciprocal(s, approx=True)
            else:
                attn = e / s
            # fold project_out: M^T[o, h*cph+d] = sum_c attn[c,d] * Wproj[h*cph+c, o]
            m_blk_t = jax.lax.dot_general(wp[sl, :], attn, dn,
                                          preferred_element_type=jnp.float32)
            m_ref[0, :, sl] = m_blk_t.astype(m_ref.dtype)


def attention_fold(q3, k3, temperature, wproj, num_heads, *, out_dtype,
                   approx_recip, vmem_limit):
    b, hw, c = q3.shape
    cph = c // num_heads
    isz = q3.dtype.itemsize
    hwt = _pick_row_tile(hw, c * isz)
    _check_budget("attention gram/softmax",
                  4 * hwt * c * isz + 2 * hwt * c * 4 + 4 * c * c * 4
                  + num_heads * cph * cph * 4,
                  vmem_limit)
    return pl.pallas_call(
        functools.partial(_attn_fold_kernel, num_heads=num_heads,
                          approx_recip=approx_recip),
        out_shape=jax.ShapeDtypeStruct((b, c, c), out_dtype),
        grid=(b, hw // hwt),
        in_specs=[
            pl.BlockSpec(memory_space=pltpu.MemorySpace.SMEM),
            pl.BlockSpec((1, hwt, c), lambda i, j: (i, j, 0)),
            pl.BlockSpec((1, hwt, c), lambda i, j: (i, j, 0)),
            pl.BlockSpec((c, c), lambda i, j: (0, 0)),
        ],
        out_specs=pl.BlockSpec((1, c, c), lambda i, j: (i, 0, 0)),
        scratch_shapes=[
            pltpu.VMEM((num_heads, cph, cph), jnp.float32),
            pltpu.VMEM((1, c), jnp.float32),
            pltpu.VMEM((1, c), jnp.float32),
        ],
        compiler_params=pltpu.CompilerParams(
            dimension_semantics=("parallel", "arbitrary"),
            vmem_limit_bytes=vmem_limit),
    )(temperature, q3, k3, wproj)


# ----------------------------------------------------------------------------
# Kernel 3: out = v @ M + b as ONE canonical A @ B^T matmul per HW chunk,
#   writing the NCHW output directly when HW is lane-tileable.
# ----------------------------------------------------------------------------
def _apply_project_kernel(mt_ref, v_ref, b_ref, o_ref, *, nchw_out):
    mt = mt_ref[0]                                   # (Cout, Cin) == M^T
    v = v_ref[0]                                     # (hwt, Cin)
    bias = b_ref[...].astype(jnp.float32)            # (Cout, 1)
    dn = (((1,), (1,)), ((), ()))                    # A @ B^T
    if nchw_out:
        y = jax.lax.dot_general(mt, v, dn, preferred_element_type=jnp.float32)
        o_ref[0] = (y + bias).astype(o_ref.dtype)                    # (Cout, hwt)
    else:
        y = jax.lax.dot_general(v, mt, dn, preferred_element_type=jnp.float32)
        o_ref[0] = (y + jnp.transpose(bias)).astype(o_ref.dtype)     # (hwt, Cout)


def attention_apply_project(mt, v3, bproj, hw_shape, *, out_dtype, vmem_limit):
    b, hw, c = v3.shape
    h, w = hw_shape
    isz = v3.dtype.itemsize
    out_isz = jnp.dtype(out_dtype).itemsize
    nchw_direct = (hw % 128 == 0) or (hw * c * out_isz <= (8 << 20))
    hwt = _pick_row_tile(hw, c * isz, multiple=128 if nchw_direct else 8)
    _check_budget("attention apply/project",
                  2 * hwt * c * isz + 2 * c * c * isz + 2 * hwt * c * out_isz
                  + hwt * c * 4,
                  vmem_limit)
    bcol = bproj.reshape(c, 1).astype(jnp.float32)
    if nchw_direct:
        out_shape = jax.ShapeDtypeStruct((b, c, hw), out_dtype)
        out_spec = pl.BlockSpec((1, c, hwt), lambda i, j: (i, 0, j))
    else:
        out_shape = jax.ShapeDtypeStruct((b, hw, c), out_dtype)
        out_spec = pl.BlockSpec((1, hwt, c), lambda i, j: (i, j, 0))
    res = pl.pallas_call(
        functools.partial(_apply_project_kernel, nchw_out=nchw_direct),
        out_shape=out_shape,
        grid=(b, hw // hwt),
        in_specs=[
            pl.BlockSpec((1, c, c), lambda i, j: (i, 0, 0)),
            pl.BlockSpec((1, hwt, c), lambda i, j: (i, j, 0)),
            pl.BlockSpec((c, 1), lambda i, j: (0, 0)),
        ],
        out_specs=out_spec,
        compiler_params=pltpu.CompilerParams(
            dimension_semantics=("parallel", "parallel"),
            vmem_limit_bytes=vmem_limit),
    )(mt, v3, bcol)
    if nchw_direct:
        return res.reshape(b, c, h, w)
    return jnp.transpose(res.reshape(b, h, w, c), (0, 3, 1, 2))


# ----------------------------------------------------------------------------
# Full forward
# ----------------------------------------------------------------------------
def cross_trans_attention(feat_guide, feat_op, params, num_heads,
                          compute_dtype=jnp.float32, approx_softmax=True):
    b, c, h, w = feat_guide.shape
    assert c % num_heads == 0
    cd = jnp.dtype(compute_dtype)
    hw = h * w
    vlim = _vmem_limit_bytes()

    # entry boundary: NCHW -> flattened channels-last (C on the lane axis)
    xg = jnp.transpose(feat_guide, (0, 2, 3, 1)).reshape(b, hw, c).astype(cd)
    xo = jnp.transpose(feat_op, (0, 2, 3, 1)).reshape(b, hw, c).astype(cd)

    def dw9(wt):  # (Cg,3,3) -> (9,Cg) with dw9[dy*3+dx, ch] == wt[ch, dy, dx]
        return wt.reshape(wt.shape[0], 9).T

    wq, bq = params["wq"], params["bq"]
    wk, wv = params["wkv"][:, :c], params["wkv"][:, c:]
    bk, bv = params["bkv"][:c], params["bkv"][c:]
    wq_dw, bq_dw = dw9(params["wq_dw"]), params["bq_dw"]
    wk_dw, bk_dw = dw9(params["wkv_dw"][:c]), params["bkv_dw"][:c]
    wv_dw, bv_dw = dw9(params["wkv_dw"][c:]), params["bkv_dw"][c:]

    # fused 1x1 + depthwise 3x3 (kv branch reads feat_op once, one matmul for k&v)
    (q4,) = fused_pw_dw_conv(xg, (h, w), [wq], [bq], [wq_dw], [bq_dw],
                             out_dtype=cd, vmem_limit=vlim)
    k4, v4 = fused_pw_dw_conv(xo, (h, w), [wk, wv], [bk, bv],
                              [wk_dw, wv_dw], [bk_dw, bv_dw],
                              out_dtype=cd, vmem_limit=vlim)
    q3 = q4.reshape(b, hw, c)
    k3 = k4.reshape(b, hw, c)
    v3 = v4.reshape(b, hw, c)

    temp = params["temperature"].reshape(num_heads).astype(jnp.float32)
    wproj = params["wproj"].astype(cd)

    # Gram -> normalize -> softmax -> fold project_out into M^T   (B, C, C)
    mt = attention_fold(q3, k3, temp, wproj, num_heads, out_dtype=cd,
                        approx_recip=approx_softmax, vmem_limit=vlim)

    # out = v @ M + b, emitted directly as NCHW
    return attention_apply_project(mt, v3, params["bproj"], (h, w),
                                   out_dtype=jnp.float32, vmem_limit=vlim)


# ----------------------------------------------------------------------------
# Pure-JAX reference for validation
# ----------------------------------------------------------------------------
def reference_forward(feat_guide, feat_op, params, num_heads):
    def pw(x, wt, bias):
        return jnp.einsum("bchw,cd->bdhw", x, wt) + bias[None, :, None, None]

    def dw(x, wt, bias):
        c = x.shape[1]
        y = jax.lax.conv_general_dilated(
            x, wt.reshape(c, 1, 3, 3), (1, 1), "SAME",
            feature_group_count=c,
            dimension_numbers=("NCHW", "OIHW", "NCHW"))
        return y + bias[None, :, None, None]

    q = dw(pw(feat_guide, params["wq"], params["bq"]), params["wq_dw"], params["bq_dw"])
    kv = dw(pw(feat_op, params["wkv"], params["bkv"]), params["wkv_dw"], params["bkv_dw"])
    k, v = jnp.split(kv, 2, axis=1)
    b, c, h, w = q.shape
    cph = c // num_heads

    def rshp(x):
        return x.reshape(b, num_heads, cph, h * w)

    q, k, v = rshp(q), rshp(k), rshp(v)

    def l2n(x):
        n = jnp.sqrt(jnp.sum(x * x, axis=-1, keepdims=True))
        return x / jnp.maximum(n, 1e-12)

    q, k = l2n(q), l2n(k)
    attn = jnp.einsum("bhcn,bhdn->bhcd", q, k) * params["temperature"][None]
    attn = jax.nn.softmax(attn, axis=-1)
    out = jnp.einsum("bhcd,bhdn->bhcn", attn, v).reshape(b, c, h, w)
    return pw(out, params["wproj"], params["bproj"])


# ----------------------------------------------------------------------------
if __name__ == "__main__":
    num_heads, dim = 4, 16
    b, h, w = 2, 8, 8

    key = jax.random.PRNGKey(0)
    ks = jax.random.split(key, 12)
    scale = 0.1
    params = {
        "wq": scale * jax.random.normal(ks[0], (dim, dim), jnp.float32),
        "bq": scale * jax.random.normal(ks[1], (dim,), jnp.float32),
        "wkv": scale * jax.random.normal(ks[2], (dim, 2 * dim), jnp.float32),
        "bkv": scale * jax.random.normal(ks[3], (2 * dim,), jnp.float32),
        "wq_dw": scale * jax.random.normal(ks[4], (dim, 3, 3), jnp.float32),
        "bq_dw": scale * jax.random.normal(ks[5], (dim,), jnp.float32),
        "wkv_dw": scale * jax.random.normal(ks[6], (2 * dim, 3, 3), jnp.float32),
        "bkv_dw": scale * jax.random.normal(ks[7], (2 * dim,), jnp.float32),
        "wproj": scale * jax.random.normal(ks[8], (dim, dim), jnp.float32),
        "bproj": scale * jax.random.normal(ks[9], (dim,), jnp.float32),
        "temperature": jnp.ones((num_heads, 1, 1), jnp.float32),  # nn.Parameter(ones)
    }

    feat_guide = jax.random.normal(ks[10], (b, dim, h, w), jnp.float32)
    feat_op = jax.random.normal(ks[11], (b, dim, h, w), jnp.float32)

    fwd = jax.jit(cross_trans_attention, static_argnums=(3,),
                  static_argnames=("compute_dtype", "approx_softmax"))

    # f32 path (validated against a pure-JAX reference)
    out = jax.block_until_ready(fwd(feat_guide, feat_op, params, num_heads))
    ref = reference_forward(feat_guide, feat_op, params, num_heads)
    assert out.shape == (b, dim, h, w)
    err = float(jnp.max(jnp.abs(out - ref)))
    assert err < 5e-3, f"f32 max abs err {err}"

    # bf16 path (halves HBM traffic; f32 accumulation + f32 softmax in-kernel)
    out_bf16 = jax.block_until_ready(
        fwd(feat_guide, feat_op, params, num_heads, compute_dtype=jnp.bfloat16))
    err_bf16 = float(jnp.max(jnp.abs(out_bf16.astype(jnp.float32) - ref)))
    assert err_bf16 < 5e-2, f"bf16 max abs err {err_bf16}"

    print("KERNEL_OK")
</pallas_src>

<mosaic_0001>
module attributes {stable_mosaic.version = 11 : i64} {
  func.func @_fused_pw_dw_kernel(%arg0: i32, %arg1: i32, %arg2: memref<1x64x16xf32, #tpu.memory_space<vmem>>, %arg3: memref<1x16x32xf32, #tpu.memory_space<vmem>>, %arg4: memref<1x1x32xf32, #tpu.memory_space<vmem>>, %arg5: memref<1x9x32xf32, #tpu.memory_space<vmem>>, %arg6: memref<1x1x32xf32, #tpu.memory_space<vmem>>, %arg7: memref<1x8x8x16xf32, #tpu.memory_space<vmem>>, %arg8: memref<1x8x8x16xf32, #tpu.memory_space<vmem>>, %arg9: memref<10x10x32xf32, #tpu.memory_space<vmem>>) attributes {dimension_semantics = [#tpu.dimension_semantics<parallel>, #tpu.dimension_semantics<parallel>], iteration_bounds = array<i64: 2, 1>, scalar_prefetch = 0 : i64, scratch_operands = 1 : i64, tpu.core_type = #tpu.core_type<tc>, window_params = [{transform_indices = @transform_0, window_bounds = array<i64: 1, 64, 16>}, {transform_indices = @transform_1, window_bounds = array<i64: 1, 16, 32>}, {transform_indices = @transform_2, window_bounds = array<i64: 1, 1, 32>}, {transform_indices = @transform_3, window_bounds = array<i64: 1, 9, 32>}, {transform_indices = @transform_4, window_bounds = array<i64: 1, 1, 32>}, {transform_indices = @transform_5, window_bounds = array<i64: 1, 8, 8, 16>}, {transform_indices = @transform_6, window_bounds = array<i64: 1, 8, 8, 16>}]} {
    %cst = arith.constant 0.000000e+00 : f32
    %0 = vector.broadcast %cst : f32 to vector<1x10x32xf32>
    %cst_0 = arith.constant 0.000000e+00 : f32
    %1 = vector.broadcast %cst_0 : f32 to vector<10x1x32xf32>
    %c0 = arith.constant 0 : index
    %c0_1 = arith.constant 0 : index
    %c0_2 = arith.constant 0 : index
    %2 = vector.load %arg9[%c0, %c0_1, %c0_2] : memref<10x10x32xf32, #tpu.memory_space<vmem>>, vector<1x10x32xf32>
    tpu.vector_store %arg9[%c0, %c0_1, %c0_2], %0 {strides = array<i32>} : memref<10x10x32xf32, #tpu.memory_space<vmem>>, vector<1x10x32xf32>,
    %c9 = arith.constant 9 : index
    %c0_3 = arith.constant 0 : index
    %c0_4 = arith.constant 0 : index
    %3 = vector.load %arg9[%c9, %c0_3, %c0_4] : memref<10x10x32xf32, #tpu.memory_space<vmem>>, vector<1x10x32xf32>
    tpu.vector_store %arg9[%c9, %c0_3, %c0_4], %0 {strides = array<i32>} : memref<10x10x32xf32, #tpu.memory_space<vmem>>, vector<1x10x32xf32>,
    %c0_5 = arith.constant 0 : index
    %c0_6 = arith.constant 0 : index
    %c0_7 = arith.constant 0 : index
    %4 = vector.load %arg9[%c0_5, %c0_6, %c0_7] : memref<10x10x32xf32, #tpu.memory_space<vmem>>, vector<10x1x32xf32>
    tpu.vector_store %arg9[%c0_5, %c0_6, %c0_7], %1 {strides = array<i32>} : memref<10x10x32xf32, #tpu.memory_space<vmem>>, vector<10x1x32xf32>,
    %c0_8 = arith.constant 0 : index
    %c9_9 = arith.constant 9 : index
    %c0_10 = arith.constant 0 : index
    %5 = vector.load %arg9[%c0_8, %c9_9, %c0_10] : memref<10x10x32xf32, #tpu.memory_space<vmem>>, vector<10x1x32xf32>
    tpu.vector_store %arg9[%c0_8, %c9_9, %c0_10], %1 {strides = array<i32>} : memref<10x10x32xf32, #tpu.memory_space<vmem>>, vector<10x1x32xf32>,
    %c0_11 = arith.constant 0 : index
    %c0_12 = arith.constant 0 : index
    %c0_13 = arith.constant 0 : index
    %6 = vector.load %arg2[%c0_11, %c0_12, %c0_13] : memref<1x64x16xf32, #tpu.memory_space<vmem>>, vector<1x64x16xf32>
    %7 = vector.shape_cast %6 : vector<1x64x16xf32> to vector<64x16xf32>
    %c0_14 = arith.constant 0 : index
    %c0_15 = arith.constant 0 : index
    %c0_16 = arith.constant 0 : index
    %8 = vector.load %arg3[%c0_14, %c0_15, %c0_16] : memref<1x16x32xf32, #tpu.memory_space<vmem>>, vector<1x16x32xf32>
    %9 = vector.shape_cast %8 : vector<1x16x32xf32> to vector<16x32xf32>
    %cst_17 = arith.constant dense<0.000000e+00> : vector<64x32xf32>
    %10 = tpu.matmul %7, %9, %cst_17 {dimension_numbers = #tpu.dot_dimension_numbers<[1], [0], [0], [1], [0, 0, 1, 1], [], []>} : vector<64x16xf32>, vector<16x32xf32>, vector<64x32xf32> -> vector<64x32xf32>
    %c0_18 = arith.constant 0 : index
    %c0_19 = arith.constant 0 : index
    %c0_20 = arith.constant 0 : index
    %11 = vector.load %arg4[%c0_18, %c0_19, %c0_20] : memref<1x1x32xf32, #tpu.memory_space<vmem>>, vector<1x1x32xf32>
    %12 = vector.shape_cast %11 : vector<1x1x32xf32> to vector<1x32xf32>
    %13 = vector.broadcast %12 : vector<1x32xf32> to vector<64x32xf32>
    %14 = arith.addf %10, %13 : vector<64x32xf32>
    %15 = vector.shape_cast %14 : vector<64x32xf32> to vector<8x8x32xf32>
    %c1 = arith.constant 1 : index
    %c1_21 = arith.constant 1 : index
    %c0_22 = arith.constant 0 : index
    %16 = vector.load %arg9[%c1, %c1_21, %c0_22] : memref<10x10x32xf32, #tpu.memory_space<vmem>>, vector<8x8x32xf32>
    tpu.vector_store %arg9[%c1, %c1_21, %c0_22], %15 {strides = array<i32>} : memref<10x10x32xf32, #tpu.memory_space<vmem>>, vector<8x8x32xf32>,
    %cst_23 = arith.constant 0.000000e+00 : f32
    %17 = vector.broadcast %cst_23 : f32 to vector<8x8x32xf32>
    %c0_24 = arith.constant 0 : index
    %c0_25 = arith.constant 0 : index
    %c0_26 = arith.constant 0 : index
    %18 = vector.load %arg5[%c0_24, %c0_25, %c0_26] : memref<1x9x32xf32, #tpu.memory_space<vmem>>, vector<1x1x32xf32>
    %19 = vector.shape_cast %18 : vector<1x1x32xf32> to vector<32xf32>
    %c0_27 = arith.constant 0 : index
    %c0_28 = arith.constant 0 : index
    %c0_29 = arith.constant 0 : index
    %20 = vector.load %arg9[%c0_27, %c0_28, %c0_29] : memref<10x10x32xf32, #tpu.memory_space<vmem>>, vector<8x8x32xf32>
    %21 = vector.shape_cast %19 : vector<32xf32> to vector<1x1x32xf32>
    %22 = vector.broadcast %21 : vector<1x1x32xf32> to vector<8x8x32xf32>
    %23 = arith.mulf %20, %22 : vector<8x8x32xf32>
    %24 = arith.addf %17, %23 : vector<8x8x32xf32>
    %c0_30 = arith.constant 0 : index
    %c1_31 = arith.constant 1 : index
    %c0_32 = arith.constant 0 : index
    %25 = vector.load %arg5[%c0_30, %c1_31, %c0_32] : memref<1x9x32xf32, #tpu.memory_space<vmem>>, vector<1x1x32xf32>
    %26 = vector.shape_cast %25 : vector<1x1x32xf32> to vector<32xf32>
    %c0_33 = arith.constant 0 : index
    %c1_34 = arith.constant 1 : index
    %c0_35 = arith.constant 0 : index
    %27 = vector.load %arg9[%c0_33, %c1_34, %c0_35] : memref<10x10x32xf32, #tpu.memory_space<vmem>>, vector<8x8x32xf32>
    %28 = vector.shape_cast %26 : vector<32xf32> to vector<1x1x32xf32>
    %29 = vector.broadcast %28 : vector<1x1x32xf32> to vector<8x8x32xf32>
    %30 = arith.mulf %27, %29 : vector<8x8x32xf32>
    %31 = arith.addf %24, %30 : vector<8x8x32xf32>
    %c0_36 = arith.constant 0 : index
    %c2 = arith.constant 2 : index
    %c0_37 = arith.constant 0 : index
    %32 = vector.load %arg5[%c0_36, %c2, %c0_37] : memref<1x9x32xf32, #tpu.memory_space<vmem>>, vector<1x1x32xf32>
    %33 = vector.shape_cast %32 : vector<1x1x32xf32> to vector<32xf32>
    %c0_38 = arith.constant 0 : index
    %c2_39 = arith.constant 2 : index
    %c0_40 = arith.constant 0 : index
    %34 = vector.load %arg9[%c0_38, %c2_39, %c0_40] : memref<10x10x32xf32, #tpu.memory_space<vmem>>, vector<8x8x32xf32>
    %35 = vector.shape_cast %33 : vector<32xf32> to vector<1x1x32xf32>
    %36 = vector.broadcast %35 : vector<1x1x32xf32> to vector<8x8x32xf32>
    %37 = arith.mulf %34, %36 : vector<8x8x32xf32>
    %38 = arith.addf %31, %37 : vector<8x8x32xf32>
    %c0_41 = arith.constant 0 : index
    %c3 = arith.constant 3 : index
    %c0_42 = arith.constant 0 : index
    %39 = vector.load %arg5[%c0_41, %c3, %c0_42] : memref<1x9x32xf32, #tpu.memory_space<vmem>>, vector<1x1x32xf32>
    %40 = vector.shape_cast %39 : vector<1x1x32xf32> to vector<32xf32>
    %c1_43 = arith.constant 1 : index
    %c0_44 = arith.constant 0 : index
    %c0_45 = arith.constant 0 : index
    %41 = vector.load %arg9[%c1_43, %c0_44, %c0_45] : memref<10x10x32xf32, #tpu.memory_space<vmem>>, vector<8x8x32xf32>
    %42 = vector.shape_cast %40 : vector<32xf32> to vector<1x1x32xf32>
    %43 = vector.broadcast %42 : vector<1x1x32xf32> to vector<8x8x32xf32>
    %44 = arith.mulf %41, %43 : vector<8x8x32xf32>
    %45 = arith.addf %38, %44 : vector<8x8x32xf32>
    %c0_46 = arith.constant 0 : index
    %c4 = arith.constant 4 : index
    %c0_47 = arith.constant 0 : index
    %46 = vector.load %arg5[%c0_46, %c4, %c0_47] : memref<1x9x32xf32, #tpu.memory_space<vmem>>, vector<1x1x32xf32>
    %47 = vector.shape_cast %46 : vector<1x1x32xf32> to vector<32xf32>
    %c1_48 = arith.constant 1 : index
    %c1_49 = arith.constant 1 : index
    %c0_50 = arith.constant 0 : index
    %48 = vector.load %arg9[%c1_48, %c1_49, %c0_50] : memref<10x10x32xf32, #tpu.memory_space<vmem>>, vector<8x8x32xf32>
    %49 = vector.shape_cast %47 : vector<32xf32> to vector<1x1x32xf32>
    %50 = vector.broadcast %49 : vector<1x1x32xf32> to vector<8x8x32xf32>
    %51 = arith.mulf %48, %50 : vector<8x8x32xf32>
    %52 = arith.addf %45, %51 : vector<8x8x32xf32>
    %c0_51 = arith.constant 0 : index
    %c5 = arith.constant 5 : index
    %c0_52 = arith.constant 0 : index
    %53 = vector.load %arg5[%c0_51, %c5, %c0_52] : memref<1x9x32xf32, #tpu.memory_space<vmem>>, vector<1x1x32xf32>
    %54 = vector.shape_cast %53 : vector<1x1x32xf32> to vector<32xf32>
    %c1_53 = arith.constant 1 : index
    %c2_54 = arith.constant 2 : index
    %c0_55 = arith.constant 0 : index
    %55 = vector.load %arg9[%c1_53, %c2_54, %c0_55] : memref<10x10x32xf32, #tpu.memory_space<vmem>>, vector<8x8x32xf32>
    %56 = vector.shape_cast %54 : vector<32xf32> to vector<1x1x32xf32>
    %57 = vector.broadcast %56 : vector<1x1x32xf32> to vector<8x8x32xf32>
    %58 = arith.mulf %55, %57 : vector<8x8x32xf32>
    %59 = arith.addf %52, %58 : vector<8x8x32xf32>
    %c0_56 = arith.constant 0 : index
    %c6 = arith.constant 6 : index
    %c0_57 = arith.constant 0 : index
    %60 = vector.load %arg5[%c0_56, %c6, %c0_57] : memref<1x9x32xf32, #tpu.memory_space<vmem>>, vector<1x1x32xf32>
    %61 = vector.shape_cast %60 : vector<1x1x32xf32> to vector<32xf32>
    %c2_58 = arith.constant 2 : index
    %c0_59 = arith.constant 0 : index
    %c0_60 = arith.constant 0 : index
    %62 = vector.load %arg9[%c2_58, %c0_59, %c0_60] : memref<10x10x32xf32, #tpu.memory_space<vmem>>, vector<8x8x32xf32>
    %63 = vector.shape_cast %61 : vector<32xf32> to vector<1x1x32xf32>
    %64 = vector.broadcast %63 : vector<1x1x32xf32> to vector<8x8x32xf32>
    %65 = arith.mulf %62, %64 : vector<8x8x32xf32>
    %66 = arith.addf %59, %65 : vector<8x8x32xf32>
    %c0_61 = arith.constant 0 : index
    %c7 = arith.constant 7 : index
    %c0_62 = arith.constant 0 : index
    %67 = vector.load %arg5[%c0_61, %c7, %c0_62] : memref<1x9x32xf32, #tpu.memory_space<vmem>>, vector<1x1x32xf32>
    %68 = vector.shape_cast %67 : vector<1x1x32xf32> to vector<32xf32>
    %c2_63 = arith.constant 2 : index
    %c1_64 = arith.constant 1 : index
    %c0_65 = arith.constant 0 : index
    %69 = vector.load %arg9[%c2_63, %c1_64, %c0_65] : memref<10x10x32xf32, #tpu.memory_space<vmem>>, vector<8x8x32xf32>
    %70 = vector.shape_cast %68 : vector<32xf32> to vector<1x1x32xf32>
    %71 = vector.broadcast %70 : vector<1x1x32xf32> to vector<8x8x32xf32>
    %72 = arith.mulf %69, %71 : vector<8x8x32xf32>
    %73 = arith.addf %66, %72 : vector<8x8x32xf32>
    %c0_66 = arith.constant 0 : index
    %c8 = arith.constant 8 : index
    %c0_67 = arith.constant 0 : index
    %74 = vector.load %arg5[%c0_66, %c8, %c0_67] : memref<1x9x32xf32, #tpu.memory_space<vmem>>, vector<1x1x32xf32>
    %75 = vector.shape_cast %74 : vector<1x1x32xf32> to vector<32xf32>
    %c2_68 = arith.constant 2 : index
    %c2_69 = arith.constant 2 : index
    %c0_70 = arith.constant 0 : index
    %76 = vector.load %arg9[%c2_68, %c2_69, %c0_70] : memref<10x10x32xf32, #tpu.memory_space<vmem>>, vector<8x8x32xf32>
    %77 = vector.shape_cast %75 : vector<32xf32> to vector<1x1x32xf32>
    %78 = vector.broadcast %77 : vector<1x1x32xf32> to vector<8x8x32xf32>
    %79 = arith.mulf %76, %78 : vector<8x8x32xf32>
    %80 = arith.addf %73, %79 : vector<8x8x32xf32>
    %c0_71 = arith.constant 0 : index
    %c0_72 = arith.constant 0 : index
    %c0_73 = arith.constant 0 : index
    %81 = vector.load %arg6[%c0_71, %c0_72, %c0_73] : memref<1x1x32xf32, #tpu.memory_space<vmem>>, vector<1x1x32xf32>
    %82 = vector.shape_cast %81 : vector<1x1x32xf32> to vector<1x32xf32>
    %83 = vector.shape_cast %82 : vector<1x32xf32> to vector<1x1x32xf32>
    %84 = vector.broadcast %83 : vector<1x1x32xf32> to vector<8x8x32xf32>
    %85 = arith.addf %80, %84 : vector<8x8x32xf32>
    %86 = vector.extract_strided_slice %85 {offsets = [0, 0, 0], sizes = [8, 8, 16], strides = [1, 1, 1]} : vector<8x8x32xf32> to vector<8x8x16xf32>
    %c0_74 = arith.constant 0 : index
    %c0_75 = arith.constant 0 : index
    %c0_76 = arith.constant 0 : index
    %c0_77 = arith.constant 0 : index
    %87 = vector.load %arg7[%c0_74, %c0_75, %c0_76, %c0_77] : memref<1x8x8x16xf32, #tpu.memory_space<vmem>>, vector<1x8x8x16xf32>
    %88 = vector.shape_cast %87 : vector<1x8x8x16xf32> to vector<8x8x16xf32>
    %89 = vector.shape_cast %86 : vector<8x8x16xf32> to vector<1x8x8x16xf32>
    tpu.vector_store %arg7[%c0_74, %c0_75, %c0_76, %c0_77], %89 {strides = array<i32>} : memref<1x8x8x16xf32, #tpu.memory_space<vmem>>, vector<1x8x8x16xf32>,
    %90 = vector.extract_strided_slice %85 {offsets = [0, 0, 16], sizes = [8, 8, 16], strides = [1, 1, 1]} : vector<8x8x32xf32> to vector<8x8x16xf32>
    %c0_78 = arith.constant 0 : index
    %c0_79 = arith.constant 0 : index
    %c0_80 = arith.constant 0 : index
    %c0_81 = arith.constant 0 : index
    %91 = vector.load %arg8[%c0_78, %c0_79, %c0_80, %c0_81] : memref<1x8x8x16xf32, #tpu.memory_space<vmem>>, vector<1x8x8x16xf32>
    %92 = vector.shape_cast %91 : vector<1x8x8x16xf32> to vector<8x8x16xf32>
    %93 = vector.shape_cast %90 : vector<8x8x16xf32> to vector<1x8x8x16xf32>
    tpu.vector_store %arg8[%c0_78, %c0_79, %c0_80, %c0_81], %93 {strides = array<i32>} : memref<1x8x8x16xf32, #tpu.memory_space<vmem>>, vector<1x8x8x16xf32>,
    return
  }
  func.func @transform_0(%arg0: i32, %arg1: i32) -> (i32, i32, i32) {
    %c0_i32 = arith.constant 0 : i32
    %c0_i32_0 = arith.constant 0 : i32
    %c0_i32_1 = arith.constant 0 : i32
    return %arg0, %c0_i32, %c0_i32_0 : i32, i32, i32
  }
  func.func @transform_1(%arg0: i32, %arg1: i32) -> (i32, i32, i32) {
    %c0_i32 = arith.constant 0 : i32
    %c0_i32_0 = arith.constant 0 : i32
    %c0_i32_1 = arith.constant 0 : i32
    return %arg1, %c0_i32, %c0_i32_0 : i32, i32, i32
  }
  func.func @transform_2(%arg0: i32, %arg1: i32) -> (i32, i32, i32) {
    %c0_i32 = arith.constant 0 : i32
    %c0_i32_0 = arith.constant 0 : i32
    %c0_i32_1 = arith.constant 0 : i32
    return %arg1, %c0_i32, %c0_i32_0 : i32, i32, i32
  }
  func.func @transform_3(%arg0: i32, %arg1: i32) -> (i32, i32, i32) {
    %c0_i32 = arith.constant 0 : i32
    %c0_i32_0 = arith.constant 0 : i32
    %c0_i32_1 = arith.constant 0 : i32
    return %arg1, %c0_i32, %c0_i32_0 : i32, i32, i32
  }
  func.func @transform_4(%arg0: i32, %arg1: i32) -> (i32, i32, i32) {
    %c0_i32 = arith.constant 0 : i32
    %c0_i32_0 = arith.constant 0 : i32
    %c0_i32_1 = arith.constant 0 : i32
    return %arg1, %c0_i32, %c0_i32_0 : i32, i32, i32
  }
  func.func @transform_5(%arg0: i32, %arg1: i32) -> (i32, i32, i32, i32) {
    %c0_i32 = arith.constant 0 : i32
    %c0_i32_0 = arith.constant 0 : i32
    %c0_i32_1 = arith.constant 0 : i32
    return %arg0, %c0_i32, %c0_i32_0, %arg1 : i32, i32, i32, i32
  }
  func.func @transform_6(%arg0: i32, %arg1: i32) -> (i32, i32, i32, i32) {
    %c0_i32 = arith.constant 0 : i32
    %c0_i32_0 = arith.constant 0 : i32
    %c0_i32_1 = arith.constant 0 : i32
    return %arg0, %c0_i32, %c0_i32_0, %arg1 : i32, i32, i32, i32
  }
}

module attributes {stable_mosaic.version = 11 : i64} {
  func.func @_fused_pw_dw_kernel(%arg0: i32, %arg1: i32, %arg2: memref<1x64x16xf32, #tpu.memory_space<vmem>>, %arg3: memref<1x16x16xf32, #tpu.memory_space<vmem>>, %arg4: memref<1x1x16xf32, #tpu.memory_space<vmem>>, %arg5: memref<1x9x16xf32, #tpu.memory_space<vmem>>, %arg6: memref<1x1x16xf32, #tpu.memory_space<vmem>>, %arg7: memref<1x8x8x16xf32, #tpu.memory_space<vmem>>, %arg8: memref<10x10x16xf32, #tpu.memory_space<vmem>>) attributes {dimension_semantics = [#tpu.dimension_semantics<parallel>, #tpu.dimension_semantics<parallel>], iteration_bounds = array<i64: 2, 1>, scalar_prefetch = 0 : i64, scratch_operands = 1 : i64, tpu.core_type = #tpu.core_type<tc>, window_params = [{transform_indices = @transform_0, window_bounds = array<i64: 1, 64, 16>}, {transform_indices = @transform_1, window_bounds = array<i64: 1, 16, 16>}, {transform_indices = @transform_2, window_bounds = array<i64: 1, 1, 16>}, {transform_indices = @transform_3, window_bounds = array<i64: 1, 9, 16>}, {transform_indices = @transform_4, window_bounds = array<i64: 1, 1, 16>}, {transform_indices = @transform_5, window_bounds = array<i64: 1, 8, 8, 16>}]} {
    %cst = arith.constant 0.000000e+00 : f32
    %0 = vector.broadcast %cst : f32 to vector<1x10x16xf32>
    %cst_0 = arith.constant 0.000000e+00 : f32
    %1 = vector.broadcast %cst_0 : f32 to vector<10x1x16xf32>
    %c0 = arith.constant 0 : index
    %c0_1 = arith.constant 0 : index
    %c0_2 = arith.constant 0 : index
    %2 = vector.load %arg8[%c0, %c0_1, %c0_2] : memref<10x10x16xf32, #tpu.memory_space<vmem>>, vector<1x10x16xf32>
    tpu.vector_store %arg8[%c0, %c0_1, %c0_2], %0 {strides = array<i32>} : memref<10x10x16xf32, #tpu.memory_space<vmem>>, vector<1x10x16xf32>,
    %c9 = arith.constant 9 : index
    %c0_3 = arith.constant 0 : index
    %c0_4 = arith.constant 0 : index
    %3 = vector.load %arg8[%c9, %c0_3, %c0_4] : memref<10x10x16xf32, #tpu.memory_space<vmem>>, vector<1x10x16xf32>
    tpu.vector_store %arg8[%c9, %c0_3, %c0_4], %0 {strides = array<i32>} : memref<10x10x16xf32, #tpu.memory_space<vmem>>, vector<1x10x16xf32>,
    %c0_5 = arith.constant 0 : index
    %c0_6 = arith.constant 0 : index
    %c0_7 = arith.constant 0 : index
    %4 = vector.load %arg8[%c0_5, %c0_6, %c0_7] : memref<10x10x16xf32, #tpu.memory_space<vmem>>, vector<10x1x16xf32>
    tpu.vector_store %arg8[%c0_5, %c0_6, %c0_7], %1 {strides = array<i32>} : memref<10x10x16xf32, #tpu.memory_space<vmem>>, vector<10x1x16xf32>,
    %c0_8 = arith.constant 0 : index
    %c9_9 = arith.constant 9 : index
    %c0_10 = arith.constant 0 : index
    %5 = vector.load %arg8[%c0_8, %c9_9, %c0_10] : memref<10x10x16xf32, #tpu.memory_space<vmem>>, vector<10x1x16xf32>
    tpu.vector_store %arg8[%c0_8, %c9_9, %c0_10], %1 {strides = array<i32>} : memref<10x10x16xf32, #tpu.memory_space<vmem>>, vector<10x1x16xf32>,
    %c0_11 = arith.constant 0 : index
    %c0_12 = arith.constant 0 : index
    %c0_13 = arith.constant 0 : index
    %6 = vector.load %arg2[%c0_11, %c0_12, %c0_13] : memref<1x64x16xf32, #tpu.memory_space<vmem>>, vector<1x64x16xf32>
    %7 = vector.shape_cast %6 : vector<1x64x16xf32> to vector<64x16xf32>
    %c0_14 = arith.constant 0 : index
    %c0_15 = arith.constant 0 : index
    %c0_16 = arith.constant 0 : index
    %8 = vector.load %arg3[%c0_14, %c0_15, %c0_16] : memref<1x16x16xf32, #tpu.memory_space<vmem>>, vector<1x16x16xf32>
    %9 = vector.shape_cast %8 : vector<1x16x16xf32> to vector<16x16xf32>
    %cst_17 = arith.constant dense<0.000000e+00> : vector<64x16xf32>
    %10 = tpu.matmul %7, %9, %cst_17 {dimension_numbers = #tpu.dot_dimension_numbers<[1], [0], [0], [1], [0, 0, 1, 1], [], []>} : vector<64x16xf32>, vector<16x16xf32>, vector<64x16xf32> -> vector<64x16xf32>
    %c0_18 = arith.constant 0 : index
    %c0_19 = arith.constant 0 : index
    %c0_20 = arith.constant 0 : index
    %11 = vector.load %arg4[%c0_18, %c0_19, %c0_20] : memref<1x1x16xf32, #tpu.memory_space<vmem>>, vector<1x1x16xf32>
    %12 = vector.shape_cast %11 : vector<1x1x16xf32> to vector<1x16xf32>
    %13 = vector.broadcast %12 : vector<1x16xf32> to vector<64x16xf32>
    %14 = arith.addf %10, %13 : vector<64x16xf32>
    %15 = vector.shape_cast %14 : vector<64x16xf32> to vector<8x8x16xf32>
    %c1 = arith.constant 1 : index
    %c1_21 = arith.constant 1 : index
    %c0_22 = arith.constant 0 : index
    %16 = vector.load %arg8[%c1, %c1_21, %c0_22] : memref<10x10x16xf32, #tpu.memory_space<vmem>>, vector<8x8x16xf32>
    tpu.vector_store %arg8[%c1, %c1_21, %c0_22], %15 {strides = array<i32>} : memref<10x10x16xf32, #tpu.memory_space<vmem>>, vector<8x8x16xf32>,
    %cst_23 = arith.constant 0.000000e+00 : f32
    %17 = vector.broadcast %cst_23 : f32 to vector<8x8x16xf32>
    %c0_24 = arith.constant 0 : index
    %c0_25 = arith.constant 0 : index
    %c0_26 = arith.constant 0 : index
    %18 = vector.load %arg5[%c0_24, %c0_25, %c0_26] : memref<1x9x16xf32, #tpu.memory_space<vmem>>, vector<1x1x16xf32>
    %19 = vector.shape_cast %18 : vector<1x1x16xf32> to vector<16xf32>
    %c0_27 = arith.constant 0 : index
    %c0_28 = arith.constant 0 : index
    %c0_29 = arith.constant 0 : index
    %20 = vector.load %arg8[%c0_27, %c0_28, %c0_29] : memref<10x10x16xf32, #tpu.memory_space<vmem>>, vector<8x8x16xf32>
    %21 = vector.shape_cast %19 : vector<16xf32> to vector<1x1x16xf32>
    %22 = vector.broadcast %21 : vector<1x1x16xf32> to vector<8x8x16xf32>
    %23 = arith.mulf %20, %22 : vector<8x8x16xf32>
    %24 = arith.addf %17, %23 : vector<8x8x16xf32>
    %c0_30 = arith.constant 0 : index
    %c1_31 = arith.constant 1 : index
    %c0_32 = arith.constant 0 : index
    %25 = vector.load %arg5[%c0_30, %c1_31, %c0_32] : memref<1x9x16xf32, #tpu.memory_space<vmem>>, vector<1x1x16xf32>
    %26 = vector.shape_cast %25 : vector<1x1x16xf32> to vector<16xf32>
    %c0_33 = arith.constant 0 : index
    %c1_34 = arith.constant 1 : index
    %c0_35 = arith.constant 0 : index
    %27 = vector.load %arg8[%c0_33, %c1_34, %c0_35] : memref<10x10x16xf32, #tpu.memory_space<vmem>>, vector<8x8x16xf32>
    %28 = vector.shape_cast %26 : vector<16xf32> to vector<1x1x16xf32>
    %29 = vector.broadcast %28 : vector<1x1x16xf32> to vector<8x8x16xf32>
    %30 = arith.mulf %27, %29 : vector<8x8x16xf32>
    %31 = arith.addf %24, %30 : vector<8x8x16xf32>
    %c0_36 = arith.constant 0 : index
    %c2 = arith.constant 2 : index
    %c0_37 = arith.constant 0 : index
    %32 = vector.load %arg5[%c0_36, %c2, %c0_37] : memref<1x9x16xf32, #tpu.memory_space<vmem>>, vector<1x1x16xf32>
    %33 = vector.shape_cast %32 : vector<1x1x16xf32> to vector<16xf32>
    %c0_38 = arith.constant 0 : index
    %c2_39 = arith.constant 2 : index
    %c0_40 = arith.constant 0 : index
    %34 = vector.load %arg8[%c0_38, %c2_39, %c0_40] : memref<10x10x16xf32, #tpu.memory_space<vmem>>, vector<8x8x16xf32>
    %35 = vector.shape_cast %33 : vector<16xf32> to vector<1x1x16xf32>
    %36 = vector.broadcast %35 : vector<1x1x16xf32> to vector<8x8x16xf32>
    %37 = arith.mulf %34, %36 : vector<8x8x16xf32>
    %38 = arith.addf %31, %37 : vector<8x8x16xf32>
    %c0_41 = arith.constant 0 : index
    %c3 = arith.constant 3 : index
    %c0_42 = arith.constant 0 : index
    %39 = vector.load %arg5[%c0_41, %c3, %c0_42] : memref<1x9x16xf32, #tpu.memory_space<vmem>>, vector<1x1x16xf32>
    %40 = vector.shape_cast %39 : vector<1x1x16xf32> to vector<16xf32>
    %c1_43 = arith.constant 1 : index
    %c0_44 = arith.constant 0 : index
    %c0_45 = arith.constant 0 : index
    %41 = vector.load %arg8[%c1_43, %c0_44, %c0_45] : memref<10x10x16xf32, #tpu.memory_space<vmem>>, vector<8x8x16xf32>
    %42 = vector.shape_cast %40 : vector<16xf32> to vector<1x1x16xf32>
    %43 = vector.broadcast %42 : vector<1x1x16xf32> to vector<8x8x16xf32>
    %44 = arith.mulf %41, %43 : vector<8x8x16xf32>
    %45 = arith.addf %38, %44 : vector<8x8x16xf32>
    %c0_46 = arith.constant 0 : index
    %c4 = arith.constant 4 : index
    %c0_47 = arith.constant 0 : index
    %46 = vector.load %arg5[%c0_46, %c4, %c0_47] : memref<1x9x16xf32, #tpu.memory_space<vmem>>, vector<1x1x16xf32>
    %47 = vector.shape_cast %46 : vector<1x1x16xf32> to vector<16xf32>
    %c1_48 = arith.constant 1 : index
    %c1_49 = arith.constant 1 : index
    %c0_50 = arith.constant 0 : index
    %48 = vector.load %arg8[%c1_48, %c1_49, %c0_50] : memref<10x10x16xf32, #tpu.memory_space<vmem>>, vector<8x8x16xf32>
    %49 = vector.shape_cast %47 : vector<16xf32> to vector<1x1x16xf32>
    %50 = vector.broadcast %49 : vector<1x1x16xf32> to vector<8x8x16xf32>
    %51 = arith.mulf %48, %50 : vector<8x8x16xf32>
    %52 = arith.addf %45, %51 : vector<8x8x16xf32>
    %c0_51 = arith.constant 0 : index
    %c5 = arith.constant 5 : index
    %c0_52 = arith.constant 0 : index
    %53 = vector.load %arg5[%c0_51, %c5, %c0_52] : memref<1x9x16xf32, #tpu.memory_space<vmem>>, vector<1x1x16xf32>
    %54 = vector.shape_cast %53 : vector<1x1x16xf32> to vector<16xf32>
    %c1_53 = arith.constant 1 : index
    %c2_54 = arith.constant 2 : index
    %c0_55 = arith.constant 0 : index
    %55 = vector.load %arg8[%c1_53, %c2_54, %c0_55] : memref<10x10x16xf32, #tpu.memory_space<vmem>>, vector<8x8x16xf32>
    %56 = vector.shape_cast %54 : vector<16xf32> to vector<1x1x16xf32>
    %57 = vector.broadcast %56 : vector<1x1x16xf32> to vector<8x8x16xf32>
    %58 = arith.mulf %55, %57 : vector<8x8x16xf32>
    %59 = arith.addf %52, %58 : vector<8x8x16xf32>
    %c0_56 = arith.constant 0 : index
    %c6 = arith.constant 6 : index
    %c0_57 = arith.constant 0 : index
    %60 = vector.load %arg5[%c0_56, %c6, %c0_57] : memref<1x9x16xf32, #tpu.memory_space<vmem>>, vector<1x1x16xf32>
    %61 = vector.shape_cast %60 : vector<1x1x16xf32> to vector<16xf32>
    %c2_58 = arith.constant 2 : index
    %c0_59 = arith.constant 0 : index
    %c0_60 = arith.constant 0 : index
    %62 = vector.load %arg8[%c2_58, %c0_59, %c0_60] : memref<10x10x16xf32, #tpu.memory_space<vmem>>, vector<8x8x16xf32>
    %63 = vector.shape_cast %61 : vector<16xf32> to vector<1x1x16xf32>
    %64 = vector.broadcast %63 : vector<1x1x16xf32> to vector<8x8x16xf32>
    %65 = arith.mulf %62, %64 : vector<8x8x16xf32>
    %66 = arith.addf %59, %65 : vector<8x8x16xf32>
    %c0_61 = arith.constant 0 : index
    %c7 = arith.constant 7 : index
    %c0_62 = arith.constant 0 : index
    %67 = vector.load %arg5[%c0_61, %c7, %c0_62] : memref<1x9x16xf32, #tpu.memory_space<vmem>>, vector<1x1x16xf32>
    %68 = vector.shape_cast %67 : vector<1x1x16xf32> to vector<16xf32>
    %c2_63 = arith.constant 2 : index
    %c1_64 = arith.constant 1 : index
    %c0_65 = arith.constant 0 : index
    %69 = vector.load %arg8[%c2_63, %c1_64, %c0_65] : memref<10x10x16xf32, #tpu.memory_space<vmem>>, vector<8x8x16xf32>
    %70 = vector.shape_cast %68 : vector<16xf32> to vector<1x1x16xf32>
    %71 = vector.broadcast %70 : vector<1x1x16xf32> to vector<8x8x16xf32>
    %72 = arith.mulf %69, %71 : vector<8x8x16xf32>
    %73 = arith.addf %66, %72 : vector<8x8x16xf32>
    %c0_66 = arith.constant 0 : index
    %c8 = arith.constant 8 : index
    %c0_67 = arith.constant 0 : index
    %74 = vector.load %arg5[%c0_66, %c8, %c0_67] : memref<1x9x16xf32, #tpu.memory_space<vmem>>, vector<1x1x16xf32>
    %75 = vector.shape_cast %74 : vector<1x1x16xf32> to vector<16xf32>
    %c2_68 = arith.constant 2 : index
    %c2_69 = arith.constant 2 : index
    %c0_70 = arith.constant 0 : index
    %76 = vector.load %arg8[%c2_68, %c2_69, %c0_70] : memref<10x10x16xf32, #tpu.memory_space<vmem>>, vector<8x8x16xf32>
    %77 = vector.shape_cast %75 : vector<16xf32> to vector<1x1x16xf32>
    %78 = vector.broadcast %77 : vector<1x1x16xf32> to vector<8x8x16xf32>
    %79 = arith.mulf %76, %78 : vector<8x8x16xf32>
    %80 = arith.addf %73, %79 : vector<8x8x16xf32>
    %c0_71 = arith.constant 0 : index
    %c0_72 = arith.constant 0 : index
    %c0_73 = arith.constant 0 : index
    %81 = vector.load %arg6[%c0_71, %c0_72, %c0_73] : memref<1x1x16xf32, #tpu.memory_space<vmem>>, vector<1x1x16xf32>
    %82 = vector.shape_cast %81 : vector<1x1x16xf32> to vector<1x16xf32>
    %83 = vector.shape_cast %82 : vector<1x16xf32> to vector<1x1x16xf32>
    %84 = vector.broadcast %83 : vector<1x1x16xf32> to vector<8x8x16xf32>
    %85 = arith.addf %80, %84 : vector<8x8x16xf32>
    %c0_74 = arith.constant 0 : index
    %c0_75 = arith.constant 0 : index
    %c0_76 = arith.constant 0 : index
    %c0_77 = arith.constant 0 : index
    %86 = vector.load %arg7[%c0_74, %c0_75, %c0_76, %c0_77] : memref<1x8x8x16xf32, #tpu.memory_space<vmem>>, vector<1x8x8x16xf32>
    %87 = vector.shape_cast %86 : vector<1x8x8x16xf32> to vector<8x8x16xf32>
    %88 = vector.shape_cast %85 : vector<8x8x16xf32> to vector<1x8x8x16xf32>
    tpu.vector_store %arg7[%c0_74, %c0_75, %c0_76, %c0_77], %88 {strides = array<i32>} : memref<1x8x8x16xf32, #tpu.memory_space<vmem>>, vector<1x8x8x16xf32>,
    return
  }
  func.func @transform_0(%arg0: i32, %arg1: i32) -> (i32, i32, i32) {
    %c0_i32 = arith.constant 0 : i32
    %c0_i32_0 = arith.constant 0 : i32
    %c0_i32_1 = arith.constant 0 : i32
    return %arg0, %c0_i32, %c0_i32_0 : i32, i32, i32
  }
  func.func @transform_1(%arg0: i32, %arg1: i32) -> (i32, i32, i32) {
    %c0_i32 = arith.constant 0 : i32
    %c0_i32_0 = arith.constant 0 : i32
    %c0_i32_1 = arith.constant 0 : i32
    return %arg1, %c0_i32, %c0_i32_0 : i32, i32, i32
  }
  func.func @transform_2(%arg0: i32, %arg1: i32) -> (i32, i32, i32) {
    %c0_i32 = arith.constant 0 : i32
    %c0_i32_0 = arith.constant 0 : i32
    %c0_i32_1 = arith.constant 0 : i32
    return %arg1, %c0_i32, %c0_i32_0 : i32, i32, i32
  }
  func.func @transform_3(%arg0: i32, %arg1: i32) -> (i32, i32, i32) {
    %c0_i32 = arith.constant 0 : i32
    %c0_i32_0 = arith.constant 0 : i32
    %c0_i32_1 = arith.constant 0 : i32
    return %arg1, %c0_i32, %c0_i32_0 : i32, i32, i32
  }
  func.func @transform_4(%arg0: i32, %arg1: i32) -> (i32, i32, i32) {
    %c0_i32 = arith.constant 0 : i32
    %c0_i32_0 = arith.constant 0 : i32
    %c0_i32_1 = arith.constant 0 : i32
    return %arg1, %c0_i32, %c0_i32_0 : i32, i32, i32
  }
  func.func @transform_5(%arg0: i32, %arg1: i32) -> (i32, i32, i32, i32) {
    %c0_i32 = arith.constant 0 : i32
    %c0_i32_0 = arith.constant 0 : i32
    %c0_i32_1 = arith.constant 0 : i32
    return %arg0, %c0_i32, %c0_i32_0, %arg1 : i32, i32, i32, i32
  }
}

module attributes {stable_mosaic.version = 11 : i64} {
  func.func @_apply_project_kernel(%arg0: i32, %arg1: i32, %arg2: memref<1x16x16xf32, #tpu.memory_space<vmem>>, %arg3: memref<1x64x16xf32, #tpu.memory_space<vmem>>, %arg4: memref<16x1xf32, #tpu.memory_space<vmem>>, %arg5: memref<1x16x64xf32, #tpu.memory_space<vmem>>) attributes {dimension_semantics = [#tpu.dimension_semantics<parallel>, #tpu.dimension_semantics<parallel>], iteration_bounds = array<i64: 2, 1>, scalar_prefetch = 0 : i64, scratch_operands = 0 : i64, tpu.core_type = #tpu.core_type<tc>, window_params = [{transform_indices = @transform_0, window_bounds = array<i64: 1, 16, 16>}, {transform_indices = @transform_1, window_bounds = array<i64: 1, 64, 16>}, {pipeline_mode = #tpu.pipeline_mode<synchronous>, transform_indices = @transform_2, window_bounds = array<i64: 16, 1>}, {transform_indices = @transform_3, window_bounds = array<i64: 1, 16, 64>}]} {
    %c0 = arith.constant 0 : index
    %c0_0 = arith.constant 0 : index
    %c0_1 = arith.constant 0 : index
    %0 = vector.load %arg2[%c0, %c0_0, %c0_1] : memref<1x16x16xf32, #tpu.memory_space<vmem>>, vector<1x16x16xf32>
    %1 = vector.shape_cast %0 : vector<1x16x16xf32> to vector<16x16xf32>
    %c0_2 = arith.constant 0 : index
    %c0_3 = arith.constant 0 : index
    %c0_4 = arith.constant 0 : index
    %2 = vector.load %arg3[%c0_2, %c0_3, %c0_4] : memref<1x64x16xf32, #tpu.memory_space<vmem>>, vector<1x64x16xf32>
    %3 = vector.shape_cast %2 : vector<1x64x16xf32> to vector<64x16xf32>
    %c0_5 = arith.constant 0 : index
    %c0_6 = arith.constant 0 : index
    %4 = vector.load %arg4[%c0_5, %c0_6] : memref<16x1xf32, #tpu.memory_space<vmem>>, vector<16x1xf32>
    %cst = arith.constant dense<0.000000e+00> : vector<16x64xf32>
    %5 = tpu.matmul %1, %3, %cst {dimension_numbers = #tpu.dot_dimension_numbers<[1], [1], [0], [0], [0, 0, 1, 0], [], []>} : vector<16x16xf32>, vector<64x16xf32>, vector<16x64xf32> -> vector<16x64xf32>
    %6 = vector.broadcast %4 : vector<16x1xf32> to vector<16x64xf32>
    %7 = arith.addf %5, %6 : vector<16x64xf32>
    %c0_7 = arith.constant 0 : index
    %c0_8 = arith.constant 0 : index
    %c0_9 = arith.constant 0 : index
    %8 = vector.load %arg5[%c0_7, %c0_8, %c0_9] : memref<1x16x64xf32, #tpu.memory_space<vmem>>, vector<1x16x64xf32>
    %9 = vector.shape_cast %8 : vector<1x16x64xf32> to vector<16x64xf32>
    %10 = vector.shape_cast %7 : vector<16x64xf32> to vector<1x16x64xf32>
    tpu.vector_store %arg5[%c0_7, %c0_8, %c0_9], %10 {strides = array<i32>} : memref<1x16x64xf32, #tpu.memory_space<vmem>>, vector<1x16x64xf32>,
    return
  }
  func.func @transform_0(%arg0: i32, %arg1: i32) -> (i32, i32, i32) {
    %c0_i32 = arith.constant 0 : i32
    %c0_i32_0 = arith.constant 0 : i32
    %c0_i32_1 = arith.constant 0 : i32
    return %arg0, %c0_i32, %c0_i32_0 : i32, i32, i32
  }
  func.func @transform_1(%arg0: i32, %arg1: i32) -> (i32, i32, i32) {
    %c0_i32 = arith.constant 0 : i32
    %c0_i32_0 = arith.constant 0 : i32
    return %arg0, %arg1, %c0_i32 : i32, i32, i32
  }
  func.func @transform_2(%arg0: i32, %arg1: i32) -> (i32, i32) {
    %c0_i32 = arith.constant 0 : i32
    %c0_i32_0 = arith.constant 0 : i32
    %c0_i32_1 = arith.constant 0 : i32
    return %c0_i32, %c0_i32_0 : i32, i32
  }
  func.func @transform_3(%arg0: i32, %arg1: i32) -> (i32, i32, i32) {
    %c0_i32 = arith.constant 0 : i32
    %c0_i32_0 = arith.constant 0 : i32
    return %arg0, %c0_i32, %arg1 : i32, i32, i32
  }
}

module attributes {stable_mosaic.version = 11 : i64} {
  func.func @_attn_fold_kernel(%arg0: i32, %arg1: i32, %arg2: memref<4xf32, #tpu.memory_space<smem>>, %arg3: memref<1x64x16xf32, #tpu.memory_space<vmem>>, %arg4: memref<1x64x16xf32, #tpu.memory_space<vmem>>, %arg5: memref<16x16xf32, #tpu.memory_space<vmem>>, %arg6: memref<1x16x16xf32, #tpu.memory_space<vmem>>, %arg7: memref<4x4x4xf32, #tpu.memory_space<vmem>>, %arg8: memref<1x16xf32, #tpu.memory_space<vmem>>, %arg9: memref<1x16xf32, #tpu.memory_space<vmem>>) attributes {dimension_semantics = [#tpu.dimension_semantics<parallel>, #tpu.dimension_semantics<arbitrary>], iteration_bounds = array<i64: 2, 1>, scalar_prefetch = 0 : i64, scratch_operands = 3 : i64, tpu.core_type = #tpu.core_type<tc>, window_params = [{transform_indices = @transform_0, window_bounds = array<i64: 4>}, {transform_indices = @transform_1, window_bounds = array<i64: 1, 64, 16>}, {transform_indices = @transform_2, window_bounds = array<i64: 1, 64, 16>}, {pipeline_mode = #tpu.pipeline_mode<synchronous>, transform_indices = @transform_3, window_bounds = array<i64: 16, 16>}, {transform_indices = @transform_4, window_bounds = array<i64: 1, 16, 16>}]} {
    %c0_i32 = arith.constant 0 : i32
    %0 = arith.cmpi eq, %arg1, %c0_i32 : i32
    %1 = arith.extui %0 : i1 to i32
    %c0_i32_0 = arith.constant 0 : i32
    %2 = arith.cmpi ne, %1, %c0_i32_0 : i32
    scf.if %2 {
      %cst_42 = arith.constant 0.000000e+00 : f32
      %58 = vector.broadcast %cst_42 : f32 to vector<4x4x4xf32>
      %c0_43 = arith.constant 0 : index
      %c0_44 = arith.constant 0 : index
      %c0_45 = arith.constant 0 : index
      %59 = vector.load %arg7[%c0_43, %c0_44, %c0_45] : memref<4x4x4xf32, #tpu.memory_space<vmem>>, vector<4x4x4xf32>
      tpu.vector_store %arg7[%c0_43, %c0_44, %c0_45], %58 {strides = array<i32>} : memref<4x4x4xf32, #tpu.memory_space<vmem>>, vector<4x4x4xf32>,
      %cst_46 = arith.constant 0.000000e+00 : f32
      %60 = vector.broadcast %cst_46 : f32 to vector<1x16xf32>
      %c0_47 = arith.constant 0 : index
      %c0_48 = arith.constant 0 : index
      %61 = vector.load %arg8[%c0_47, %c0_48] : memref<1x16xf32, #tpu.memory_space<vmem>>, vector<1x16xf32>
      tpu.vector_store %arg8[%c0_47, %c0_48], %60 {strides = array<i32>} : memref<1x16xf32, #tpu.memory_space<vmem>>, vector<1x16xf32>,
      %cst_49 = arith.constant 0.000000e+00 : f32
      %62 = vector.broadcast %cst_49 : f32 to vector<1x16xf32>
      %c0_50 = arith.constant 0 : index
      %c0_51 = arith.constant 0 : index
      %63 = vector.load %arg9[%c0_50, %c0_51] : memref<1x16xf32, #tpu.memory_space<vmem>>, vector<1x16xf32>
      tpu.vector_store %arg9[%c0_50, %c0_51], %62 {strides = array<i32>} : memref<1x16xf32, #tpu.memory_space<vmem>>, vector<1x16xf32>,
    } else {
    }
    %c0 = arith.constant 0 : index
    %c0_1 = arith.constant 0 : index
    %c0_2 = arith.constant 0 : index
    %3 = vector.load %arg3[%c0, %c0_1, %c0_2] : memref<1x64x16xf32, #tpu.memory_space<vmem>>, vector<1x64x16xf32>
    %4 = vector.shape_cast %3 : vector<1x64x16xf32> to vector<64x16xf32>
    %c0_3 = arith.constant 0 : index
    %c0_4 = arith.constant 0 : index
    %c0_5 = arith.constant 0 : index
    %5 = vector.load %arg4[%c0_3, %c0_4, %c0_5] : memref<1x64x16xf32, #tpu.memory_space<vmem>>, vector<1x64x16xf32>
    %6 = vector.shape_cast %5 : vector<1x64x16xf32> to vector<64x16xf32>
    %c0_6 = arith.constant 0 : index
    %c0_7 = arith.constant 0 : index
    %7 = vector.load %arg8[%c0_6, %c0_7] : memref<1x16xf32, #tpu.memory_space<vmem>>, vector<1x16xf32>
    %8 = arith.mulf %4, %4 : vector<64x16xf32>
    %cst = arith.constant dense<0.000000e+00> : vector<16xf32>
    %9 = vector.multi_reduction <add>, %8, %cst [0] : vector<64x16xf32> to vector<16xf32>
    %10 = vector.shape_cast %9 : vector<16xf32> to vector<1x16xf32>
    %11 = arith.addf %7, %10 : vector<1x16xf32>
    %c0_8 = arith.constant 0 : index
    %c0_9 = arith.constant 0 : index
    %12 = vector.load %arg8[%c0_8, %c0_9] : memref<1x16xf32, #tpu.memory_space<vmem>>, vector<1x16xf32>
    tpu.vector_store %arg8[%c0_8, %c0_9], %11 {strides = array<i32>} : memref<1x16xf32, #tpu.memory_space<vmem>>, vector<1x16xf32>,
    %c0_10 = arith.constant 0 : index
    %c0_11 = arith.constant 0 : index
    %13 = vector.load %arg9[%c0_10, %c0_11] : memref<1x16xf32, #tpu.memory_space<vmem>>, vector<1x16xf32>
    %14 = arith.mulf %6, %6 : vector<64x16xf32>
    %cst_12 = arith.constant dense<0.000000e+00> : vector<16xf32>
    %15 = vector.multi_reduction <add>, %14, %cst_12 [0] : vector<64x16xf32> to vector<16xf32>
    %16 = vector.shape_cast %15 : vector<16xf32> to vector<1x16xf32>
    %17 = arith.addf %13, %16 : vector<1x16xf32>
    %c0_13 = arith.constant 0 : index
    %c0_14 = arith.constant 0 : index
    %18 = vector.load %arg9[%c0_13, %c0_14] : memref<1x16xf32, #tpu.memory_space<vmem>>, vector<1x16xf32>
    tpu.vector_store %arg9[%c0_13, %c0_14], %17 {strides = array<i32>} : memref<1x16xf32, #tpu.memory_space<vmem>>, vector<1x16xf32>,
    %c0_15 = arith.constant 0 : index
    %c0_16 = arith.constant 0 : index
    %c0_17 = arith.constant 0 : index
    %19 = vector.load %arg7[%c0_15, %c0_16, %c0_17] : memref<4x4x4xf32, #tpu.memory_space<vmem>>, vector<1x4x4xf32>
    %20 = vector.shape_cast %19 : vector<1x4x4xf32> to vector<4x4xf32>
    %21 = vector.extract_strided_slice %4 {offsets = [0, 0], sizes = [64, 4], strides = [1, 1]} : vector<64x16xf32> to vector<64x4xf32>
    %22 = vector.extract_strided_slice %6 {offsets = [0, 0], sizes = [64, 4], strides = [1, 1]} : vector<64x16xf32> to vector<64x4xf32>
    %cst_18 = arith.constant dense<0.000000e+00> : vector<4x4xf32>
    %23 = tpu.matmul %21, %22, %cst_18 {dimension_numbers = #tpu.dot_dimension_numbers<[0], [0], [1], [1], [0, 1, 1, 1], [], []>} : vector<64x4xf32>, vector<64x4xf32>, vector<4x4xf32> -> vector<4x4xf32>
    %24 = arith.addf %20, %23 : vector<4x4xf32>
    %c0_19 = arith.constant 0 : index
    %c0_20 = arith.constant 0 : index
    %c0_21 = arith.constant 0 : index
    %25 = vector.load %arg7[%c0_19, %c0_20, %c0_21] : memref<4x4x4xf32, #tpu.memory_space<vmem>>, vector<1x4x4xf32>
    %26 = vector.shape_cast %25 : vector<1x4x4xf32> to vector<4x4xf32>
    %27 = vector.shape_cast %24 : vector<4x4xf32> to vector<1x4x4xf32>
    tpu.vector_store %arg7[%c0_19, %c0_20, %c0_21], %27 {strides = array<i32>} : memref<4x4x4xf32, #tpu.memory_space<vmem>>, vector<1x4x4xf32>,
    %c1 = arith.constant 1 : index
    %c0_22 = arith.constant 0 : index
    %c0_23 = arith.constant 0 : index
    %28 = vector.load %arg7[%c1, %c0_22, %c0_23] : memref<4x4x4xf32, #tpu.memory_space<vmem>>, vector<1x4x4xf32>
    %29 = vector.shape_cast %28 : vector<1x4x4xf32> to vector<4x4xf32>
    %30 = vector.extract_strided_slice %4 {offsets = [0, 4], sizes = [64, 4], strides = [1, 1]} : vector<64x16xf32> to vector<64x4xf32>
    %31 = vector.extract_strided_slice %6 {offsets = [0, 4], sizes = [64, 4], strides = [1, 1]} : vector<64x16xf32> to vector<64x4xf32>
    %cst_24 = arith.constant dense<0.000000e+00> : vector<4x4xf32>
    %32 = tpu.matmul %30, %31, %cst_24 {dimension_numbers = #tpu.dot_dimension_numbers<[0], [0], [1], [1], [0, 1, 1, 1], [], []>} : vector<64x4xf32>, vector<64x4xf32>, vector<4x4xf32> -> vector<4x4xf32>
    %33 = arith.addf %29, %32 : vector<4x4xf32>
    %c1_25 = arith.constant 1 : index
    %c0_26 = arith.constant 0 : index
    %c0_27 = arith.constant 0 : index
    %34 = vector.load %arg7[%c1_25, %c0_26, %c0_27] : memref<4x4x4xf32, #tpu.memory_space<vmem>>, vector<1x4x4xf32>
    %35 = vector.shape_cast %34 : vector<1x4x4xf32> to vector<4x4xf32>
    %36 = vector.shape_cast %33 : vector<4x4xf32> to vector<1x4x4xf32>
    tpu.vector_store %arg7[%c1_25, %c0_26, %c0_27], %36 {strides = array<i32>} : memref<4x4x4xf32, #tpu.memory_space<vmem>>, vector<1x4x4xf32>,
    %c2 = arith.constant 2 : index
    %c0_28 = arith.constant 0 : index
    %c0_29 = arith.constant 0 : index
    %37 = vector.load %arg7[%c2, %c0_28, %c0_29] : memref<4x4x4xf32, #tpu.memory_space<vmem>>, vector<1x4x4xf32>
    %38 = vector.shape_cast %37 : vector<1x4x4xf32> to vector<4x4xf32>
    %39 = vector.extract_strided_slice %4 {offsets = [0, 8], sizes = [64, 4], strides = [1, 1]} : vector<64x16xf32> to vector<64x4xf32>
    %40 = vector.extract_strided_slice %6 {offsets = [0, 8], sizes = [64, 4], strides = [1, 1]} : vector<64x16xf32> to vector<64x4xf32>
    %cst_30 = arith.constant dense<0.000000e+00> : vector<4x4xf32>
    %41 = tpu.matmul %39, %40, %cst_30 {dimension_numbers = #tpu.dot_dimension_numbers<[0], [0], [1], [1], [0, 1, 1, 1], [], []>} : vector<64x4xf32>, vector<64x4xf32>, vector<4x4xf32> -> vector<4x4xf32>
    %42 = arith.addf %38, %41 : vector<4x4xf32>
    %c2_31 = arith.constant 2 : index
    %c0_32 = arith.constant 0 : index
    %c0_33 = arith.constant 0 : index
    %43 = vector.load %arg7[%c2_31, %c0_32, %c0_33] : memref<4x4x4xf32, #tpu.memory_space<vmem>>, vector<1x4x4xf32>
    %44 = vector.shape_cast %43 : vector<1x4x4xf32> to vector<4x4xf32>
    %45 = vector.shape_cast %42 : vector<4x4xf32> to vector<1x4x4xf32>
    tpu.vector_store %arg7[%c2_31, %c0_32, %c0_33], %45 {strides = array<i32>} : memref<4x4x4xf32, #tpu.memory_space<vmem>>, vector<1x4x4xf32>,
    %c3 = arith.constant 3 : index
    %c0_34 = arith.constant 0 : index
    %c0_35 = arith.constant 0 : index
    %46 = vector.load %arg7[%c3, %c0_34, %c0_35] : memref<4x4x4xf32, #tpu.memory_space<vmem>>, vector<1x4x4xf32>
    %47 = vector.shape_cast %46 : vector<1x4x4xf32> to vector<4x4xf32>
    %48 = vector.extract_strided_slice %4 {offsets = [0, 12], sizes = [64, 4], strides = [1, 1]} : vector<64x16xf32> to vector<64x4xf32>
    %49 = vector.extract_strided_slice %6 {offsets = [0, 12], sizes = [64, 4], strides = [1, 1]} : vector<64x16xf32> to vector<64x4xf32>
    %cst_36 = arith.constant dense<0.000000e+00> : vector<4x4xf32>
    %50 = tpu.matmul %48, %49, %cst_36 {dimension_numbers = #tpu.dot_dimension_numbers<[0], [0], [1], [1], [0, 1, 1, 1], [], []>} : vector<64x4xf32>, vector<64x4xf32>, vector<4x4xf32> -> vector<4x4xf32>
    %51 = arith.addf %47, %50 : vector<4x4xf32>
    %c3_37 = arith.constant 3 : index
    %c0_38 = arith.constant 0 : index
    %c0_39 = arith.constant 0 : index
    %52 = vector.load %arg7[%c3_37, %c0_38, %c0_39] : memref<4x4x4xf32, #tpu.memory_space<vmem>>, vector<1x4x4xf32>
    %53 = vector.shape_cast %52 : vector<1x4x4xf32> to vector<4x4xf32>
    %54 = vector.shape_cast %51 : vector<4x4xf32> to vector<1x4x4xf32>
    tpu.vector_store %arg7[%c3_37, %c0_38, %c0_39], %54 {strides = array<i32>} : memref<4x4x4xf32, #tpu.memory_space<vmem>>, vector<1x4x4xf32>,
    %c0_i32_40 = arith.constant 0 : i32
    %55 = arith.cmpi eq, %arg1, %c0_i32_40 : i32
    %56 = arith.extui %55 : i1 to i32
    %c0_i32_41 = arith.constant 0 : i32
    %57 = arith.cmpi ne, %56, %c0_i32_41 : i32
    scf.if %57 {
      %c0_42 = arith.constant 0 : index
      %c0_43 = arith.constant 0 : index
      %58 = vector.load %arg8[%c0_42, %c0_43] : memref<1x16xf32, #tpu.memory_space<vmem>>, vector<1x16xf32>
      %cst_44 = arith.constant 1.000000e-24 : f32
      %59 = vector.broadcast %cst_44 : f32 to vector<1x16xf32>
      %60 = arith.maximumf %58, %59 : vector<1x16xf32>
      %61 = math.rsqrt %60 : vector<1x16xf32>
      %c0_45 = arith.constant 0 : index
      %c0_46 = arith.constant 0 : index
      %62 = vector.load %arg9[%c0_45, %c0_46] : memref<1x16xf32, #tpu.memory_space<vmem>>, vector<1x16xf32>
      %cst_47 = arith.constant 1.000000e-24 : f32
      %63 = vector.broadcast %cst_47 : f32 to vector<1x16xf32>
      %64 = arith.maximumf %62, %63 : vector<1x16xf32>
      %65 = math.rsqrt %64 : vector<1x16xf32>
      %c0_48 = arith.constant 0 : index
      %c0_49 = arith.constant 0 : index
      %66 = vector.load %arg5[%c0_48, %c0_49] : memref<16x16xf32, #tpu.memory_space<vmem>>, vector<16x16xf32>
      %c0_50 = arith.constant 0 : index
      %c0_51 = arith.constant 0 : index
      %c0_52 = arith.constant 0 : index
      %67 = vector.load %arg7[%c0_50, %c0_51, %c0_52] : memref<4x4x4xf32, #tpu.memory_space<vmem>>, vector<1x4x4xf32>
      %68 = vector.shape_cast %67 : vector<1x4x4xf32> to vector<4x4xf32>
      %69 = vector.extract_strided_slice %61 {offsets = [0, 0], sizes = [1, 4], strides = [1, 1]} : vector<1x16xf32> to vector<1x4xf32>
      %70 = tpu.transpose %69, [1, 0] : vector<1x4xf32> -> vector<4x1xf32>
      %71 = vector.broadcast %70 : vector<4x1xf32> to vector<4x4xf32>
      %72 = arith.mulf %68, %71 : vector<4x4xf32>
      %73 = vector.extract_strided_slice %65 {offsets = [0, 0], sizes = [1, 4], strides = [1, 1]} : vector<1x16xf32> to vector<1x4xf32>
      %74 = vector.broadcast %73 : vector<1x4xf32> to vector<4x4xf32>
      %75 = arith.mulf %72, %74 : vector<4x4xf32>
      %c0_53 = arith.constant 0 : index
      %76 = memref.load %arg2[%c0_53] : memref<4xf32, #tpu.memory_space<smem>>
      %77 = vector.broadcast %76 : f32 to vector<4x4xf32>
      %78 = arith.mulf %75, %77 : vector<4x4xf32>
      %cst_54 = arith.constant dense<0xFF800000> : vector<4xf32>
      %79 = vector.multi_reduction <maximumf>, %78, %cst_54 [1] : vector<4x4xf32> to vector<4xf32>
      %80 = vector.shape_cast %79 : vector<4xf32> to vector<4x1xf32>
      %81 = vector.broadcast %80 : vector<4x1xf32> to vector<4x4xf32>
      %82 = arith.subf %78, %81 : vector<4x4xf32>
      %83 = math.exp %82 : vector<4x4xf32>
      %cst_55 = arith.constant dense<0.000000e+00> : vector<4xf32>
      %84 = vector.multi_reduction <add>, %83, %cst_55 [1] : vector<4x4xf32> to vector<4xf32>
      %85 = vector.shape_cast %84 : vector<4xf32> to vector<4x1xf32>
      %86 = tpu.reciprocal %85 {approx = true} : vector<4x1xf32> -> vector<4x1xf32>
      %87 = vector.broadcast %86 : vector<4x1xf32> to vector<4x4xf32>
      %88 = arith.mulf %83, %87 : vector<4x4xf32>
      %89 = vector.extract_strided_slice %66 {offsets = [0, 0], sizes = [4, 16], strides = [1, 1]} : vector<16x16xf32> to vector<4x16xf32>
      %cst_56 = arith.constant dense<0.000000e+00> : vector<16x4xf32>
      %90 = tpu.matmul %89, %88, %cst_56 {dimension_numbers = #tpu.dot_dimension_numbers<[0], [0], [1], [1], [0, 1, 1, 1], [], []>} : vector<4x16xf32>, vector<4x4xf32>, vector<16x4xf32> -> vector<16x4xf32>
      %c0_57 = arith.constant 0 : index
      %c0_58 = arith.constant 0 : index
      %c0_59 = arith.constant 0 : index
      %91 = vector.load %arg6[%c0_57, %c0_58, %c0_59] : memref<1x16x16xf32, #tpu.memory_space<vmem>>, vector<1x16x4xf32>
      %92 = vector.shape_cast %91 : vector<1x16x4xf32> to vector<16x4xf32>
      %93 = vector.shape_cast %90 : vector<16x4xf32> to vector<1x16x4xf32>
      tpu.vector_store %arg6[%c0_57, %c0_58, %c0_59], %93 {strides = array<i32>} : memref<1x16x16xf32, #tpu.memory_space<vmem>>, vector<1x16x4xf32>,
      %c1_60 = arith.constant 1 : index
      %c0_61 = arith.constant 0 : index
      %c0_62 = arith.constant 0 : index
      %94 = vector.load %arg7[%c1_60, %c0_61, %c0_62] : memref<4x4x4xf32, #tpu.memory_space<vmem>>, vector<1x4x4xf32>
      %95 = vector.shape_cast %94 : vector<1x4x4xf32> to vector<4x4xf32>
      %96 = vector.extract_strided_slice %61 {offsets = [0, 4], sizes = [1, 4], strides = [1, 1]} : vector<1x16xf32> to vector<1x4xf32>
      %97 = tpu.transpose %96, [1, 0] : vector<1x4xf32> -> vector<4x1xf32>
      %98 = vector.broadcast %97 : vector<4x1xf32> to vector<4x4xf32>
      %99 = arith.mulf %95, %98 : vector<4x4xf32>
      %100 = vector.extract_strided_slice %65 {offsets = [0, 4], sizes = [1, 4], strides = [1, 1]} : vector<1x16xf32> to vector<1x4xf32>
      %101 = vector.broadcast %100 : vector<1x4xf32> to vector<4x4xf32>
      %102 = arith.mulf %99, %101 : vector<4x4xf32>
      %c1_63 = arith.constant 1 : index
      %103 = memref.load %arg2[%c1_63] : memref<4xf32, #tpu.memory_space<smem>>
      %104 = vector.broadcast %103 : f32 to vector<4x4xf32>
      %105 = arith.mulf %102, %104 : vector<4x4xf32>
      %cst_64 = arith.constant dense<0xFF800000> : vector<4xf32>
      %106 = vector.multi_reduction <maximumf>, %105, %cst_64 [1] : vector<4x4xf32> to vector<4xf32>
      %107 = vector.shape_cast %106 : vector<4xf32> to vector<4x1xf32>
      %108 = vector.broadcast %107 : vector<4x1xf32> to vector<4x4xf32>
      %109 = arith.subf %105, %108 : vector<4x4xf32>
      %110 = math.exp %109 : vector<4x4xf32>
      %cst_65 = arith.constant dense<0.000000e+00> : vector<4xf32>
      %111 = vector.multi_reduction <add>, %110, %cst_65 [1] : vector<4x4xf32> to vector<4xf32>
      %112 = vector.shape_cast %111 : vector<4xf32> to vector<4x1xf32>
      %113 = tpu.reciprocal %112 {approx = true} : vector<4x1xf32> -> vector<4x1xf32>
      %114 = vector.broadcast %113 : vector<4x1xf32> to vector<4x4xf32>
      %115 = arith.mulf %110, %114 : vector<4x4xf32>
      %116 = vector.extract_strided_slice %66 {offsets = [4, 0], sizes = [4, 16], strides = [1, 1]} : vector<16x16xf32> to vector<4x16xf32>
      %cst_66 = arith.constant dense<0.000000e+00> : vector<16x4xf32>
      %117 = tpu.matmul %116, %115, %cst_66 {dimension_numbers = #tpu.dot_dimension_numbers<[0], [0], [1], [1], [0, 1, 1, 1], [], []>} : vector<4x16xf32>, vector<4x4xf32>, vector<16x4xf32> -> vector<16x4xf32>
      %c0_67 = arith.constant 0 : index
      %c0_68 = arith.constant 0 : index
      %c4 = arith.constant 4 : index
      %118 = vector.load %arg6[%c0_67, %c0_68, %c4] : memref<1x16x16xf32, #tpu.memory_space<vmem>>, vector<1x16x4xf32>
      %119 = vector.shape_cast %118 : vector<1x16x4xf32> to vector<16x4xf32>
      %120 = vector.shape_cast %117 : vector<16x4xf32> to vector<1x16x4xf32>
      tpu.vector_store %arg6[%c0_67, %c0_68, %c4], %120 {strides = array<i32>} : memref<1x16x16xf32, #tpu.memory_space<vmem>>, vector<1x16x4xf32>,
      %c2_69 = arith.constant 2 : index
      %c0_70 = arith.constant 0 : index
      %c0_71 = arith.constant 0 : index
      %121 = vector.load %arg7[%c2_69, %c0_70, %c0_71] : memref<4x4x4xf32, #tpu.memory_space<vmem>>, vector<1x4x4xf32>
      %122 = vector.shape_cast %121 : vector<1x4x4xf32> to vector<4x4xf32>
      %123 = vector.extract_strided_slice %61 {offsets = [0, 8], sizes = [1, 4], strides = [1, 1]} : vector<1x16xf32> to vector<1x4xf32>
      %124 = tpu.transpose %123, [1, 0] : vector<1x4xf32> -> vector<4x1xf32>
      %125 = vector.broadcast %124 : vector<4x1xf32> to vector<4x4xf32>
      %126 = arith.mulf %122, %125 : vector<4x4xf32>
      %127 = vector.extract_strided_slice %65 {offsets = [0, 8], sizes = [1, 4], strides = [1, 1]} : vector<1x16xf32> to vector<1x4xf32>
      %128 = vector.broadcast %127 : vector<1x4xf32> to vector<4x4xf32>
      %129 = arith.mulf %126, %128 : vector<4x4xf32>
      %c2_72 = arith.constant 2 : index
      %130 = memref.load %arg2[%c2_72] : memref<4xf32, #tpu.memory_space<smem>>
      %131 = vector.broadcast %130 : f32 to vector<4x4xf32>
      %132 = arith.mulf %129, %131 : vector<4x4xf32>
      %cst_73 = arith.constant dense<0xFF800000> : vector<4xf32>
      %133 = vector.multi_reduction <maximumf>, %132, %cst_73 [1] : vector<4x4xf32> to vector<4xf32>
      %134 = vector.shape_cast %133 : vector<4xf32> to vector<4x1xf32>
      %135 = vector.broadcast %134 : vector<4x1xf32> to vector<4x4xf32>
      %136 = arith.subf %132, %135 : vector<4x4xf32>
      %137 = math.exp %136 : vector<4x4xf32>
      %cst_74 = arith.constant dense<0.000000e+00> : vector<4xf32>
      %138 = vector.multi_reduction <add>, %137, %cst_74 [1] : vector<4x4xf32> to vector<4xf32>
      %139 = vector.shape_cast %138 : vector<4xf32> to vector<4x1xf32>
      %140 = tpu.reciprocal %139 {approx = true} : vector<4x1xf32> -> vector<4x1xf32>
      %141 = vector.broadcast %140 : vector<4x1xf32> to vector<4x4xf32>
      %142 = arith.mulf %137, %141 : vector<4x4xf32>
      %143 = vector.extract_strided_slice %66 {offsets = [8, 0], sizes = [4, 16], strides = [1, 1]} : vector<16x16xf32> to vector<4x16xf32>
      %cst_75 = arith.constant dense<0.000000e+00> : vector<16x4xf32>
      %144 = tpu.matmul %143, %142, %cst_75 {dimension_numbers = #tpu.dot_dimension_numbers<[0], [0], [1], [1], [0, 1, 1, 1], [], []>} : vector<4x16xf32>, vector<4x4xf32>, vector<16x4xf32> -> vector<16x4xf32>
      %c0_76 = arith.constant 0 : index
      %c0_77 = arith.constant 0 : index
      %c8 = arith.constant 8 : index
      %145 = vector.load %arg6[%c0_76, %c0_77, %c8] : memref<1x16x16xf32, #tpu.memory_space<vmem>>, vector<1x16x4xf32>
      %146 = vector.shape_cast %145 : vector<1x16x4xf32> to vector<16x4xf32>
      %147 = vector.shape_cast %144 : vector<16x4xf32> to vector<1x16x4xf32>
      tpu.vector_store %arg6[%c0_76, %c0_77, %c8], %147 {strides = array<i32>} : memref<1x16x16xf32, #tpu.memory_space<vmem>>, vector<1x16x4xf32>,
      %c3_78 = arith.constant 3 : index
      %c0_79 = arith.constant 0 : index
      %c0_80 = arith.constant 0 : index
      %148 = vector.load %arg7[%c3_78, %c0_79, %c0_80] : memref<4x4x4xf32, #tpu.memory_space<vmem>>, vector<1x4x4xf32>
      %149 = vector.shape_cast %148 : vector<1x4x4xf32> to vector<4x4xf32>
      %150 = vector.extract_strided_slice %61 {offsets = [0, 12], sizes = [1, 4], strides = [1, 1]} : vector<1x16xf32> to vector<1x4xf32>
      %151 = tpu.transpose %150, [1, 0] : vector<1x4xf32> -> vector<4x1xf32>
      %152 = vector.broadcast %151 : vector<4x1xf32> to vector<4x4xf32>
      %153 = arith.mulf %149, %152 : vector<4x4xf32>
      %154 = vector.extract_strided_slice %65 {offsets = [0, 12], sizes = [1, 4], strides = [1, 1]} : vector<1x16xf32> to vector<1x4xf32>
      %155 = vector.broadcast %154 : vector<1x4xf32> to vector<4x4xf32>
      %156 = arith.mulf %153, %155 : vector<4x4xf32>
      %c3_81 = arith.constant 3 : index
      %157 = memref.load %arg2[%c3_81] : memref<4xf32, #tpu.memory_space<smem>>
      %158 = vector.broadcast %157 : f32 to vector<4x4xf32>
      %159 = arith.mulf %156, %158 : vector<4x4xf32>
      %cst_82 = arith.constant dense<0xFF800000> : vector<4xf32>
      %160 = vector.multi_reduction <maximumf>, %159, %cst_82 [1] : vector<4x4xf32> to vector<4xf32>
      %161 = vector.shape_cast %160 : vector<4xf32> to vector<4x1xf32>
      %162 = vector.broadcast %161 : vector<4x1xf32> to vector<4x4xf32>
      %163 = arith.subf %159, %162 : vector<4x4xf32>
      %164 = math.exp %163 : vector<4x4xf32>
      %cst_83 = arith.constant dense<0.000000e+00> : vector<4xf32>
      %165 = vector.multi_reduction <add>, %164, %cst_83 [1] : vector<4x4xf32> to vector<4xf32>
      %166 = vector.shape_cast %165 : vector<4xf32> to vector<4x1xf32>
      %167 = tpu.reciprocal %166 {approx = true} : vector<4x1xf32> -> vector<4x1xf32>
      %168 = vector.broadcast %167 : vector<4x1xf32> to vector<4x4xf32>
      %169 = arith.mulf %164, %168 : vector<4x4xf32>
      %170 = vector.extract_strided_slice %66 {offsets = [12, 0], sizes = [4, 16], strides = [1, 1]} : vector<16x16xf32> to vector<4x16xf32>
      %cst_84 = arith.constant dense<0.000000e+00> : vector<16x4xf32>
      %171 = tpu.matmul %170, %169, %cst_84 {dimension_numbers = #tpu.dot_dimension_numbers<[0], [0], [1], [1], [0, 1, 1, 1], [], []>} : vector<4x16xf32>, vector<4x4xf32>, vector<16x4xf32> -> vector<16x4xf32>
      %c0_85 = arith.constant 0 : index
      %c0_86 = arith.constant 0 : index
      %c12 = arith.constant 12 : index
      %172 = vector.load %arg6[%c0_85, %c0_86, %c12] : memref<1x16x16xf32, #tpu.memory_space<vmem>>, vector<1x16x4xf32>
      %173 = vector.shape_cast %172 : vector<1x16x4xf32> to vector<16x4xf32>
      %174 = vector.shape_cast %171 : vector<16x4xf32> to vector<1x16x4xf32>
      tpu.vector_store %arg6[%c0_85, %c0_86, %c12], %174 {strides = array<i32>} : memref<1x16x16xf32, #tpu.memory_space<vmem>>, vector<1x16x4xf32>,
    } else {
    }
    return
  }
  func.func @transform_0(%arg0: i32, %arg1: i32) -> i32 {
    %c0_i32 = arith.constant 0 : i32
    %c0_i32_0 = arith.constant 0 : i32
    return %c0_i32 : i32
  }
  func.func @transform_1(%arg0: i32, %arg1: i32) -> (i32, i32, i32) {
    %c0_i32 = arith.constant 0 : i32
    %c0_i32_0 = arith.constant 0 : i32
    return %arg0, %arg1, %c0_i32 : i32, i32, i32
  }
  func.func @transform_2(%arg0: i32, %arg1: i32) -> (i32, i32, i32) {
    %c0_i32 = arith.constant 0 : i32
    %c0_i32_0 = arith.constant 0 : i32
    return %arg0, %arg1, %c0_i32 : i32, i32, i32
  }
  func.func @transform_3(%arg0: i32, %arg1: i32) -> (i32, i32) {
    %c0_i32 = arith.constant 0 : i32
    %c0_i32_0 = arith.constant 0 : i32
    %c0_i32_1 = arith.constant 0 : i32
    return %c0_i32, %c0_i32_0 : i32, i32
  }
  func.func @transform_4(%arg0: i32, %arg1: i32) -> (i32, i32, i32) {
    %c0_i32 = arith.constant 0 : i32
    %c0_i32_0 = arith.constant 0 : i32
    %c0_i32_1 = arith.constant 0 : i32
    return %arg0, %c0_i32, %c0_i32_0 : i32, i32, i32
  }
}

</mosaic_0001>

<bundles_post_ra>
// kernel: cross_trans_attention.7
= control target key start
LH: loop header
LB: loop body
LE: loop exit
PB: predicated region body
PF: predicated region fallthrough
CT: control target
= control target key end

     0   :  { %s506_s12 = smov 0   ;;  %s508_s13 = smov 0   ;;  %s570_s0 = inlined_call_operand.vmem [shape: f32[2,16,16], index: 0, kind: input, shape index: {}]   ;;  %s571_s1 = inlined_call_operand.vmem [shape: f32[2,64,16], index: 1, kind: input, shape index: {}]   ;;  %s572_s2 = inlined_call_operand.vmem [shape: f32[16,1], index: 2, kind: input, shape index: {}]   ;;  %s573_s3 = inlined_call_operand.vmem [shape: f32[2,16,64], index: 3, kind: output, shape index: {}]  }
   0x1   :  { %s510_s14 = smov 0  }
   0x2 LB: > { %s25_s15 = sadd.s32 1, %s479_s13  ;;  %p405_p0 = scmp.ge.s32.totalorder %s483_s14, 1  ;;  %s483_s14 = sphi %s510_s14, %s13_s14   ;;  %s479_s13 = sphi %s508_s13, %s575_s13   ;;  %s475_s12 = sphi %s506_s12, %s574_s12  }
   0x3   : > { %p27_p1 = scmp.ge.s32.totalorder %s25_s15, 2  ;;  %p168_p2 = scmp.lt.s32.totalorder %s483_s14, 3 }
   0x5   : > { %s577_s15 = smov (%p27_p1, %s25_s15), 0  ;;  %p169_p3 = pnand %p405_p0, %p168_p2 }
   0x6   : > { %p204_p4 = scmp.lt.s32.totalorder (!%p169_p3), %s475_s12, 1 }
   0x7   : > { %172 = sbr.rel (%p169_p3) target bundleno = 177 (0xb1), region = 32 }
   0xc   : > { %v237_v0 = vld [vmem:[%s572_s2] sm:$0xff]  ;;  %v485_v1 = vmov 0   ;;  %s579_s12 = smov (!%p204_p4, %s475_s12), 1  ;;  %vm249_vm0 = vcmask 130048   ;;  %v238_v4 = vld [vmem:[%s572_s2 + $0x8] sm:$0xff]  ;;  %vm303_vm1 = vcmask 523264  }
   0xd   : > { %460 = vset.pattern.permute.xlu0 %v485_v1  ;;  %s425_s18 = sshll.u32 %s579_s12, 6  ;;  %s424_s24 = sshll.u32 %s579_s12, 4 }
   0xe   : > { %241 = vperm.xlu0 %460, %v237_v0   ;;  %s217_s21 = scalar_lea.vmem %s571_s1, %s425_s18  ;;  %s208_s27 = scalar_lea.vmem %s570_s0, %s424_s24 }
   0xf   : > { %v236_v2 = vld [vmem:[%s217_s21 + $0x38] sm:$0xff]  ;;  %v235_v3 = vld [vmem:[%s217_s21 + $0x30] sm:$0xff]  ;;  %v234_v5 = vld [vmem:[%s217_s21 + $0x28] sm:$0xff]  ;;  %s226_s30 = scalar_lea.vmem %s573_s3, %s424_s24 }
  0x10   : > { %412 = vmatpush.xpose.msk.msra.mxu0 %vm249_vm0, %v236_v2  ;;  %427 = vmatpush.xpose.msk.msra.mxu1 %vm249_vm0, %v236_v2  ;;  %v233_v6 = vld [vmem:[%s217_s21 + $0x20] sm:$0xff]  ;;  %v232_v7 = vld [vmem:[%s217_s21 + $0x18] sm:$0xff]  ;;  %v231_v8 = vld [vmem:[%s217_s21 + $0x10] sm:$0xff] }
  0x11   : > { %v230_v9 = vld [vmem:[%s217_s21 + $0x8] sm:$0xff]  ;;  %v229_v10 = vld [vmem:[%s217_s21] sm:$0xff] }
  0x12   : > { %v227_v11 = vld [vmem:[%s208_s27] sm:$0xff]  ;;  %v228_v12 = vld [vmem:[%s208_s27 + $0x8] sm:$0xff] }
  0x14   : > { %413 = vmatpush.xpose.msk.msra.mxu0 %vm249_vm0, %v235_v3  ;;  %428 = vmatpush.xpose.msk.msra.mxu1 %vm249_vm0, %v235_v3 }
  0x16   : > { %246 = vperm.xlu0 %460, %v238_v4  }
  0x18   : > { %414 = vmatpush.xpose.msk.msra.mxu0 %vm249_vm0, %v234_v5  ;;  %429 = vmatpush.xpose.msk.msra.mxu1 %vm249_vm0, %v234_v5 }
  0x1c   : > { %415 = vmatpush.xpose.msk.msra.mxu0 %vm249_vm0, %v233_v6  ;;  %430 = vmatpush.xpose.msk.msra.mxu1 %vm249_vm0, %v233_v6 }
  0x20   : > { %416 = vmatpush.xpose.msk.msra.mxu0 %vm249_vm0, %v232_v7  ;;  %431 = vmatpush.xpose.msk.msra.mxu1 %vm249_vm0, %v232_v7 }
  0x24   : > { %417 = vmatpush.xpose.msk.msra.mxu0 %vm249_vm0, %v231_v8  ;;  %432 = vmatpush.xpose.msk.msra.mxu1 %vm249_vm0, %v231_v8 }
  0x28   : > { %418 = vmatpush.xpose.msk.msra.mxu0 %vm249_vm0, %v230_v9  ;;  %433 = vmatpush.xpose.msk.msra.mxu1 %vm249_vm0, %v230_v9 }
  0x2c   : > { %419 = vmatpush.xpose.msk.msra.mxu0 %vm249_vm0, %v229_v10  ;;  %434 = vmatpush.xpose.msk.msra.mxu1 %vm249_vm0, %v229_v10 }
  0x2f   : > { %420 = vmatmul.msk.f32.vlgmr.msra.gmra.mxu0 %vm249_vm0, %v227_v11  ;;  %421 = vmatmul.msk.f32.vlgmr.msra.gmra.mxu1 %vm249_vm0, %v228_v12 }
  0x80   : > { %v242_v13 = vpop.permute.xlu0 %241 }
  0x88   : > { %v247_v14 = vpop.permute.xlu0 %246 }
  0xac   : > { %v297_v15 = vpop.f32.mrf.mxu0  ;;  %v300_v16 = vpop.f32.mrf.mxu1 }
  0xad   : > { %v298_v17 = vadd.f32 %v297_v15, %v242_v13  ;;  %v301_v18 = vadd.f32 %v300_v16, %v247_v14 }
  0xaf   : > { %304 = vst.msk [vmem:[%s226_s30] sm:$0xff] %vm303_vm1, %v298_v17 }
  0xb0   : > { %305 = vst.msk [vmem:[%s226_s30 + $0x8] sm:$0xff] %vm303_vm1, %v301_v18 }
  0xb1 PF: > { %s13_s14 = sadd.s32 1, %s483_s14   ;;  %s574_s12 = smov %s479_s13 }
  0xb2   : > { %p10_p5 = scmp.ge.s32.totalorder %s13_s14, 4   ;;  %s575_s13 = smov %s577_s15 }
  0xb4   :  { %12 = sbr.rel (!%p10_p5) target bundleno = 2 (0x2), region = 65 }

// kernel: cross_trans_attention.4
= control target key start
LH: loop header
LB: loop body
LE: loop exit
PB: predicated region body
PF: predicated region fallthrough
CT: control target
= control target key end

     0   :  { %10 = vsyncpa [#allocation4], 0  ;;  %s1429_s0 = inlined_call_operand.hbm [shape: f32[2,64,16], index: 0, kind: input, shape index: {}]   ;;  %s1430_s1 = inlined_call_operand.vmem [shape: f32[1,16,16], index: 1, kind: input, shape index: {}]   ;;  %s1431_s2 = inlined_call_operand.vmem [shape: f32[1,1,16], index: 2, kind: input, shape index: {}]   ;;  %s1432_s3 = inlined_call_operand.vmem [shape: f32[1,9,16], index: 3, kind: input, shape index: {}]   ;;  %s1433_s4 = inlined_call_operand.vmem [shape: f32[1,1,16], index: 4, kind: input, shape index: {}]   ;;  %s1434_s5 = inlined_call_operand.vmem [shape: f32[2,8,8,16], index: 5, kind: output, shape index: {}]  }
   0x1   :  { %12 = vsyncpa [#allocation4 + $0x1], 0  ;;  %s1066_s18 = smov 0   ;;  %s1068_s19 = smov 0  }
   0x2   :  { %s1070_s20 = smov 0   ;;  %s1072_s21 = smov 0  }
   0x3   :  { %s1074_s22 = smov 0   ;;  %s1076_s23 = smov 0  }
   0x4 LB: > { %s849_s24 = sadd.s32 4294967295, %s1031_s23   ;;  %s30_s25 = sadd.s32 1, %s1027_s22  ;;  %s1031_s23 = sphi %s1076_s23, %s18_s23   ;;  %s1027_s22 = sphi %s1074_s22, %s1441_s22   ;;  %s1023_s21 = sphi %s1072_s21, %s1440_s21   ;;  %s1019_s20 = sphi %s1070_s20, %s1439_s20   ;;  %s1015_s19 = sphi %s1068_s19, %s1438_s19   ;;  %s1011_s18 = sphi %s1066_s18, %s1437_s18  }
   0x5   : > { %p32_p0 = scmp.ge.s32.totalorder %s30_s25, 2  ;;  %s37_s26 = sadd.s32 1, %s1019_s20 }
   0x6   : > { %p44_p1 = scmp.ne.s32.totalorder %s1019_s20, %s1015_s19  ;;  %p45_p2 = scmp.eq.s32.totalorder %s1031_s23, 0 }
   0x7   : > { %s1443_s25 = smov (%p32_p0, %s30_s25), 0  ;;  %p50_p4 = scmp.ne.s32.totalorder %s1015_s19, %s1011_s18 }
   0x8   : > { %p1102_p3 = por %p45_p2, %p44_p1  ;;  %s34_s28 = ssub.s32 %s1027_s22, %s1443_s25 }
   0x9   : > { %p51_p5 = scmp.eq.s32.totalorder %s849_s24, 0  ;;  %p35_p6 = scmp.eq.s32.totalorder %s34_s28, 0 }
   0xa   : > { %p888_p8 = scmp.lt.s32.totalorder %s1031_s23, 2  ;;  %s234_s6 = sand.u32 1, %s1019_s20  }
   0xb   : > { %p1109_p7 = por %p51_p5, %p50_p4  ;;  %s874_s7 = sshll.u32 %s1027_s22, 6 }
   0xc   : > { %s1115_s30 = scalar_select %p35_p6, %s1019_s20, %s37_s26  }
   0xd   : > { %s857_s8 = sshll.u32 %s234_s6, 6  ;;  %s243_s11 = scalar_lea.hbm %s1429_s0, %s874_s7 }
   0xe   : > { %s244_s12 = sshll.u32 %s243_s11, 4  ;;  %s238_s13 = scalar_lea.vmem [#allocation3], %s857_s8  ;;  %s245_s12 = int_to_ptr.hbm [resolvable:$true] %s244_s12 }
   0xf   : > { %s246_s14 = sshll.u32 %s238_s13, 4  ;;  %p885_p9 = pnand %p888_p8, %p1102_p3  ;;  %s247_s14 = int_to_ptr.vmem [resolvable:$true] %s246_s14 }
  0x10   : > { %p860_p10 = scmp.ge.s32.totalorder %s1031_s23, 1  ;;  %p254_p11 = scmp.lt.s32.totalorder %s1031_s23, 3 }
  0x11   : > { %s235_s15 = scalar_lea.sflag [#allocation4], %s234_s6  ;;  %s1033_s16 = smov 128  }
  0x12   : > { %s1034_s17 = smov 8   ;;  %p255_p12 = pnand %p860_p10, %p254_p11 }
  0x13   : > { %887 = dma.hbm_to_vmem [thread:$0]  (!%p885_p9), %s245_s12, 1024, %s247_s14, %s235_s15, %s1033_s16, %s1033_s16, %s1034_s17  }
  0x14   : > { %258 = sbr.rel (%p255_p12) target bundleno = 212 (0xd4), region = 40  ;;  %s260_s18 = sand.u32 (!%p255_p12), 1, %s1015_s19  }
  0x15   : > { %s861_s24 = sshll.u32 (!%p255_p12), %s260_s18, 6  ;;  %s261_s26 = scalar_lea.sflag (!%p255_p12), [#allocation4], %s260_s18 }
  0x16   : > { %s1127_s28 = scalar_lea.vmem (!%p255_p12), [#allocation3], %s861_s24 }
  0x19   : > { %1006 = dma.done.wait (%p1109_p7), %s261_s26, 1024  }
  0x1a   : > { %1008 = vsyncadd (%p1109_p7), %s261_s26, 4294966272  ;;  %vm335_vm0 = vcmask 130048   ;;  %vm337_vm1 = vcmask 123904   ;;  %vm342_vm2 = vcmask 122880   ;;  %v1035_v0 = vmov 0.0   ;;  %v372_v1 = vld [vmem:[%s1430_s1 + $0x8] sm:$0xff] }
  0x1b   : > { %336 = vst.msk [vmem:[#allocation2] sm:$0xff] %vm335_vm0, %v1035_v0  ;;  %v371_v2 = vld [vmem:[%s1430_s1] sm:$0xff]  ;;  %415 = vmatpush.msra.mxu0 %v372_v1  ;;  %876 = vmatpush.msra.mxu1 %v372_v1  ;;  %v365_v4 = vld [vmem:[%s1127_s28 + $0x10] sm:$0xff]  ;;  %v364_v7 = vld [vmem:[%s1127_s28 + $0x8] sm:$0xff]  ;;  %p327_p13 = scmp.lt.s32.totalorder %s1023_s21, 1 }
  0x1c   : > { %338 = vst.msk [vmem:[#allocation2 + $0x8] sm:$0x3] %vm337_vm1, %v1035_v0  ;;  %877 = vmatpush.msra.mxu2 %v372_v1  ;;  %878 = vmatpush.msra.mxu3 %v372_v1  ;;  %v363_v3 = vld [vmem:[%s1127_s28] sm:$0xff]  ;;  %v369_v6 = vld [vmem:[%s1127_s28 + $0x30] sm:$0xff]  ;;  %v366_v8 = vld [vmem:[%s1127_s28 + $0x18] sm:$0xff] }
  0x1d   : > { %343 = vst.msk [vmem:[#allocation2] sm:$0x1] %vm342_vm2, %v1035_v0  ;;  %416 = vmatpush.msra.mxu0 %v371_v2  ;;  %879 = vmatpush.msra.mxu1 %v371_v2  ;;  %v367_v5 = vld [vmem:[%s1127_s28 + $0x20] sm:$0xff]  ;;  %v368_v9 = vld [vmem:[%s1127_s28 + $0x28] sm:$0xff]  ;;  %v370_v10 = vld [vmem:[%s1127_s28 + $0x38] sm:$0xff]  ;;  %s1445_s21 = smov (!%p327_p13, %s1023_s21), 1 }
  0x1e   : > { %344 = vst.msk [vmem:[#allocation2 + $0x10] sm:$0x1] %vm342_vm2, %v1035_v0  ;;  %880 = vmatpush.msra.mxu2 %v371_v2  ;;  %881 = vmatpush.msra.mxu3 %v371_v2  ;;  %v940_v11 = vld [vmem:[%s1431_s2] ss:$0 sm:$0xff]  ;;  %v1188_v13 = vld [vmem:[%s1432_s3 + $0x1] ss:$0 sm:$0xff] }
  0x1f   : > { %353 = vst.msk [vmem:[#allocation2 + $0x9] sm:$0x1] %vm342_vm2, %v1035_v0  ;;  %864 = vmatmul.msk.f32.vlgmr.msra.gmra.mxu0 %vm335_vm0, %v363_v3  ;;  %866 = vmatmul.msk.f32.vlgmr.msra.gmra.mxu1 %vm335_vm0, %v365_v4  ;;  %v1183_v12 = vld [vmem:[%s1432_s3] ss:$0 sm:$0xff]  ;;  %v1195_v21 = vld [vmem:[%s1432_s3 + $0x2] ss:$0 sm:$0xff] }
  0x20   : > { %354 = vst.msk [vmem:[#allocation2 + $0x19] sm:$0x1] %vm342_vm2, %v1035_v0  ;;  %868 = vmatmul.msk.f32.vlgmr.msra.gmra.mxu2 %vm335_vm0, %v367_v5  ;;  %870 = vmatmul.msk.f32.vlgmr.msra.gmra.mxu3 %vm335_vm0, %v369_v6  ;;  %v1203_v26 = vld [vmem:[%s1432_s3 + $0x3] ss:$0 sm:$0xff]  ;;  %v1208_v29 = vld [vmem:[%s1432_s3 + $0x4] ss:$0 sm:$0xff] }
  0x21   : > { %340 = vst.msk [vmem:[#allocation2 + $0x90] sm:$0xff] %vm335_vm0, %v1035_v0  ;;  %v1213_v35 = vld [vmem:[%s1432_s3 + $0x5] ss:$0 sm:$0xff]  ;;  %v1226_v50 = vld [vmem:[%s1432_s3 + $0x6] ss:$0 sm:$0xff]  ;;  %s875_s10 = sshll.u32 %s1445_s21, 6 }
  0x22   : > { %341 = vst.msk [vmem:[#allocation2 + $0x98] sm:$0x3] %vm337_vm1, %v1035_v0  ;;  %v1234_v55 = vld [vmem:[%s1432_s3 + $0x7] ss:$0 sm:$0xff]  ;;  %v1239_v56 = vld [vmem:[%s1432_s3 + $0x8] ss:$0 sm:$0xff]  ;;  %s1350_s14 = scalar_lea.vmem %s1434_s5, %s875_s10 }
  0x23   : > { %345 = vst.msk [vmem:[#allocation2 + $0x20] sm:$0x1] %vm342_vm2, %v1035_v0  ;;  %v478_v15 = vld [vmem:[#allocation2 + $0x1] sm:$0xff] }
  0x24   : > { %346 = vst.msk [vmem:[#allocation2 + $0x30] sm:$0x1] %vm342_vm2, %v1035_v0  ;;  %v452_v14 = vld [vmem:[#allocation2] sm:$0xff]  ;;  %v487_v20 = vmul.f32 %v1188_v13, %v478_v15 }
  0x25   : > { %347 = vst.msk [vmem:[#allocation2 + $0x40] sm:$0x1] %vm342_vm2, %v1035_v0  ;;  %v461_v19 = vmul.f32 %v1183_v12, %v452_v14 }
  0x26   : > { %348 = vst.msk [vmem:[#allocation2 + $0x50] sm:$0x1] %vm342_vm2, %v1035_v0  ;;  %v504_v23 = vld [vmem:[#allocation2 + $0x2] sm:$0xff] }
  0x27   : > { %349 = vst.msk [vmem:[#allocation2 + $0x60] sm:$0x1] %vm342_vm2, %v1035_v0  ;;  %865 = vmatmul.msk.f32.gmra.mxu0 %vm335_vm0, %v364_v7  ;;  %867 = vmatmul.msk.f32.gmra.mxu1 %vm335_vm0, %v366_v8  ;;  %v495_v24 = vadd.f32 %v487_v20, %v461_v19  ;;  %v513_v25 = vmul.f32 %v1195_v21, %v504_v23 }
  0x28   : > { %350 = vst.msk [vmem:[#allocation2 + $0x70] sm:$0x1] %vm342_vm2, %v1035_v0  ;;  %869 = vmatmul.msk.f32.gmra.mxu2 %vm335_vm0, %v368_v9  ;;  %871 = vmatmul.msk.f32.gmra.mxu3 %vm335_vm0, %v370_v10 }
  0x29   : > { %351 = vst.msk [vmem:[#allocation2 + $0x80] sm:$0x1] %vm342_vm2, %v1035_v0  ;;  %v521_v34 = vadd.f32 %v513_v25, %v495_v24 }
  0x2a   : > { %355 = vst.msk [vmem:[#allocation2 + $0x29] sm:$0x1] %vm342_vm2, %v1035_v0 }
  0x2b   : > { %356 = vst.msk [vmem:[#allocation2 + $0x39] sm:$0x1] %vm342_vm2, %v1035_v0 }
  0x2c   : > { %357 = vst.msk [vmem:[#allocation2 + $0x49] sm:$0x1] %vm342_vm2, %v1035_v0 }
  0x2d   : > { %358 = vst.msk [vmem:[#allocation2 + $0x59] sm:$0x1] %vm342_vm2, %v1035_v0 }
  0x2e   : > { %359 = vst.msk [vmem:[#allocation2 + $0x69] sm:$0x1] %vm342_vm2, %v1035_v0 }
  0x2f   : > { %360 = vst.msk [vmem:[#allocation2 + $0x79] sm:$0x1] %vm342_vm2, %v1035_v0 }
  0x30   : > { %361 = vst.msk [vmem:[#allocation2 + $0x89] sm:$0x1] %vm342_vm2, %v1035_v0 }
  0x31   : > { %352 = vst.msk [vmem:[#allocation2 + $0x90] sm:$0x1] %vm342_vm2, %v1035_v0 }
  0x32   : > { %362 = vst.msk [vmem:[#allocation2 + $0x99] sm:$0x1] %vm342_vm2, %v1035_v0 }
  0x9c   : > { %v418_v16 = vpop.f32.mrf.mxu0  ;;  %v424_v17 = vpop.f32.mrf.mxu1 }
  0x9d   : > { %v419_v18 = vadd.f32 %v940_v11, %v418_v16  ;;  %v425_v22 = vadd.f32 %v940_v11, %v424_v17 }
  0x9f   : > { %443 = vst.msk [vmem:[#allocation2 + $0x11] sm:$0xff] %vm335_vm0, %v419_v18 }
  0xa0   : > { %445 = vst.msk [vmem:[#allocation2 + $0x31] sm:$0xff] %vm335_vm0, %v425_v22 }
  0xa3   : > { %v430_v27 = vpop.f32.mrf.mxu2  ;;  %v436_v28 = vpop.f32.mrf.mxu3 }
  0xa4   : > { %v431_v30 = vadd.f32 %v940_v11, %v430_v27  ;;  %v437_v31 = vadd.f32 %v940_v11, %v436_v28  ;;  %v421_v32 = vpop.f32.mrf.mxu0  ;;  %v427_v33 = vpop.f32.mrf.mxu1 }
  0xa5   : > { %v422_v36 = vadd.f32 %v940_v11, %v421_v32  ;;  %v428_v37 = vadd.f32 %v940_v11, %v427_v33 }
  0xa6   : > { %v453_v38 = vld [vmem:[#allocation2 + $0x10] sm:$0xff]  ;;  %447 = vst.msk [vmem:[#allocation2 + $0x51] sm:$0xff] %vm335_vm0, %v431_v30 }
  0xa7   : > { %v479_v39 = vld [vmem:[#allocation2 + $0x11] sm:$0xff]  ;;  %v462_v41 = vmul.f32 %v1183_v12, %v453_v38  ;;  %v539_v43 = vmul.f32 %v1203_v26, %v453_v38  ;;  %449 = vst.msk [vmem:[#allocation2 + $0x71] sm:$0xff] %vm335_vm0, %v437_v31 }
  0xa8   : > { %v505_v40 = vld [vmem:[#allocation2 + $0x12] sm:$0xff]  ;;  %v488_v42 = vmul.f32 %v1188_v13, %v479_v39  ;;  %v565_v47 = vmul.f32 %v1208_v29, %v479_v39  ;;  %444 = vst.msk [vmem:[#allocation2 + $0x21] sm:$0xff] %vm335_vm0, %v422_v36 }
  0xa9   : > { %v455_v44 = vld [vmem:[#allocation2 + $0x30] sm:$0xff]  ;;  %v514_v52 = vmul.f32 %v1195_v21, %v505_v40  ;;  %v547_v53 = vadd.f32 %v539_v43, %v521_v34  ;;  %446 = vst.msk [vmem:[#allocation2 + $0x41] sm:$0xff] %vm335_vm0, %v428_v37  ;;  %v591_v57 = vmul.f32 %v1213_v35, %v505_v40 }
  0xaa   : > { %v481_v45 = vld [vmem:[#allocation2 + $0x31] sm:$0xff]  ;;  %v464_v48 = vmul.f32 %v1183_v12, %v455_v44  ;;  %v496_v51 = vadd.f32 %v488_v42, %v462_v41  ;;  %v1244_v60 = vmul.f32 %v1203_v26, %v455_v44  ;;  %v1253_v1 = vmul.f32 %v1226_v50, %v455_v44 }
  0xab   : > { %v507_v46 = vld [vmem:[#allocation2 + $0x32] sm:$0xff]  ;;  %v490_v49 = vmul.f32 %v1188_v13, %v481_v45  ;;  %v573_v59 = vadd.f32 %v565_v47, %v547_v53  ;;  %v1247_v61 = vmul.f32 %v1208_v29, %v481_v45  ;;  %v433_v62 = vpop.f32.mrf.mxu2  ;;  %v439_v63 = vpop.f32.mrf.mxu3  ;;  %v1258_v6 = vmul.f32 %v1234_v55, %v481_v45 }
  0xac   : > { %v516_v54 = vmul.f32 %v1195_v21, %v507_v46  ;;  %v1250_v0 = vmul.f32 %v1213_v35, %v507_v46  ;;  %v434_v2 = vadd.f32 %v940_v11, %v433_v62  ;;  %v440_v3 = vadd.f32 %v940_v11, %v439_v63 }
  0xad   : > { %v498_v58 = vadd.f32 %v490_v49, %v464_v48  ;;  %v522_v4 = vadd.f32 %v514_v52, %v496_v51  ;;  %v1261_v7 = vmul.f32 %v1239_v56, %v507_v46  ;;  %v457_v8 = vld [vmem:[#allocation2 + $0x50] sm:$0xff]  ;;  %v599_v14 = vadd.f32 %v591_v57, %v573_v59 }
  0xae   : > { %v483_v9 = vld [vmem:[#allocation2 + $0x51] sm:$0xff]  ;;  %v466_v15 = vmul.f32 %v1183_v12, %v457_v8  ;;  %448 = vst.msk [vmem:[#allocation2 + $0x61] sm:$0xff] %vm335_vm0, %v434_v2  ;;  %v1268_v20 = vmul.f32 %v1203_v26, %v457_v8  ;;  %v1277_v24 = vmul.f32 %v1226_v50, %v457_v8 }
  0xaf   : > { %v1255_v5 = vadd.f32 %v516_v54, %v498_v58  ;;  %v509_v10 = vld [vmem:[#allocation2 + $0x52] sm:$0xff]  ;;  %v492_v16 = vmul.f32 %v1188_v13, %v483_v9  ;;  %v1271_v22 = vmul.f32 %v1208_v29, %v483_v9  ;;  %450 = vst.msk [vmem:[#allocation2 + $0x81] sm:$0xff] %vm335_vm0, %v440_v3  ;;  %v1281_v27 = vmul.f32 %v1234_v55, %v483_v9  ;;  %v454_v31 = vld [vmem:[#allocation2 + $0x20] sm:$0xff] }
  0xb0   : > { %v518_v17 = vmul.f32 %v1195_v21, %v509_v10  ;;  %v459_v11 = vld [vmem:[#allocation2 + $0x70] sm:$0xff]  ;;  %v1274_v23 = vmul.f32 %v1213_v35, %v509_v10  ;;  %v480_v32 = vld [vmem:[#allocation2 + $0x21] sm:$0xff]  ;;  %v1286_v34 = vmul.f32 %v1239_v56, %v509_v10  ;;  %v463_v44 = vmul.f32 %v1183_v12, %v454_v31 }
  0xb1   : > { %v485_v18 = vld [vmem:[#allocation2 + $0x71] sm:$0xff]  ;;  %v500_v25 = vadd.f32 %v492_v16, %v466_v15  ;;  %v468_v28 = vmul.f32 %v1183_v12, %v459_v11  ;;  %v506_v33 = vld [vmem:[#allocation2 + $0x22] sm:$0xff]  ;;  %v1290_v37 = vmul.f32 %v1203_v26, %v459_v11  ;;  %v1300_v42 = vmul.f32 %v1226_v50, %v459_v11 }
  0xb2   : > { %v511_v19 = vld [vmem:[#allocation2 + $0x72] sm:$0xff]  ;;  %v494_v30 = vmul.f32 %v1188_v13, %v485_v18  ;;  %v1293_v38 = vmul.f32 %v1208_v29, %v485_v18  ;;  %v1303_v43 = vmul.f32 %v1234_v55, %v485_v18  ;;  %v489_v45 = vmul.f32 %v1188_v13, %v480_v32  ;;  %v456_v47 = vld [vmem:[#allocation2 + $0x40] sm:$0xff] }
  0xb3   : > { %v520_v36 = vmul.f32 %v1195_v21, %v511_v19  ;;  %v526_v39 = vadd.f32 %v518_v17, %v500_v25  ;;  %v1297_v41 = vmul.f32 %v1213_v35, %v511_v19  ;;  %v515_v46 = vmul.f32 %v1195_v21, %v506_v33  ;;  %v482_v48 = vld [vmem:[#allocation2 + $0x41] sm:$0xff] }
  0xb4   : > { %v502_v40 = vadd.f32 %v494_v30, %v468_v28  ;;  %v1308_v49 = vld [vmem:[#allocation2 + $0x42] sm:$0xff]  ;;  %v1311_v51 = vmul.f32 %v1239_v56, %v511_v19  ;;  %v540_v52 = vmul.f32 %v1203_v26, %v454_v31  ;;  %v566_v53 = vmul.f32 %v1208_v29, %v480_v32 }
  0xb5   : > { %v592_v54 = vmul.f32 %v1213_v35, %v506_v33  ;;  %v497_v57 = vadd.f32 %v489_v45, %v463_v44  ;;  %v618_v58 = vmul.f32 %v1226_v50, %v454_v31  ;;  %v644_v59 = vmul.f32 %v1234_v55, %v480_v32  ;;  %v458_v17 = vld [vmem:[#allocation2 + $0x60] sm:$0xff] }
  0xb6   : > { %v670_v62 = vmul.f32 %v1239_v56, %v506_v33  ;;  %v548_v63 = vadd.f32 %v540_v52, %v522_v4  ;;  %v465_v2 = vmul.f32 %v1183_v12, %v456_v47  ;;  %v491_v3 = vmul.f32 %v1188_v13, %v482_v48  ;;  %v484_v25 = vld [vmem:[#allocation2 + $0x61] sm:$0xff] }
  0xb7   : > { %v517_v8 = vmul.f32 %v1195_v21, %v1308_v49  ;;  %v523_v9 = vadd.f32 %v515_v46, %v497_v57  ;;  %v626_v10 = vadd.f32 %v618_v58, %v599_v14  ;;  %v542_v15 = vmul.f32 %v1203_v26, %v456_v47  ;;  %v1339_v14 = vld [vmem:[%s1433_s4] ss:$0 sm:$0xff]  ;;  %v510_v33 = vld [vmem:[#allocation2 + $0x62] sm:$0xff] }
  0xb8   : > { %v568_v16 = vmul.f32 %v1208_v29, %v482_v48  ;;  %v1330_v11 = vadd.f32 %v520_v36, %v502_v40  ;;  %v574_v18 = vadd.f32 %v566_v53, %v548_v63  ;;  %v499_v19 = vadd.f32 %v491_v3, %v465_v2 }
  0xb9   : > { %v594_v4 = vmul.f32 %v1213_v35, %v1308_v49  ;;  %v549_v28 = vadd.f32 %v1244_v60, %v523_v9  ;;  %v652_v30 = vadd.f32 %v644_v59, %v626_v10  ;;  %v550_v31 = vadd.f32 %v542_v15, %v1255_v5  ;;  %v563_v9 = vld [vmem:[#allocation2 + $0x81] sm:$0xff] }
  0xba   : > { %v620_v32 = vmul.f32 %v1226_v50, %v456_v47  ;;  %v600_v36 = vadd.f32 %v592_v54, %v574_v18  ;;  %v525_v40 = vadd.f32 %v517_v8, %v499_v19  ;;  %v646_v44 = vmul.f32 %v1234_v55, %v482_v48 }
  0xbb   : > { %v467_v45 = vmul.f32 %v1183_v12, %v458_v17  ;;  %v678_v46 = vadd.f32 %v670_v62, %v652_v30  ;;  %v575_v60 = vadd.f32 %v1247_v61, %v549_v28  ;;  %v576_v52 = vadd.f32 %v568_v16, %v550_v31 }
  0xbc   : > { %v493_v53 = vmul.f32 %v1188_v13, %v484_v25  ;;  %v627_v5 = vadd.f32 %v1253_v1, %v600_v36  ;;  %v551_v47 = vadd.f32 %v1268_v20, %v525_v40  ;;  %v519_v48 = vmul.f32 %v1195_v21, %v510_v33 }
  0xbd   : > { %v544_v12 = vmul.f32 %v1203_v26, %v458_v17  ;;  %v690_v54 = vadd.f32 %v1339_v14, %v678_v46  ;;  %v601_v61 = vadd.f32 %v1250_v0, %v575_v60  ;;  %v602_v57 = vadd.f32 %v594_v4, %v576_v52 }
  0xbe   : > { %v501_v13 = vadd.f32 %v493_v53, %v467_v45  ;;  %v653_v58 = vadd.f32 %v1258_v6, %v627_v5  ;;  %v570_v62 = vmul.f32 %v1208_v29, %v484_v25  ;;  %v577_v63 = vadd.f32 %v1271_v22, %v551_v47 }
  0xbf   : > { %v552_v59 = vadd.f32 %v544_v12, %v526_v39  ;;  %698 = vst.msk [vmem:[%s1350_s14] sm:$0xff] %vm335_vm0, %v690_v54  ;;  %v628_v1 = vadd.f32 %v620_v32, %v601_v61  ;;  %v629_v21 = vadd.f32 %v1277_v24, %v602_v57  ;;  %v596_v2 = vmul.f32 %v1213_v35, %v510_v33  ;;  %v537_v39 = vld [vmem:[#allocation2 + $0x80] sm:$0xff] }
  0xc0   : > { %v527_v20 = vadd.f32 %v519_v48, %v501_v13  ;;  %v679_v3 = vadd.f32 %v1261_v7, %v653_v58  ;;  %v603_v8 = vadd.f32 %v1274_v23, %v577_v63  ;;  %v622_v6 = vmul.f32 %v1226_v50, %v458_v17  ;;  %v589_v23 = vld [vmem:[#allocation2 + $0x82] sm:$0xff] }
  0xc1   : > { %v578_v0 = vadd.f32 %v570_v62, %v552_v59  ;;  %v654_v10 = vadd.f32 %v646_v44, %v628_v1  ;;  %v655_v22 = vadd.f32 %v1281_v27, %v629_v21  ;;  %v672_v15 = vmul.f32 %v1239_v56, %v1308_v49 }
  0xc2   : > { %v553_v24 = vadd.f32 %v1290_v37, %v527_v20  ;;  %v691_v16 = vadd.f32 %v1339_v14, %v679_v3  ;;  %v630_v7 = vadd.f32 %v622_v6, %v603_v8  ;;  %v648_v19 = vmul.f32 %v1234_v55, %v484_v25  ;;  %v616_v25 = vld [vmem:[#allocation2 + $0x90] sm:$0xff] }
  0xc3   : > { %v604_v18 = vadd.f32 %v596_v2, %v578_v0  ;;  %v680_v4 = vadd.f32 %v672_v15, %v654_v10  ;;  %v681_v17 = vadd.f32 %v1286_v34, %v655_v22  ;;  %v546_v28 = vmul.f32 %v1203_v26, %v537_v39 }
  0xc4   : > { %v572_v30 = vmul.f32 %v1208_v29, %v563_v9  ;;  %699 = vst.msk [vmem:[%s1350_s14 + $0x8] sm:$0xff] %vm335_vm0, %v691_v16  ;;  %v656_v37 = vadd.f32 %v648_v19, %v630_v7  ;;  %v674_v49 = vmul.f32 %v1239_v56, %v510_v33  ;;  %v579_v31 = vadd.f32 %v1293_v38, %v553_v24  ;;  %v642_v33 = vld [vmem:[#allocation2 + $0x91] sm:$0xff] }
  0xc5   : > { %v631_v27 = vadd.f32 %v1300_v42, %v604_v18  ;;  %v692_v32 = vadd.f32 %v1339_v14, %v680_v4  ;;  %v693_v34 = vadd.f32 %v1339_v14, %v681_v17  ;;  %v554_v26 = vadd.f32 %v546_v28, %v1330_v11 }
  0xc6   : > { %v598_v29 = vmul.f32 %v1213_v35, %v589_v23  ;;  %v682_v40 = vadd.f32 %v674_v49, %v656_v37  ;;  %v605_v42 = vadd.f32 %v1297_v41, %v579_v31  ;;  %v624_v44 = vmul.f32 %v1226_v50, %v537_v39  ;;  %v668_v41 = vld [vmem:[#allocation2 + $0x92] sm:$0xff] }
  0xc7   : > { %v657_v36 = vadd.f32 %v1303_v43, %v631_v27  ;;  %700 = vst.msk [vmem:[%s1350_s14 + $0x10] sm:$0xff] %vm335_vm0, %v692_v32  ;;  %v580_v38 = vadd.f32 %v572_v30, %v554_v26  ;;  %v625_v45 = vmul.f32 %v1226_v50, %v616_v25  ;;  %v650_v46 = vmul.f32 %v1234_v55, %v563_v9 }
  0xc8   : > { %701 = vst.msk [vmem:[%s1350_s14 + $0x18] sm:$0xff] %vm335_vm0, %v693_v34  ;;  %v694_v35 = vadd.f32 %v1339_v14, %v682_v40  ;;  %v632_v43 = vadd.f32 %v624_v44, %v605_v42  ;;  %v651_v52 = vmul.f32 %v1234_v55, %v642_v33  ;;  %v676_v5 = vmul.f32 %v1239_v56, %v589_v23 }
  0xc9   : > { %v683_v11 = vadd.f32 %v1311_v51, %v657_v36  ;;  %v606_v60 = vadd.f32 %v598_v29, %v580_v38  ;;  %v677_v51 = vmul.f32 %v1239_v56, %v668_v41 }
  0xca   : > { %702 = vst.msk [vmem:[%s1350_s14 + $0x20] sm:$0xff] %vm335_vm0, %v694_v35  ;;  %v658_v50 = vadd.f32 %v650_v46, %v632_v43 }
  0xcb   : > { %v695_v53 = vadd.f32 %v1339_v14, %v683_v11  ;;  %v633_v47 = vadd.f32 %v625_v45, %v606_v60 }
  0xcc   : > { %v684_v48 = vadd.f32 %v676_v5, %v658_v50 }
  0xcd   : > { %703 = vst.msk [vmem:[%s1350_s14 + $0x28] sm:$0xff] %vm335_vm0, %v695_v53  ;;  %v659_v12 = vadd.f32 %v651_v52, %v633_v47 }
  0xce   : > { %v696_v54 = vadd.f32 %v1339_v14, %v684_v48 }
  0xcf   : > { %v685_v61 = vadd.f32 %v677_v51, %v659_v12 }
  0xd0   : > { %704 = vst.msk [vmem:[%s1350_s14 + $0x30] sm:$0xff] %vm335_vm0, %v696_v54 }
  0xd1   : > { %v697_v55 = vadd.f32 %v1339_v14, %v685_v61 }
  0xd3   : > { %705 = vst.msk [vmem:[%s1350_s14 + $0x38] sm:$0xff] %vm335_vm0, %v697_v55 }
  0xd4 PF: > { %s18_s23 = sadd.s32 1, %s1031_s23   ;;  %s1437_s18 = smov %s1015_s19 }
  0xd5   : > { %p15_p0 = scmp.ge.s32.totalorder %s18_s23, 4   ;;  %s1438_s19 = smov %s1019_s20 }
  0xd6   : > { %s1439_s20 = smov %s1115_s30  ;;  %s1440_s21 = smov %s1027_s22 }
  0xd7   : > { %s1441_s22 = smov %s1443_s25  ;;  %17 = sbr.rel (!%p15_p0) target bundleno = 4 (0x4), region = 95 }
  0xdc   :  { %733 = vsyncpa [#allocation4], 1 }
  0xdd   :  { %735 = vsyncpa [#allocation4 + $0x1], 1 }

// kernel: cross_trans_attention.5
= control target key start
LH: loop header
LB: loop body
LE: loop exit
PB: predicated region body
PF: predicated region fallthrough
CT: control target
= control target key end

     0   :  { %s1084_s21 = smov 0   ;;  %s1086_s22 = smov 0   ;;  %s1371_s0 = inlined_call_operand.vmem [shape: f32[2,64,16], index: 0, kind: input, shape index: {}]   ;;  %s1372_s1 = inlined_call_operand.vmem [shape: f32[1,16,32], index: 1, kind: input, shape index: {}]   ;;  %s1373_s2 = inlined_call_operand.vmem [shape: f32[1,1,32], index: 2, kind: input, shape index: {}]   ;;  %s1374_s3 = inlined_call_operand.vmem [shape: f32[1,9,32], index: 3, kind: input, shape index: {}]   ;;  %s1375_s4 = inlined_call_operand.vmem [shape: f32[1,1,32], index: 4, kind: input, shape index: {}]   ;;  %s1376_s5 = inlined_call_operand.vmem [shape: f32[2,8,8,16], index: 5, kind: output, shape index: {0}]   ;;  %s1377_s6 = inlined_call_operand.vmem [shape: f32[2,8,8,16], index: 6, kind: output, shape index: {1}]  }
   0x1   :  { %s1088_s23 = smov 0  }
   0x2 LB: > { %s29_s24 = sadd.s32 1, %s1041_s22  ;;  %p960_p0 = scmp.ge.s32.totalorder %s1045_s23, 1  ;;  %s1045_s23 = sphi %s1088_s23, %s17_s23   ;;  %s1041_s22 = sphi %s1086_s22, %s1379_s22   ;;  %s1037_s21 = sphi %s1084_s21, %s1378_s21  }
   0x3   : > { %p31_p1 = scmp.ge.s32.totalorder %s29_s24, 2  ;;  %p267_p2 = scmp.lt.s32.totalorder %s1045_s23, 3 }
   0x5   : > { %s1381_s24 = smov (%p31_p1, %s29_s24), 0  ;;  %p268_p3 = pnand %p960_p0, %p267_p2 }
   0x6   : > { %p324_p4 = scmp.lt.s32.totalorder (!%p268_p3), %s1037_s21, 1  ;;  %s1048_s14 = smov (!%p268_p3), 112  }
   0x7   : > { %271 = sbr.rel (%p268_p3) target bundleno = 317 (0x13d), region = 40 }
   0xc   : > { %v398_v0 = vld [vmem:[%s1372_s1 + $0x8] sm:$0xff]  ;;  %v397_v1 = vld [vmem:[%s1372_s1] sm:$0xff]  ;;  %s1383_s21 = smov (!%p324_p4, %s1037_s21), 1  ;;  %vm403_vm0 = vcmask 130048   ;;  %vm361_vm1 = vcmask 261120   ;;  %v1047_v10 = vmov 0.0  }
   0xd   : > { %442 = vmatpush.msra.mxu0 %v398_v0  ;;  %980 = vmatpush.msra.mxu1 %v398_v0  ;;  %s1108_s29 = sshll.u32 %s1383_s21, 6  ;;  %362 = vst.msk [vmem:[#allocation2] sm:$0xff] %vm361_vm1, %v1047_v10  ;;  %vm363_vm2 = vcmask 254976   ;;  %vm368_vm3 = vcmask 253952   ;;  %v1012_v11 = vld [vmem:[%s1373_s2] ss:$0 sm:$0xff] }
   0xe   : > { %981 = vmatpush.msra.mxu2 %v398_v0  ;;  %982 = vmatpush.msra.mxu3 %v398_v0  ;;  %s328_s8 = scalar_lea.vmem %s1371_s0, %s1108_s29  ;;  %364 = vst.msk [vmem:[#allocation2 + $0x8] sm:$0x3] %vm363_vm2, %v1047_v10  ;;  %v1150_v12 = vld [vmem:[%s1374_s3] ss:$0 sm:$0xff]  ;;  %v1155_v13 = vld [vmem:[%s1374_s3 + $0x1] ss:$0 sm:$0xff]  ;;  %s1263_s13 = scalar_lea.vmem %s1376_s5, %s1108_s29 }
   0xf   : > { %443 = vmatpush.msra.mxu0 %v397_v1  ;;  %983 = vmatpush.msra.mxu1 %v397_v1  ;;  %v389_v2 = vld [vmem:[%s328_s8] sm:$0xff]  ;;  %v391_v3 = vld [vmem:[%s328_s8 + $0x10] sm:$0xff]  ;;  %v390_v6 = vld [vmem:[%s328_s8 + $0x8] sm:$0xff]  ;;  %369 = vst.msk [vmem:[#allocation2] sm:$0x1] %vm368_vm3, %v1047_v10  ;;  %s360_s17 = scalar_lea.vmem %s1377_s6, %s1108_s29 }
  0x10   : > { %984 = vmatpush.msra.mxu2 %v397_v1  ;;  %985 = vmatpush.msra.mxu3 %v397_v1  ;;  %v393_v4 = vld [vmem:[%s328_s8 + $0x20] sm:$0xff]  ;;  %v395_v5 = vld [vmem:[%s328_s8 + $0x30] sm:$0xff]  ;;  %v392_v7 = vld [vmem:[%s328_s8 + $0x18] sm:$0xff]  ;;  %370 = vst.msk [vmem:[#allocation2 + $0x10] sm:$0x1] %vm368_vm3, %v1047_v10 }
  0x11   : > { %967 = vmatmul.msk.f32.vlgmr.msra.gmra.mxu0 %vm403_vm0, %v389_v2  ;;  %969 = vmatmul.msk.f32.vlgmr.msra.gmra.mxu1 %vm403_vm0, %v391_v3  ;;  %v394_v8 = vld [vmem:[%s328_s8 + $0x28] sm:$0xff]  ;;  %v396_v9 = vld [vmem:[%s328_s8 + $0x38] sm:$0xff]  ;;  %371 = vst.msk [vmem:[#allocation2 + $0x20] sm:$0x1] %vm368_vm3, %v1047_v10  ;;  %v1162_v22 = vld [vmem:[%s1374_s3 + $0x2] ss:$0 sm:$0xff] }
  0x12   : > { %971 = vmatmul.msk.f32.vlgmr.msra.gmra.mxu2 %vm403_vm0, %v393_v4  ;;  %973 = vmatmul.msk.f32.vlgmr.msra.gmra.mxu3 %vm403_vm0, %v395_v5  ;;  %379 = vst.msk [vmem:[#allocation2 + $0x9] sm:$0x1] %vm368_vm3, %v1047_v10  ;;  %v1170_v28 = vld [vmem:[%s1374_s3 + $0x3] ss:$0 sm:$0xff]  ;;  %v1175_v36 = vld [vmem:[%s1374_s3 + $0x4] ss:$0 sm:$0xff] }
  0x13   : > { %380 = vst.msk [vmem:[#allocation2 + $0x19] sm:$0x1] %vm368_vm3, %v1047_v10  ;;  %v1186_v45 = vld [vmem:[%s1374_s3 + $0x5] ss:$0 sm:$0xff]  ;;  %v1191_v46 = vld [vmem:[%s1374_s3 + $0x6] ss:$0 sm:$0xff] }
  0x14   : > { %381 = vst.msk [vmem:[#allocation2 + $0x29] sm:$0x1] %vm368_vm3, %v1047_v10  ;;  %v1200_v51 = vld [vmem:[%s1374_s3 + $0x7] ss:$0 sm:$0xff]  ;;  %v1205_v52 = vld [vmem:[%s1374_s3 + $0x8] ss:$0 sm:$0xff] }
  0x15   : > { %366 = vst.msk [vmem:[#allocation2 + $0x90] sm:$0xff] %vm361_vm1, %v1047_v10  ;;  %v505_v15 = vld [vmem:[#allocation2 + $0x1] sm:$0xff] }
  0x16   : > { %367 = vst.msk [vmem:[#allocation2 + $0x98] sm:$0x3] %vm363_vm2, %v1047_v10  ;;  %v479_v14 = vld [vmem:[#allocation2] sm:$0xff]  ;;  %v514_v21 = vmul.f32 %v1155_v13, %v505_v15 }
  0x17   : > { %372 = vst.msk [vmem:[#allocation2 + $0x30] sm:$0x1] %vm368_vm3, %v1047_v10  ;;  %v488_v20 = vmul.f32 %v1150_v12, %v479_v14 }
  0x18   : > { %373 = vst.msk [vmem:[#allocation2 + $0x40] sm:$0x1] %vm368_vm3, %v1047_v10 }
  0x19   : > { %968 = vmatmul.msk.f32.gmra.mxu0 %vm403_vm0, %v390_v6  ;;  %970 = vmatmul.msk.f32.gmra.mxu1 %vm403_vm0, %v392_v7  ;;  %374 = vst.msk [vmem:[#allocation2 + $0x50] sm:$0x1] %vm368_vm3, %v1047_v10  ;;  %v531_v23 = vld [vmem:[#allocation2 + $0x2] sm:$0xff]  ;;  %v522_v24 = vadd.f32 %v514_v21, %v488_v20 }
  0x1a   : > { %972 = vmatmul.msk.f32.gmra.mxu2 %vm403_vm0, %v394_v8  ;;  %974 = vmatmul.msk.f32.gmra.mxu3 %vm403_vm0, %v396_v9  ;;  %375 = vst.msk [vmem:[#allocation2 + $0x60] sm:$0x1] %vm368_vm3, %v1047_v10  ;;  %v540_v25 = vmul.f32 %v1162_v22, %v531_v23 }
  0x1b   : > { %376 = vst.msk [vmem:[#allocation2 + $0x70] sm:$0x1] %vm368_vm3, %v1047_v10 }
  0x1c   : > { %377 = vst.msk [vmem:[#allocation2 + $0x80] sm:$0x1] %vm368_vm3, %v1047_v10  ;;  %v548_v35 = vadd.f32 %v540_v25, %v522_v24 }
  0x1d   : > { %382 = vst.msk [vmem:[#allocation2 + $0x39] sm:$0x1] %vm368_vm3, %v1047_v10 }
  0x1e   : > { %383 = vst.msk [vmem:[#allocation2 + $0x49] sm:$0x1] %vm368_vm3, %v1047_v10 }
  0x1f   : > { %384 = vst.msk [vmem:[#allocation2 + $0x59] sm:$0x1] %vm368_vm3, %v1047_v10 }
  0x20   : > { %385 = vst.msk [vmem:[#allocation2 + $0x69] sm:$0x1] %vm368_vm3, %v1047_v10 }
  0x21   : > { %386 = vst.msk [vmem:[#allocation2 + $0x79] sm:$0x1] %vm368_vm3, %v1047_v10 }
  0x22   : > { %387 = vst.msk [vmem:[#allocation2 + $0x89] sm:$0x1] %vm368_vm3, %v1047_v10 }
  0x23   : > { %378 = vst.msk [vmem:[#allocation2 + $0x90] sm:$0x1] %vm368_vm3, %v1047_v10 }
  0x24   : > { %388 = vst.msk [vmem:[#allocation2 + $0x99] sm:$0x1] %vm368_vm3, %v1047_v10 }
  0x8e   : > { %v445_v16 = vpop.f32.mrf.mxu0  ;;  %v451_v17 = vpop.f32.mrf.mxu1 }
  0x8f   : > { %v446_v18 = vadd.f32 %v1012_v11, %v445_v16  ;;  %v452_v19 = vadd.f32 %v1012_v11, %v451_v17 }
  0x91   : > { %470 = vst.msk [vmem:[#allocation2 + $0x11] sm:$0xff] %vm361_vm1, %v446_v18 }
  0x92   : > { %472 = vst.msk [vmem:[#allocation2 + $0x31] sm:$0xff] %vm361_vm1, %v452_v19 }
  0x95   : > { %v457_v26 = vpop.f32.mrf.mxu2  ;;  %v463_v27 = vpop.f32.mrf.mxu3 }
  0x96   : > { %v458_v29 = vadd.f32 %v1012_v11, %v457_v26  ;;  %v448_v30 = vpop.f32.mrf.mxu0  ;;  %v454_v31 = vpop.f32.mrf.mxu1  ;;  %v464_v34 = vadd.f32 %v1012_v11, %v463_v27 }
  0x97   : > { %v449_v32 = vadd.f32 %v1012_v11, %v448_v30  ;;  %v455_v33 = vadd.f32 %v1012_v11, %v454_v31 }
  0x98   : > { %474 = vst.msk [vmem:[#allocation2 + $0x51] sm:$0xff] %vm361_vm1, %v458_v29  ;;  %v557_v37 = vld [vmem:[#allocation2 + $0x10] sm:$0xff] }
  0x99   : > { %v583_v38 = vld [vmem:[#allocation2 + $0x11] sm:$0xff]  ;;  %471 = vst.msk [vmem:[#allocation2 + $0x21] sm:$0xff] %vm361_vm1, %v449_v32  ;;  %v566_v39 = vmul.f32 %v1170_v28, %v557_v37  ;;  %v489_v44 = vmul.f32 %v1150_v12, %v557_v37  ;;  %v1249_v37 = vld [vmem:[%s1375_s4] ss:$0 sm:$0xff] }
  0x9a   : > { %v592_v40 = vmul.f32 %v1175_v36, %v583_v38  ;;  %v609_v41 = vld [vmem:[#allocation2 + $0x12] sm:$0xff]  ;;  %473 = vst.msk [vmem:[#allocation2 + $0x41] sm:$0xff] %vm361_vm1, %v455_v33  ;;  %v515_v49 = vmul.f32 %v1155_v13, %v583_v38 }
  0x9b   : > { %v482_v42 = vld [vmem:[#allocation2 + $0x30] sm:$0xff]  ;;  %476 = vst.msk [vmem:[#allocation2 + $0x71] sm:$0xff] %vm361_vm1, %v464_v34  ;;  %v574_v50 = vadd.f32 %v566_v39, %v548_v35  ;;  %v541_v56 = vmul.f32 %v1162_v22, %v609_v41  ;;  %v618_v60 = vmul.f32 %v1186_v45, %v609_v41 }
  0x9c   : > { %v508_v43 = vld [vmem:[#allocation2 + $0x31] sm:$0xff]  ;;  %v491_v47 = vmul.f32 %v1150_v12, %v482_v42  ;;  %v523_v55 = vadd.f32 %v515_v49, %v489_v44  ;;  %v646_v0 = vmul.f32 %v1191_v46, %v482_v42  ;;  %v1218_v3 = vmul.f32 %v1170_v28, %v482_v42 }
  0x9d   : > { %v517_v48 = vmul.f32 %v1155_v13, %v508_v43  ;;  %v534_v53 = vld [vmem:[#allocation2 + $0x32] sm:$0xff]  ;;  %v460_v57 = vpop.f32.mrf.mxu2  ;;  %v466_v58 = vpop.f32.mrf.mxu3  ;;  %v600_v59 = vadd.f32 %v592_v40, %v574_v50  ;;  %v1212_v1 = vmul.f32 %v1200_v51, %v508_v43  ;;  %v1224_v9 = vmul.f32 %v1175_v36, %v508_v43 }
  0x9e   : > { %v461_v61 = vadd.f32 %v1012_v11, %v460_v57  ;;  %v467_v62 = vadd.f32 %v1012_v11, %v466_v58  ;;  %v543_v63 = vmul.f32 %v1162_v22, %v534_v53  ;;  %v1215_v2 = vmul.f32 %v1205_v52, %v534_v53 }
  0x9f   : > { %v525_v54 = vadd.f32 %v517_v48, %v491_v47  ;;  %v1221_v7 = vld [vmem:[#allocation2 + $0x50] sm:$0xff]  ;;  %v549_v8 = vadd.f32 %v541_v56, %v523_v55  ;;  %v1227_v10 = vmul.f32 %v1186_v45, %v534_v53  ;;  %v626_v11 = vadd.f32 %v618_v60, %v600_v59 }
  0xa0   : > { %475 = vst.msk [vmem:[#allocation2 + $0x61] sm:$0xff] %vm361_vm1, %v461_v61  ;;  %v636_v4 = vld [vmem:[#allocation2 + $0x20] sm:$0xff]  ;;  %v648_v24 = vmul.f32 %v1191_v46, %v1221_v7  ;;  %v570_v34 = vmul.f32 %v1170_v28, %v1221_v7  ;;  %v691_v39 = vld [vmem:[#allocation2 + $0x52] sm:$0xff] }
  0xa1   : > { %v662_v5 = vld [vmem:[#allocation2 + $0x21] sm:$0xff]  ;;  %v551_v6 = vadd.f32 %v543_v63, %v525_v54  ;;  %477 = vst.msk [vmem:[#allocation2 + $0x81] sm:$0xff] %vm361_vm1, %v467_v62  ;;  %v645_v14 = vmul.f32 %v1191_v46, %v636_v4  ;;  %v567_v19 = vmul.f32 %v1170_v28, %v636_v4  ;;  %v490_v41 = vmul.f32 %v1150_v12, %v636_v4  ;;  %v665_v43 = vld [vmem:[#allocation2 + $0x51] sm:$0xff] }
  0xa2   : > { %v671_v15 = vmul.f32 %v1200_v51, %v662_v5  ;;  %v688_v16 = vld [vmem:[#allocation2 + $0x22] sm:$0xff]  ;;  %v593_v25 = vmul.f32 %v1175_v36, %v662_v5  ;;  %v516_v48 = vmul.f32 %v1155_v13, %v662_v5  ;;  %v674_v50 = vmul.f32 %v1200_v51, %v665_v43 }
  0xa3   : > { %v560_v17 = vld [vmem:[#allocation2 + $0x40] sm:$0xff]  ;;  %v697_v20 = vmul.f32 %v1205_v52, %v688_v16  ;;  %v653_v26 = vadd.f32 %v645_v14, %v626_v11  ;;  %v575_v27 = vadd.f32 %v567_v19, %v549_v8  ;;  %v619_v29 = vmul.f32 %v1186_v45, %v688_v16 }
  0xa4   : > { %v586_v18 = vld [vmem:[#allocation2 + $0x41] sm:$0xff]  ;;  %v569_v21 = vmul.f32 %v1170_v28, %v560_v17  ;;  %v492_v30 = vmul.f32 %v1150_v12, %v560_v17  ;;  %v542_v55 = vmul.f32 %v1162_v22, %v688_v16  ;;  %v700_v57 = vmul.f32 %v1205_v52, %v691_v39 }
  0xa5   : > { %v1235_v23 = vld [vmem:[#allocation2 + $0x42] sm:$0xff]  ;;  %v595_v32 = vmul.f32 %v1175_v36, %v586_v18  ;;  %v518_v33 = vmul.f32 %v1155_v13, %v586_v18  ;;  %v679_v35 = vadd.f32 %v671_v15, %v653_v26  ;;  %v601_v40 = vadd.f32 %v593_v25, %v575_v27 }
  0xa6   : > { %v577_v31 = vadd.f32 %v569_v21, %v551_v6  ;;  %v621_v38 = vmul.f32 %v1186_v45, %v1235_v23  ;;  %v544_v47 = vmul.f32 %v1162_v22, %v1235_v23  ;;  %v596_v59 = vmul.f32 %v1175_v36, %v665_v43 }
  0xa7   : > { %v526_v44 = vadd.f32 %v518_v33, %v492_v30  ;;  %v705_v49 = vadd.f32 %v697_v20, %v679_v35  ;;  %v627_v53 = vadd.f32 %v619_v29, %v601_v40  ;;  %v640_v54 = vld [vmem:[#allocation2 + $0x60] sm:$0xff]  ;;  %v622_v63 = vmul.f32 %v1186_v45, %v691_v39  ;;  %v589_v35 = vld [vmem:[#allocation2 + $0x71] sm:$0xff] }
  0xa8   : > { %v603_v42 = vadd.f32 %v595_v32, %v577_v31  ;;  %v666_v60 = vld [vmem:[#allocation2 + $0x61] sm:$0xff]  ;;  %v524_v5 = vadd.f32 %v516_v48, %v490_v41  ;;  %v647_v11 = vmul.f32 %v1191_v46, %v560_v17  ;;  %v494_v14 = vmul.f32 %v1150_v12, %v640_v54  ;;  %v563_v32 = vld [vmem:[#allocation2 + $0x70] sm:$0xff] }
  0xa9   : > { %v552_v58 = vadd.f32 %v544_v47, %v526_v44  ;;  %v717_v61 = vadd.f32 %v1249_v37, %v705_v49  ;;  %v654_v62 = vadd.f32 %v646_v0, %v627_v53  ;;  %v1269_v4 = vld [vmem:[#allocation2 + $0x62] sm:$0xff]  ;;  %v520_v0 = vmul.f32 %v1155_v13, %v666_v60 }
  0xaa   : > { %v629_v56 = vadd.f32 %v621_v38, %v603_v42  ;;  %v550_v16 = vadd.f32 %v542_v55, %v524_v5  ;;  %v649_v21 = vmul.f32 %v1191_v46, %v640_v54  ;;  %v673_v26 = vmul.f32 %v1200_v51, %v586_v18  ;;  %v1290_v18 = vld [vmem:[#allocation2 + $0x72] sm:$0xff]  ;;  %v642_v47 = vld [vmem:[#allocation2 + $0x80] sm:$0xff] }
  0xab   : > { %v578_v8 = vadd.f32 %v570_v34, %v552_v58  ;;  %741 = vrot.lane.b32.xlu0 %v717_v61, %s1048_s14  ;;  %725 = vst.msk [vmem:[%s1263_s13] sm:$0xff] %vm403_vm0, %v717_v61  ;;  %v680_v15 = vadd.f32 %v1212_v1, %v654_v62  ;;  %v528_v27 = vadd.f32 %v520_v0, %v494_v14  ;;  %v668_v62 = vld [vmem:[#allocation2 + $0x81] sm:$0xff] }
  0xac   : > { %v656_v6 = vadd.f32 %v648_v24, %v629_v56  ;;  %v546_v24 = vmul.f32 %v1162_v22, %v1269_v4  ;;  %v576_v25 = vadd.f32 %v1218_v3, %v550_v16  ;;  %v675_v30 = vmul.f32 %v1200_v51, %v666_v60 }
  0xad   : > { %v604_v20 = vadd.f32 %v596_v59, %v578_v8  ;;  %v706_v17 = vadd.f32 %v1215_v2, %v680_v15  ;;  %v701_v31 = vmul.f32 %v1205_v52, %v1269_v4  ;;  %v572_v3 = vmul.f32 %v1170_v28, %v563_v32 }
  0xae   : > { %v682_v19 = vadd.f32 %v674_v50, %v656_v6  ;;  %v602_v34 = vadd.f32 %v1224_v9, %v576_v25  ;;  %v554_v2 = vadd.f32 %v546_v24, %v528_v27  ;;  %v598_v41 = vmul.f32 %v1175_v36, %v589_v35 }
  0xaf   : > { %v630_v1 = vadd.f32 %v622_v63, %v604_v20  ;;  %v718_v33 = vadd.f32 %v1249_v37, %v706_v17  ;;  %v493_v42 = vmul.f32 %v1150_v12, %v1221_v7  ;;  %v519_v48 = vmul.f32 %v1155_v13, %v665_v43 }
  0xb0   : > { %v708_v29 = vadd.f32 %v700_v57, %v682_v19  ;;  %v628_v44 = vadd.f32 %v1227_v10, %v602_v34  ;;  %v580_v9 = vadd.f32 %v572_v3, %v554_v2  ;;  %v545_v49 = vmul.f32 %v1162_v22, %v691_v39  ;;  %v695_v34 = vld [vmem:[#allocation2 + $0x92] sm:$0xff] }
  0xb1   : > { %v657_v40 = vadd.f32 %v649_v21, %v630_v1  ;;  %726 = vst.msk [vmem:[%s1263_s13 + $0x8] sm:$0xff] %vm403_vm0, %v718_v33  ;;  %v624_v53 = vmul.f32 %v1186_v45, %v1290_v18  ;;  %v651_v7 = vmul.f32 %v1191_v46, %v642_v47  ;;  %v527_v56 = vadd.f32 %v519_v48, %v493_v42 }
  0xb2   : > { %v720_v38 = vadd.f32 %v1249_v37, %v708_v29  ;;  %v655_v55 = vadd.f32 %v647_v11, %v628_v44  ;;  %v606_v10 = vadd.f32 %v598_v41, %v580_v9  ;;  %v571_v57 = vmul.f32 %v1170_v28, %v640_v54 }
  0xb3   : > { %v683_v50 = vadd.f32 %v675_v30, %v657_v40  ;;  %743 = vrot.lane.b32.xlu0 %v718_v33, %s1048_s14  ;;  %v699_v39 = vmul.f32 %v1205_v52, %v1235_v23  ;;  %v597_v58 = vmul.f32 %v1175_v36, %v666_v60  ;;  %v553_v63 = vadd.f32 %v545_v49, %v527_v56 }
  0xb4   : > { %747 = vrot.lane.b32.xlu1 %v720_v38, %s1048_s14  ;;  %728 = vst.msk [vmem:[%s1263_s13 + $0x18] sm:$0xff] %vm403_vm0, %v720_v38  ;;  %v681_v59 = vadd.f32 %v673_v26, %v655_v55  ;;  %v632_v61 = vadd.f32 %v624_v53, %v606_v10  ;;  %v495_v5 = vmul.f32 %v1150_v12, %v563_v32  ;;  %v694_v12 = vld [vmem:[#allocation2 + $0x82] sm:$0xff]  ;;  %v643_v26 = vld [vmem:[#allocation2 + $0x90] sm:$0xff] }
  0xb5   : > { %v709_v43 = vadd.f32 %v701_v31, %v683_v50  ;;  %v677_v8 = vmul.f32 %v1200_v51, %v668_v62  ;;  %v521_v11 = vmul.f32 %v1155_v13, %v589_v35  ;;  %v547_v54 = vmul.f32 %v1162_v22, %v1290_v18  ;;  %v669_v31 = vld [vmem:[#allocation2 + $0x91] sm:$0xff] }
  0xb6   : > { %v707_v14 = vadd.f32 %v699_v39, %v681_v59  ;;  %v659_v23 = vadd.f32 %v651_v7, %v632_v61  ;;  %v579_v15 = vadd.f32 %v571_v57, %v553_v63  ;;  %v623_v60 = vmul.f32 %v1186_v45, %v1269_v4 }
  0xb7   : > { %v721_v6 = vadd.f32 %v1249_v37, %v709_v43  ;;  %v529_v16 = vadd.f32 %v521_v11, %v495_v5  ;;  %v573_v0 = vmul.f32 %v1170_v28, %v642_v47  ;;  %v703_v22 = vmul.f32 %v1205_v52, %v694_v12 }
  0xb8   : > { %v719_v13 = vadd.f32 %v1249_v37, %v707_v14  ;;  %v685_v19 = vadd.f32 %v677_v8, %v659_v23  ;;  %v605_v20 = vadd.f32 %v597_v58, %v579_v15  ;;  %v599_v24 = vmul.f32 %v1175_v36, %v668_v62 }
  0xb9   : > { %749 = vrot.lane.b32.xlu2 %v721_v6, %s1048_s14  ;;  %729 = vst.msk [vmem:[%s1263_s13 + $0x20] sm:$0xff] %vm403_vm0, %v721_v6  ;;  %v555_v21 = vadd.f32 %v547_v54, %v529_v16  ;;  %v650_v25 = vmul.f32 %v1191_v46, %v563_v32  ;;  %v625_v27 = vmul.f32 %v1186_v45, %v694_v12 }
  0xba   : > { %727 = vst.msk [vmem:[%s1263_s13 + $0x10] sm:$0xff] %vm403_vm0, %v719_v13  ;;  %v711_v4 = vadd.f32 %v703_v22, %v685_v19  ;;  %v631_v17 = vadd.f32 %v623_v60, %v605_v20  ;;  %v676_v30 = vmul.f32 %v1200_v51, %v589_v35  ;;  %v652_v33 = vmul.f32 %v1191_v46, %v643_v26 }
  0xbb   : > { %v581_v28 = vadd.f32 %v573_v0, %v555_v21  ;;  %v702_v45 = vmul.f32 %v1205_v52, %v1290_v18  ;;  %v678_v3 = vmul.f32 %v1200_v51, %v669_v31  ;;  %v704_v40 = vmul.f32 %v1205_v52, %v695_v34 }
  0xbc   : > { %745 = vrot.lane.b32.xlu1 %v719_v13, %s1048_s14  ;;  %v723_v29 = vadd.f32 %v1249_v37, %v711_v4  ;;  %v658_v1 = vadd.f32 %v650_v25, %v631_v17 }
  0xbd   : > { %v607_v36 = vadd.f32 %v599_v24, %v581_v28 }
  0xbe   : > { %731 = vst.msk [vmem:[%s1263_s13 + $0x30] sm:$0xff] %vm403_vm0, %v723_v29  ;;  %753 = vrot.lane.b32.xlu0 %v723_v29, %s1048_s14  ;;  %v684_v32 = vadd.f32 %v676_v30, %v658_v1 }
  0xbf   : > { %v633_v2 = vadd.f32 %v625_v27, %v607_v36 }
  0xc0   : > { %v710_v35 = vadd.f32 %v702_v45, %v684_v32 }
  0xc1   : > { %v660_v38 = vadd.f32 %v652_v33, %v633_v2 }
  0xc2   : > { %v722_v46 = vadd.f32 %v1249_v37, %v710_v35 }
  0xc3   : > { %v686_v41 = vadd.f32 %v678_v3, %v660_v38 }
  0xc4   : > { %730 = vst.msk [vmem:[%s1263_s13 + $0x28] sm:$0xff] %vm403_vm0, %v722_v46  ;;  %751 = vrot.lane.b32.xlu2 %v722_v46, %s1048_s14 }
  0xc5   : > { %v712_v42 = vadd.f32 %v704_v40, %v686_v41 }
  0xc7   : > { %v724_v44 = vadd.f32 %v1249_v37, %v712_v42 }
  0xc9   : > { %732 = vst.msk [vmem:[%s1263_s13 + $0x38] sm:$0xff] %vm403_vm0, %v724_v44  ;;  %755 = vrot.lane.b32.xlu1 %v724_v44, %s1048_s14 }
 0x113   : > { %v750_v51 = vpop.permute.xlu2 %749 }
 0x114   : > { %769 = vst.msk [vmem:[%s360_s17 + $0x20] sm:$0xff] %vm403_vm0, %v750_v51 }
 0x11d   : > { %v742_v52 = vpop.permute.xlu0 %741 }
 0x11e   : > { %765 = vst.msk [vmem:[%s360_s17] sm:$0xff] %vm403_vm0, %v742_v52  ;;  %v752_v18 = vpop.permute.xlu2 %751 }
 0x11f   : > { %770 = vst.msk [vmem:[%s360_s17 + $0x28] sm:$0xff] %vm403_vm0, %v752_v18 }
 0x125   : > { %v744_v37 = vpop.permute.xlu0 %743 }
 0x126   : > { %v748_v9 = vpop.permute.xlu1 %747  ;;  %766 = vst.msk [vmem:[%s360_s17 + $0x8] sm:$0xff] %vm403_vm0, %v744_v37 }
 0x127   : > { %768 = vst.msk [vmem:[%s360_s17 + $0x18] sm:$0xff] %vm403_vm0, %v748_v9 }
 0x12e   : > { %v746_v47 = vpop.permute.xlu1 %745 }
 0x12f   : > { %767 = vst.msk [vmem:[%s360_s17 + $0x10] sm:$0xff] %vm403_vm0, %v746_v47 }
 0x130   : > { %v754_v48 = vpop.permute.xlu0 %753 }
 0x131   : > { %771 = vst.msk [vmem:[%s360_s17 + $0x30] sm:$0xff] %vm403_vm0, %v754_v48 }
 0x13b   : > { %v756_v49 = vpop.permute.xlu1 %755 }
 0x13c   : > { %772 = vst.msk [vmem:[%s360_s17 + $0x38] sm:$0xff] %vm403_vm0, %v756_v49 }
 0x13d PF: > { %s17_s23 = sadd.s32 1, %s1045_s23   ;;  %s1378_s21 = smov %s1041_s22 }
 0x13e   : > { %p14_p5 = scmp.ge.s32.totalorder %s17_s23, 4   ;;  %s1379_s22 = smov %s1381_s24 }
 0x140   :  { %16 = sbr.rel (!%p14_p5) target bundleno = 2 (0x2), region = 97 }

// kernel: cross_trans_attention.6
= control target key start
LH: loop header
LB: loop body
LE: loop exit
PB: predicated region body
PF: predicated region fallthrough
CT: control target
= control target key end

     0   :  { %9 = vsyncpa [#allocation6], 0  ;;  %s1674_s15 = smov 0   ;;  %s1676_s16 = smov 0   ;;  %s2005_s0 = inlined_call_operand.vmem [shape: f32[4], index: 0, kind: input, shape index: {}]   ;;  %s2006_s1 = inlined_call_operand.vmem [shape: f32[2,64,16], index: 1, kind: input, shape index: {}]   ;;  %s2007_s2 = inlined_call_operand.vmem [shape: f32[2,64,16], index: 2, kind: input, shape index: {}]   ;;  %s2008_s3 = inlined_call_operand.vmem [shape: f32[16,16], index: 3, kind: input, shape index: {}]   ;;  %s2009_s4 = inlined_call_operand.vmem [shape: f32[2,16,16], index: 4, kind: output, shape index: {}]  }
   0x1   :  { %s1678_s17 = smov 0  }
   0x2 LB: > { %s1434_s18 = sadd.s32 4294967295, %s1638_s17   ;;  %s27_s19 = sadd.s32 1, %s1634_s16  ;;  %s1638_s17 = sphi %s1678_s17, %s15_s17   ;;  %s1634_s16 = sphi %s1676_s16, %s2011_s16   ;;  %s1630_s15 = sphi %s1674_s15, %s2010_s15  }
   0x3   : > { %p29_p0 = scmp.ge.s32.totalorder %s27_s19, 2  ;;  %p1436_p1 = scmp.ge.s32.totalorder %s1638_s17, 1 }
   0x4   : > { %p156_p2 = scmp.lt.s32.totalorder %s1638_s17, 3  ;;  %p1479_p4 = scmp.eq.s32.totalorder %s1434_s18, 0 }
   0x5   : > { %s2013_s19 = smov (%p29_p0, %s27_s19), 0  ;;  %s168_s22 = sshll.u32 %s2005_s0, 4  ;;  %s169_s22 = int_to_ptr.vmem [resolvable:$true] %s168_s22 }
   0x6   : > { %p157_p3 = pnand %p1436_p1, %p156_p2  ;;  %s1640_s23 = smov [#allocation5]  }
   0x8   : > { %p1475_p5 = pneg %p157_p3  ;;  %210 = sbr.rel (%p157_p3) target bundleno = 1659 (0x67b), region = 36 }
   0xa   : > { %p1476_p6 = pnand %p1479_p4, %p1475_p5 }
   0xc   : > { %1478 = dma.vmem_to_smem (!%p1476_p6), %s169_s22, 16, %s1640_s23, [#allocation6]  }
   0xd   : > { %1625 = dma.done.wait (%p1479_p4), [#allocation6], 16  }
   0xe   : > { %1627 = vsyncadd (%p1479_p4), [#allocation6], 4294967280 }
   0xf   : > { %217 = sfence }
  0x10   : > { %p252_p7 = scmp.lt.s32.totalorder %s1630_s15, 1  ;;  %vm285_vm0 = vcmask 122880   ;;  %v1641_v0 = vmov 0.0   ;;  %vm313_vm1 = vcmask 130048   ;;  %s1642_s5 = smov 124   ;;  %vm403_vm5 = vcmask 523264  }
  0x11   : > { %287 = vst.msk [vmem:[#allocation4] sm:$0x1] %vm285_vm0, %v1641_v0  ;;  %s1643_s6 = smov 120   ;;  %s1644_s7 = smov 116   ;;  %vm280_vm6 = vcmask 27648   ;;  %vm892_vm10 = vcmask 1043456  }
  0x12   : > { %s2015_s15 = smov (!%p252_p7, %s1630_s15), 1  ;;  %286 = vst.msk [vmem:[#allocation3] sm:$0x1] %vm285_vm0, %v1641_v0  ;;  %s839_s8 = sld [smem:[#allocation5]]  ;;  %vm885_vm11 = vcmask 31744   ;;  %vm1058_vm12 = vcmask 64544  }
  0x13   : > { %s1468_s24 = sshll.u32 %s2015_s15, 6  ;;  %281 = vst.msk [vmem:[#allocation2] sm:$0xf] %vm280_vm6, %v1641_v0  ;;  %s1458_s11 = sld [smem:[#allocation5 + $0x2]]  ;;  %vm1193_vm13 = vcmask 97344   ;;  %vm1331_vm14 = vcmask 130144  }
  0x14   : > { %s1706_s27 = scalar_lea.vmem %s2006_s1, %s1468_s24  ;;  %s1711_s30 = scalar_lea.vmem %s2007_s2, %s1468_s24  ;;  %282 = vst.msk [vmem:[#allocation2 + $0x4] sm:$0xf] %vm280_vm6, %v1641_v0 }
  0x15   : > { %v1714_v1 = vld [vmem:[%s1706_s27 + $0x10] sm:$0xff]  ;;  %v1717_v2 = vld [vmem:[%s1706_s27] sm:$0xff]  ;;  %v1728_v5 = vld [vmem:[%s1706_s27 + $0x18] sm:$0xff]  ;;  %283 = vst.msk [vmem:[#allocation2 + $0x8] sm:$0xf] %vm280_vm6, %v1641_v0  ;;  %s1454_s12 = sld [smem:[#allocation5 + $0x1]] }
  0x16   : > { %444 = vrot.lane.b32.xlu2 %v1714_v1, %s1642_s5  ;;  %v307_v3 = vmul.f32 %v1714_v1, %v1714_v1  ;;  %555 = vrot.lane.b32.xlu0 %v1717_v2, %s1643_s6  ;;  %v305_v4 = vmul.f32 %v1717_v2, %v1717_v2  ;;  %v298_v6 = vld [vmem:[%s1711_s30 + $0x10] sm:$0xff]  ;;  %v299_v7 = vld [vmem:[%s1711_s30 + $0x18] sm:$0xff]  ;;  %v308_v10 = vmul.f32 %v1728_v5, %v1728_v5  ;;  %s1470_s13 = sshll.u32 %s2015_s15, 4  ;;  %s1462_s21 = sld [smem:[#allocation5 + $0x3]] }
  0x17   : > { %440 = vrot.lane.b32.xlu1 %v1717_v2, %s1642_s5  ;;  %v1735_v8 = vld [vmem:[%s1706_s27 + $0x8] sm:$0xff]  ;;  %v1743_v12 = vld [vmem:[%s1711_s30 + $0x38] sm:$0xff]  ;;  %v1746_v14 = vpack.i.bf16 %v299_v7, %v298_v6  ;;  %v341_v15 = vmul.f32 %v298_v6, %v298_v6  ;;  %v302_v19 = vld [vmem:[%s1711_s30 + $0x30] sm:$0xff]  ;;  %v342_v28 = vmul.f32 %v299_v7, %v299_v7  ;;  %284 = vst.msk [vmem:[#allocation2 + $0xc] sm:$0xf] %vm280_vm6, %v1641_v0  ;;  %s1967_s20 = scalar_lea.vmem %s2009_s4, %s1470_s13  ;;  %s1646_s23 = smov 4  }
  0x18   : > { %v314_v9 = vsel %vm313_vm1, %v305_v4, 0.0  ;;  %v306_v11 = vmul.f32 %v1735_v8, %v1735_v8  ;;  %v317_v13 = vsel %vm313_vm1, %v307_v3, 0.0  ;;  %415 = vmatpush.msra.mxu0 %v1743_v12  ;;  %v1751_v18 = vld [vmem:[%s1706_s27 + $0x28] sm:$0xff]  ;;  %v319_v20 = vsel %vm313_vm1, %v308_v10, 0.0  ;;  %v300_v24 = vld [vmem:[%s1711_s30 + $0x20] sm:$0xff]  ;;  %v1780_v33 = vld [vmem:[%s1706_s27 + $0x30] sm:$0xff] }
  0x19   : > { %v310_v21 = vmul.f32 %v1751_v18, %v1751_v18  ;;  %v1758_v22 = vld [vmem:[%s1711_s30 + $0x8] sm:$0xff]  ;;  %v1762_v25 = vld [vmem:[%s1711_s30] sm:$0xff]  ;;  %v350_v29 = vsel %vm313_vm1, %v341_v15, 0.0  ;;  %v343_v34 = vmul.f32 %v300_v24, %v300_v24  ;;  %v1785_v35 = vld [vmem:[%s1706_s27 + $0x38] sm:$0xff]  ;;  %v311_v38 = vmul.f32 %v1780_v33, %v1780_v33  ;;  %s1647_s24 = smov 8   ;;  %s1648_s25 = smov 12  }
  0x1a   : > { %v315_v16 = vsel %vm313_vm1, %v306_v11, 0.0  ;;  %416 = vmatpush.msra.mxu0 %v302_v19  ;;  %v340_v26 = vmul.f32 %v1758_v22, %v1758_v22  ;;  %v1767_v27 = vld [vmem:[%s1706_s27 + $0x20] sm:$0xff]  ;;  %v301_v30 = vld [vmem:[%s1711_s30 + $0x28] sm:$0xff]  ;;  %v339_v31 = vmul.f32 %v1762_v25, %v1762_v25  ;;  %v312_v40 = vmul.f32 %v1785_v35, %v1785_v35 }
  0x1b   : > { %v316_v17 = vadd.f32 %v315_v16, %v314_v9  ;;  %v309_v32 = vmul.f32 %v1767_v27, %v1767_v27  ;;  %v323_v39 = vsel %vm313_vm1, %v310_v21, 0.0  ;;  %v352_v45 = vsel %vm313_vm1, %v342_v28, 0.0  ;;  %v304_v16 = vld [vmem:[#allocation3] sm:$0x1] }
  0x1c   : > { %v348_v36 = vsel %vm313_vm1, %v340_v26, 0.0  ;;  %417 = vmatpush.msra.mxu0 %v301_v30  ;;  %v347_v41 = vsel %vm313_vm1, %v339_v31, 0.0  ;;  %v344_v46 = vmul.f32 %v301_v30, %v301_v30  ;;  %v1796_v47 = vpack.i.bf16 %v301_v30, %v300_v24 }
  0x1d   : > { %v318_v23 = vadd.f32 %v317_v13, %v316_v17  ;;  %v321_v42 = vsel %vm313_vm1, %v309_v32, 0.0  ;;  %v349_v43 = vadd.f32 %v348_v36, %v347_v41  ;;  %v325_v48 = vsel %vm313_vm1, %v311_v38, 0.0 }
  0x1e   : > { %446 = vrot.lane.b32.xlu2 %v1728_v5, %s1642_s5  ;;  %1540 = vrot.lane.b32.xlu0 %v1746_v14, %s1643_s6  ;;  %v354_v51 = vsel %vm313_vm1, %v343_v34, 0.0  ;;  %v327_v52 = vsel %vm313_vm1, %v312_v40, 0.0  ;;  %v345_v53 = vmul.f32 %v302_v19, %v302_v19  ;;  %v356_v56 = vsel %vm313_vm1, %v344_v46, 0.0 }
  0x1f   : > { %442 = vrot.lane.b32.xlu1 %v1735_v8, %s1642_s5  ;;  %v320_v37 = vadd.f32 %v319_v20, %v318_v23  ;;  %418 = vmatpush.msra.mxu0 %v300_v24  ;;  %v351_v49 = vadd.f32 %v350_v29, %v349_v43  ;;  %v346_v57 = vmul.f32 %v1743_v12, %v1743_v12 }
  0x20   : > { %v358_v60 = vsel %vm313_vm1, %v345_v53, 0.0  ;;  %v1815_v3 = vpack.i.bf16 %v1743_v12, %v302_v19  ;;  %v1825_v12 = vpack.i.bf16 %v1758_v22, %v1762_v25 }
  0x21   : > { %v322_v44 = vadd.f32 %v321_v42, %v320_v37  ;;  %419 = vmatpush.msra.mxu0 %v299_v7  ;;  %v353_v54 = vadd.f32 %v352_v45, %v351_v49  ;;  %v360_v63 = vsel %vm313_vm1, %v346_v57, 0.0 }
  0x23   : > { %v324_v50 = vadd.f32 %v323_v39, %v322_v44  ;;  %420 = vmatpush.msra.mxu0 %v298_v6  ;;  %v355_v58 = vadd.f32 %v354_v51, %v353_v54 }
  0x25   : > { %v326_v55 = vadd.f32 %v325_v48, %v324_v50  ;;  %421 = vmatpush.msra.mxu0 %v1758_v22  ;;  %v357_v61 = vadd.f32 %v356_v56, %v355_v58  ;;  %v338_v22 = vld [vmem:[#allocation4] sm:$0x1] }
  0x26   : > { %450 = vrot.lane.b32.xlu2 %v1751_v18, %s1642_s5  ;;  %1545 = vrot.lane.b32.xlu0 %v1796_v47, %s1643_s6 }
  0x27   : > { %448 = vrot.lane.b32.xlu1 %v1767_v27, %s1642_s5  ;;  %v328_v59 = vadd.f32 %v327_v52, %v326_v55  ;;  %422 = vmatpush.msra.mxu0 %v1762_v25  ;;  %v359_v4 = vadd.f32 %v358_v60, %v357_v61 }
  0x29   : > { %v329_v62 = vrot.slane %v328_v59, 4  ;;  %v361_v7 = vadd.f32 %v360_v63, %v359_v4 }
  0x2b   : > { %v330_v6 = vadd.f32 %v329_v62, %v328_v59  ;;  %v362_v10 = vrot.slane %v361_v7, 4 }
  0x2d   : > { %v331_v9 = vrot.slane %v330_v6, 2  ;;  %v363_v13 = vadd.f32 %v362_v10, %v361_v7 }
  0x2e   : > { %454 = vrot.lane.b32.xlu2 %v1785_v35, %s1642_s5  ;;  %1550 = vrot.lane.b32.xlu0 %v1815_v3, %s1643_s6 }
  0x2f   : > { %452 = vrot.lane.b32.xlu1 %v1780_v33, %s1642_s5  ;;  %v332_v11 = vadd.f32 %v331_v9, %v330_v6  ;;  %v364_v17 = vrot.slane %v363_v13, 2 }
  0x31   : > { %v333_v15 = vrot.slane %v332_v11, 1  ;;  %v365_v20 = vadd.f32 %v364_v17, %v363_v13  ;;  %v1645_v13 = vmov 0  }
  0x33   : > { %v334_v19 = vadd.f32 %v333_v15, %v332_v11  ;;  %v366_v23 = vrot.slane %v365_v20, 1 }
  0x35   : > { %v335_v21 = vadd.f32 %v334_v19, %v304_v16  ;;  %v367_v24 = vadd.f32 %v366_v23, %v365_v20 }
  0x36   : > { %1515 = vrot.lane.b32.xlu2 %v1825_v12, %s1642_s5  ;;  %662 = vrot.lane.b32.xlu0 %v1717_v2, %s1644_s7 }
  0x37   : > { %337 = vst.msk [vmem:[#allocation3] sm:$0x1] %vm285_vm0, %v335_v21  ;;  %1535 = vrot.lane.b32.xlu1 %v1825_v12, %s1643_s6  ;;  %v368_v25 = vadd.f32 %v367_v24, %v338_v22 }
  0x39   : > { %369 = vst.msk [vmem:[#allocation4] sm:$0x1] %vm285_vm0, %v368_v25 }
  0x3e   : > { %1520 = vrot.lane.b32.xlu2 %v1746_v14, %s1642_s5  ;;  %664 = vrot.lane.b32.xlu0 %v1735_v8, %s1644_s7 }
  0x3f   : > { %674 = vrot.lane.b32.xlu1 %v1780_v33, %s1644_s7 }
  0x46   : > { %1525 = vrot.lane.b32.xlu2 %v1796_v47, %s1642_s5  ;;  %666 = vrot.lane.b32.xlu0 %v1714_v1, %s1644_s7 }
  0x4e   : > { %1530 = vrot.lane.b32.xlu2 %v1815_v3, %s1642_s5  ;;  %670 = vrot.lane.b32.xlu0 %v1767_v27, %s1644_s7 }
  0x56   : > { %557 = vrot.lane.b32.xlu2 %v1735_v8, %s1643_s6  ;;  %672 = vrot.lane.b32.xlu0 %v1751_v18, %s1644_s7 }
  0x5e   : > { %559 = vrot.lane.b32.xlu2 %v1714_v1, %s1643_s6  ;;  %676 = vrot.lane.b32.xlu0 %v1785_v35, %s1644_s7 }
  0x66   : > { %561 = vrot.lane.b32.xlu2 %v1728_v5, %s1643_s6 }
  0x6e   : > { %563 = vrot.lane.b32.xlu2 %v1767_v27, %s1643_s6 }
  0x70   : > { %v445_v26 = vpop.permute.xlu2 %444 }
  0x76   : > { %565 = vrot.lane.b32.xlu2 %v1751_v18, %s1643_s6 }
  0x78   : > { %v447_v28 = vpop.permute.xlu2 %446 }
  0x7e   : > { %567 = vrot.lane.b32.xlu2 %v1780_v33, %s1643_s6 }
  0x80   : > { %v451_v29 = vpop.permute.xlu2 %450  ;;  %371 = vxpose.xlu0.b32.start [1/8] (short) (narrow) %v1717_v2, 8 }
  0x86   : > { %569 = vrot.lane.b32.xlu2 %v1785_v35, %s1643_s6 }
  0x88   : > { %v455_v30 = vpop.permute.xlu2 %454  ;;  %372 = vxpose.xlu0.b32.cont [2/8] (short) (narrow) %v1735_v8, 8  ;;  %v1869_v31 = vpop.permute.xlu0 %555  ;;  %v770_v8 = vld [vmem:[#allocation3] sm:$0x1] }
  0x89   : > { %v441_v32 = vpop.permute.xlu1 %440  ;;  %v771_v39 = vmax.f32 %v770_v8, 1e-24 }
  0x8a   : > { %464 = vxpose.xlu1.b32.start [1/8] (short) (narrow) %v441_v32, 8 }
  0x8b   : > { %1577 = vrsqrt.f32 %v771_v39  ;;  %vm778_vm2 = vweird.f32 %v771_v39 }
  0x8e   : > { %668 = vrot.lane.b32.xlu2 %v1728_v5, %s1644_s7 }
  0x90   : > { %v1873_v34 = vpop.permute.xlu2 %1515  ;;  %373 = vxpose.xlu0.b32.cont [3/8] (short) (narrow) %v1714_v1, 8  ;;  %v1541_v36 = vpop.permute.xlu0 %1540 }
  0x91   : > { %v443_v37 = vpop.permute.xlu1 %442  ;;  %v1578_v44 = vpop.eup %1577  ;;  %v1543_v48 = vunpack.i.h.bf16 %v1541_v36  ;;  %v1517_v20 = vunpack.i.l.bf16 %v1873_v34 }
  0x92   : > { %465 = vxpose.xlu1.b32.cont [2/8] (short) (narrow) %v443_v37, 8  ;;  %v773_v49 = vmul.f32 %v1578_v44, %v771_v39  ;;  %vm779_vm3 = vweird.f32 %v1578_v44 }
  0x93   : > { %vm780_vm4 = vmor %vm778_vm2, %vm779_vm3 }
  0x94   : > { %v774_v50 = vmul.f32 %v1578_v44, %v773_v49 }
  0x96   : > { %v775_v52 = vmul.f32 0.5, %v774_v50  ;;  %v840_v50 = vstv %s839_s8 }
  0x98   : > { %v1876_v2 = vpop.permute.xlu2 %1520  ;;  %374 = vxpose.xlu0.b32.cont [4/8] (short) (narrow) %v1728_v5, 8  ;;  %v1546_v38 = vpop.permute.xlu0 %1545  ;;  %v776_v53 = vsub.f32 1.5, %v775_v52 }
  0x99   : > { %v1548_v43 = vunpack.i.h.bf16 %v1546_v38  ;;  %v449_v45 = vpop.permute.xlu1 %448  ;;  %v1547_v5 = vunpack.i.l.bf16 %v1546_v38 }
  0x9a   : > { %466 = vxpose.xlu1.b32.cont [3/8] (short) (narrow) %v445_v26, 8  ;;  %v370_v26 = vld [vmem:[#allocation2] sm:$0xf] }
  0xa0   : > { %v1879_v40 = vpop.permute.xlu2 %1525  ;;  %375 = vxpose.xlu0.b32.cont [5/8] (short) (narrow) %v1767_v27, 8  ;;  %v1551_v41 = vpop.permute.xlu0 %1550  ;;  %v1542_v27 = vunpack.i.l.bf16 %v1541_v36 }
  0xa1   : > { %v1553_v42 = vunpack.i.h.bf16 %v1551_v41  ;;  %v1552_v1 = vunpack.i.l.bf16 %v1551_v41  ;;  %v453_v54 = vpop.permute.xlu1 %452  ;;  %v1528_v17 = vunpack.i.h.bf16 %v1879_v40  ;;  %v1527_v19 = vunpack.i.l.bf16 %v1879_v40 }
  0xa2   : > { %467 = vxpose.xlu1.b32.cont [4/8] (short) (narrow) %v447_v28, 8 }
  0xa3   : > { %646 = vmatpush.msra.mxu2 %v1553_v42 }
  0xa5   : > { %647 = vmatpush.msra.mxu2 %v1552_v1 }
  0xa7   : > { %648 = vmatpush.msra.mxu2 %v1548_v43 }
  0xa8   : > { %v1531_v46 = vpop.permute.xlu2 %1530  ;;  %376 = vxpose.xlu0.b32.cont [6/8] (short) (narrow) %v1751_v18, 8  ;;  %v777_v18 = vmul.f32 %v1578_v44, %v776_v53 }
  0xa9   : > { %649 = vmatpush.msra.mxu2 %v1547_v5  ;;  %v1536_v6 = vpop.permute.xlu1 %1535  ;;  %v1533_v15 = vunpack.i.h.bf16 %v1531_v46  ;;  %v1532_v16 = vunpack.i.l.bf16 %v1531_v46 }
  0xaa   : > { %468 = vxpose.xlu1.b32.cont [5/8] (short) (narrow) %v449_v45, 8  ;;  %v1889_v56 = vsel %vm780_vm4, %v1578_v44, %v777_v18  ;;  %v1538_v23 = vunpack.i.h.bf16 %v1536_v6  ;;  %v1537_v24 = vunpack.i.l.bf16 %v1536_v6  ;;  %v431_v6 = vld [vmem:[#allocation2 + $0x4] sm:$0xf] }
  0xab   : > { %650 = vmatpush.msra.mxu2 %v1543_v48  ;;  %539 = vmatpush.msra.mxu1 %v1533_v15  ;;  %v923_v18 = vperm.slane %v1889_v56, 0 }
  0xad   : > { %651 = vmatpush.msra.mxu2 %v1542_v27  ;;  %540 = vmatpush.msra.mxu1 %v1532_v16 }
  0xaf   : > { %541 = vmatpush.msra.mxu1 %v1528_v17  ;;  %652 = vmatpush.msra.mxu2 %v1538_v23 }
  0xb0   : > { %v1883_v51 = vpop.permute.xlu2 %557  ;;  %377 = vxpose.xlu0.b32.cont [7/8] (short) (narrow) %v1780_v33, 8  ;;  %v663_v33 = vpop.permute.xlu0 %662 }
  0xb1   : > { %v675_v9 = vpop.permute.xlu1 %674  ;;  %542 = vmatpush.msra.mxu1 %v1527_v19  ;;  %653 = vmatpush.msra.mxu2 %v1537_v24 }
  0xb2   : > { %469 = vxpose.xlu1.b32.cont [6/8] (short) (narrow) %v451_v29, 8  ;;  %v782_v29 = vld [vmem:[#allocation4] sm:$0x1] }
  0xb3   : > { %v783_v32 = vmax.f32 %v782_v29, 1e-24  ;;  %v1108_v29 = vstv %s1458_s11 }
  0xb5   : > { %1579 = vrsqrt.f32 %v783_v32  ;;  %vm790_vm7 = vweird.f32 %v783_v32 }
  0xb8   : > { %v1886_v55 = vpop.permute.xlu2 %559  ;;  %378 = vxpose.xlu0.b32.end [8/8] (short) (narrow) %v1785_v35, 8  ;;  %v665_v59 = vpop.permute.xlu0 %664 }
  0xba   : > { %470 = vxpose.xlu1.b32.cont [7/8] (short) (narrow) %v453_v54, 8 }
  0xbb   : > { %v1580_v38 = vpop.eup %1579 }
  0xbc   : > { %v785_v39 = vmul.f32 %v1580_v38, %v783_v32  ;;  %vm791_vm8 = vweird.f32 %v1580_v38 }
  0xbd   : > { %vm792_vm9 = vmor %vm790_vm7, %vm791_vm8 }
  0xbe   : > { %v786_v41 = vmul.f32 %v1580_v38, %v785_v39 }
  0xc0   : > { %v1891_v57 = vpop.permute.xlu2 %561  ;;  %797 = vxpose.xlu0.b32.start.end [1/1] (short) (narrow) %v1889_v56, 8  ;;  %v667_v35 = vpop.permute.xlu0 %666  ;;  %v787_v43 = vmul.f32 0.5, %v786_v41 }
  0xc2   : > { %471 = vxpose.xlu1.b32.end [8/8] (short) (narrow) %v455_v30, 8  ;;  %v788_v44 = vsub.f32 1.5, %v787_v43  ;;  %v1243_v43 = vstv %s1462_s21 }
  0xc4   : > { %v789_v45 = vmul.f32 %v1580_v38, %v788_v44 }
  0xc6   : > { %v793_v5 = vsel %vm792_vm9, %v1580_v38, %v789_v45  ;;  %v970_v38 = vstv %s1454_s12 }
  0xc7   : > { %v836_v48 = vperm.slane %v793_v5, 0 }
  0xc8   : > { %v1894_v58 = vpop.permute.xlu2 %563  ;;  %v671_v4 = vpop.permute.xlu0 %670 }
  0xca   : > { %686 = vxpose.xlu1.b32.start [1/8] (short) (narrow) %v663_v33, 8 }
  0xd0   : > { %v1896_v60 = vpop.permute.xlu2 %565  ;;  %v673_v7 = vpop.permute.xlu0 %672 }
  0xd2   : > { %687 = vxpose.xlu1.b32.cont [2/8] (short) (narrow) %v665_v59, 8 }
  0xd8   : > { %v1898_v61 = vpop.permute.xlu2 %567  ;;  %v677_v10 = vpop.permute.xlu0 %676 }
  0xda   : > { %688 = vxpose.xlu1.b32.cont [3/8] (short) (narrow) %v667_v35, 8 }
  0xe0   : > { %v1900_v62 = vpop.permute.xlu2 %569 }
  0xe8   : > { %v669_v63 = vpop.permute.xlu2 %668 }
  0xe9   : > { %689 = vxpose.xlu1.b32.cont [4/8] (short) (narrow) %v669_v63, 8 }
  0xf1   : > { %690 = vxpose.xlu1.b32.cont [5/8] (short) (narrow) %v671_v4, 8 }
  0xf9   : > { %691 = vxpose.xlu1.b32.cont [6/8] (short) (narrow) %v673_v7, 8 }
 0x101   : > { %692 = vxpose.xlu1.b32.cont [7/8] (short) (narrow) %v675_v9, 8 }
 0x109   : > { %693 = vxpose.xlu1.b32.end [8/8] (short) (narrow) %v677_v10, 8  ;;  %v661_v10 = vld [vmem:[#allocation2 + $0xc] sm:$0xf] }
 0x124   : > { %v387_v11 = vpop.trf.xlu0 }
 0x125   : > { %1447 = vmatmul.msk.f32.vlgmr.msra.gmra.mxu0 %vm403_vm5, %v387_v11 }
 0x127   : > { %1574 = vset.pattern.permute.xlu0 %v1645_v13 }
 0x12e   : > { %1555 = vrot.lane.b32.xlu0 %v1825_v12, %s1644_s7  ;;  %v1523_v12 = vunpack.i.h.bf16 %v1876_v2  ;;  %v480_v56 = vpop.trf.xlu1 }
 0x130   : > { %543 = vmatpush.msra.mxu1 %v1523_v12 }
 0x136   : > { %1560 = vrot.lane.b32.xlu0 %v1746_v14, %s1644_s7  ;;  %v1522_v14 = vunpack.i.l.bf16 %v1876_v2 }
 0x138   : > { %544 = vmatpush.msra.mxu1 %v1522_v14 }
 0x13e   : > { %1565 = vrot.lane.b32.xlu0 %v1796_v47, %s1644_s7  ;;  %v1518_v47 = vunpack.i.h.bf16 %v1873_v34 }
 0x140   : > { %545 = vmatpush.msra.mxu1 %v1518_v47 }
 0x142   : > { %546 = vmatpush.msra.mxu1 %v1517_v20  ;;  %v554_v20 = vld [vmem:[#allocation2 + $0x8] sm:$0xf] }
 0x143   : > { %1448 = vmatmul.msk.f32.vlgmr.msra.gmra.mxu1 %vm403_vm5, %v480_v56 }
 0x146   : > { %1570 = vrot.lane.b32.xlu0 %v1815_v3, %s1644_s7 }
 0x164   : > { %v813_v3 = vpop.trf.xlu0 }
 0x165   : > { %831 = vperm.xlu0 %1574, %v813_v3  }
 0x1a0   : > { %v1556_v21 = vpop.permute.xlu0 %1555 }
 0x1a1   : > { %v1558_v42 = vunpack.i.h.bf16 %v1556_v21  ;;  %v1557_v1 = vunpack.i.l.bf16 %v1556_v21 }
 0x1a2   : > { %v424_v25 = vpop.f32.mrf.mxu0 }
 0x1a3   : > { %v427_v28 = vadd.f32 %v424_v25, %v370_v26 }
 0x1a5   : > { %429 = vst.msk [vmem:[#allocation2] sm:$0xf] %vm280_vm6, %v427_v28 }
 0x1a8   : > { %v1561_v22 = vpop.permute.xlu0 %1560 }
 0x1a9   : > { %v1563_v0 = vunpack.i.h.bf16 %v1561_v22  ;;  %v1562_v40 = vunpack.i.l.bf16 %v1561_v22 }
 0x1ac   : > { %v796_v46 = vld [vmem:[#allocation2] sm:$0xf] }
 0x1b0   : > { %v1566_v30 = vpop.permute.xlu0 %1565 }
 0x1b1   : > { %v1568_v2 = vunpack.i.h.bf16 %v1566_v30  ;;  %v1567_v8 = vunpack.i.l.bf16 %v1566_v30 }
 0x1b8   : > { %v1571_v34 = vpop.permute.xlu0 %1570 }
 0x1b9   : > { %v1573_v36 = vunpack.i.h.bf16 %v1571_v34  ;;  %v1572_v37 = vunpack.i.l.bf16 %v1571_v34 }
 0x1bb   : > { %753 = vmatpush.msra.mxu3 %v1573_v36 }
 0x1bd   : > { %754 = vmatpush.msra.mxu3 %v1572_v37 }
 0x1bf   : > { %755 = vmatpush.msra.mxu3 %v1568_v2 }
 0x1c0   : > { %v548_v7 = vpop.f32.mrf.mxu1 }
 0x1c1   : > { %756 = vmatpush.msra.mxu3 %v1567_v8  ;;  %v551_v9 = vadd.f32 %v548_v7, %v431_v6 }
 0x1c3   : > { %757 = vmatpush.msra.mxu3 %v1563_v0  ;;  %552 = vst.msk [vmem:[#allocation2 + $0x4] sm:$0xf] %vm280_vm6, %v551_v9 }
 0x1c5   : > { %758 = vmatpush.msra.mxu3 %v1562_v40 }
 0x1c7   : > { %759 = vmatpush.msra.mxu3 %v1558_v42 }
 0x1c9   : > { %760 = vmatpush.msra.mxu3 %v1557_v1 }
 0x1ca   : > { %v921_v32 = vld [vmem:[#allocation2 + $0x4] sm:$0xf] }
 0x1d7   : > { %v832_v49 = vpop.permute.xlu0 %831 }
 0x1d8   : > { %v834_v27 = vmul.f32 %v832_v49, %v796_v46 }
 0x1da   : > { %v838_v52 = vmul.f32 %v836_v48, %v834_v27 }
 0x1dc   : > { %v841_v53 = vmul.f32 %v840_v50, %v838_v52 }
 0x1de   : > { %v842_v54 = vsel %vm280_vm6, %v841_v53, -inf }
 0x1df   : > { %843 = vmax.xlane.f32.xlu2 %v842_v54 }
 0x1f7   : > { %924 = vrot.lane.b32.xlu2 %v923_v18, %s1642_s5 }
 0x21d   : > { %579 = vxpose.xlu2.b32.start [1/8] (short) (narrow) %v1869_v31, 8 }
 0x225   : > { %580 = vxpose.xlu2.b32.cont [2/8] (short) (narrow) %v1883_v51, 8 }
 0x22d   : > { %581 = vxpose.xlu2.b32.cont [3/8] (short) (narrow) %v1886_v55, 8 }
 0x235   : > { %582 = vxpose.xlu2.b32.cont [4/8] (short) (narrow) %v1891_v57, 8  ;;  %v702_v57 = vpop.trf.xlu1 }
 0x236   : > { %1450 = vmatmul.msk.f32.vlgmr.msra.gmra.mxu3 %vm403_vm5, %v702_v57  ;;  %v795_v57 = vld [vmem:[%s2008_s3 + $0x8] sm:$0xff] }
 0x23d   : > { %583 = vxpose.xlu2.b32.cont [5/8] (short) (narrow) %v1894_v58, 8 }
 0x245   : > { %584 = vxpose.xlu2.b32.cont [6/8] (short) (narrow) %v1896_v60, 8 }
 0x24d   : > { %585 = vxpose.xlu2.b32.cont [7/8] (short) (narrow) %v1898_v61, 8 }
 0x252   : > { %v844_v33 = vpop.xlane.xlu2 %843 }
 0x253   : > { %v845_v59 = vsub.f32 %v841_v53, %v844_v33 }
 0x255   : > { %v846_v35 = vmul.f32 1.442695, %v845_v59  ;;  %586 = vxpose.xlu2.b32.end [8/8] (short) (narrow) %v1900_v62, 8  ;;  %v1949_v62 = vld [vmem:[%s2008_s3] sm:$0xff] }
 0x256   : > { %v984_v46 = vrot.slane %v1949_v62, 4 }
 0x257   : > { %1581 = vpow2.f32 %v846_v35 }
 0x25a   : > { %v925_v31 = vpop.permute.xlu2 %924 }
 0x25b   : > { %927 = vxpose.xlu0.b32.start.end [1/1] (short) (narrow) %v925_v31, 8 }
 0x25d   : > { %v1582_v51 = vpop.eup %1581  ;;  %853 = vxpose.xlu2.b32.start.end [1/1] (short) (narrow) %v1949_v62, 16 }
 0x25e   : > { %v848_v55 = vsel %vm280_vm6, %v1582_v51, 0.0 }
 0x25f   : > { %849 = vadd.xlane.f32.xlu1 %v848_v55 }
 0x278   : > { %1062 = vrot.lane.b32.xlu1 %v923_v18, %s1643_s6 }
 0x2b6   : > { %v595_v17 = vpop.trf.xlu2 }
 0x2b7   : > { %1449 = vmatmul.msk.f32.vlgmr.msra.gmra.mxu2 %vm403_vm5, %v595_v17 }
 0x2b9   : > { %v762_v11 = vpop.f32.mrf.mxu3 }
 0x2ba   : > { %v765_v15 = vadd.f32 %v762_v11, %v661_v10 }
 0x2bc   : > { %766 = vst.msk [vmem:[#allocation2 + $0xc] sm:$0xf] %vm280_vm6, %v765_v15 }
 0x2c3   : > { %v1196_v41 = vld [vmem:[#allocation2 + $0xc] sm:$0xf] }
 0x2c9   : > { %1197 = vrot.lane.b32.xlu0 %v923_v18, %s1644_s7 }
 0x2d1   : > { %1103 = vrot.lane.b32.xlu0 %v836_v48, %s1643_s6 }
 0x2d2   : > { %v850_v58 = vpop.xlane.xlu1 %849 }
 0x2d3   : > { %1583 = vrcp.f32 %v850_v58  ;;  %v1257_v58 = vrot.slane %v795_v57, 4 }
 0x2d9   : > { %v1584_v60 = vpop.eup %1583  ;;  %1238 = vrot.lane.b32.xlu0 %v836_v48, %s1644_s7 }
 0x2da   : > { %v852_v61 = vmul.f32 %v1584_v60, %v1582_v51 }
 0x2dc   : > { %1451 = vmatpush.msk.msrb.mxu0 %vm892_vm10, %v852_v61 }
 0x2ea   : > { %v1063_v63 = vpop.permute.xlu1 %1062 }
 0x2eb   : > { %1065 = vxpose.xlu1.b32.start.end [1/1] (short) (narrow) %v1063_v63, 8 }
 0x2f6   : > { %v869_v19 = vpop.trf.xlu2 }
 0x2f7   : > { %1452 = vmatmul.msk.f32.vlgmr.msrb.gmra.mxu0 %vm885_vm11, %v869_v19 }
 0x2fe   : > { %v870_v12 = vpop.trf.xlu2 }
 0x2ff   : > { %v943_v4 = vpop.trf.xlu0  ;;  %1453 = vmatmul.msk.f32.gmra.mxu0 %vm885_vm11, %v870_v12 }
 0x300   : > { %961 = vperm.xlu0 %1574, %v943_v4  }
 0x308   : > { %965 = vrot.lane.b32.xlu0 %v836_v48, %s1642_s5 }
 0x33a   : > { %v655_v3 = vpop.f32.mrf.mxu2 }
 0x33b   : > { %v1198_v16 = vpop.permute.xlu0 %1197  ;;  %v658_v21 = vadd.f32 %v655_v3, %v554_v20 }
 0x33c   : > { %1200 = vxpose.xlu2.b32.start.end [1/1] (short) (narrow) %v1198_v16, 8 }
 0x33d   : > { %659 = vst.msk [vmem:[#allocation2 + $0x8] sm:$0xf] %vm280_vm6, %v658_v21 }
 0x33e   : > { %1575 = vset.pattern.permute.xlu1 %v1645_v13 }
 0x343   : > { %v1104_v23 = vpop.permute.xlu0 %1103 }
 0x344   : > { %v1061_v25 = vld [vmem:[#allocation2 + $0x8] sm:$0xf] }
 0x34b   : > { %v1239_v22 = vpop.permute.xlu0 %1238 }
 0x372   : > { %v962_v24 = vpop.permute.xlu0 %961 }
 0x373   : > { %v964_v34 = vmul.f32 %v962_v24, %v921_v32 }
 0x374   : > { %v913_v39 = vpop.f32.mrf.mxu0 }
 0x375   : > { %919 = vst.msk [vmem:[%s1967_s20] sm:$0xff] %vm885_vm11, %v913_v39 }
 0x37c   : > { %v916_v40 = vpop.f32.mrf.mxu0 }
 0x37d   : > { %920 = vst.msk [vmem:[%s1967_s20 + $0x8] sm:$0xff] %vm885_vm11, %v916_v40 }
 0x38f   : > { %v1081_v14 = vpop.trf.xlu1 }
 0x390   : > { %1099 = vperm.xlu1 %1575, %v1081_v14  }
 0x39e   : > { %1576 = vset.pattern.permute.xlu2 %v1645_v13  ;;  %v966_v13 = vpop.permute.xlu0 %965 }
 0x39f   : > { %v968_v37 = vmul.f32 %v966_v13, %v964_v34 }
 0x3a1   : > { %v971_v8 = vmul.f32 %v970_v38, %v968_v37 }
 0x3a3   : > { %v972_v0 = vsel %vm280_vm6, %v971_v8, -inf }
 0x3d5   : > { %v1216_v47 = vpop.trf.xlu2 }
 0x3d6   : > { %1234 = vperm.xlu2 %1576, %v1216_v47  }
 0x402   : > { %v1100_v26 = vpop.permute.xlu1 %1099 }
 0x403   : > { %v1102_v28 = vmul.f32 %v1100_v26, %v1061_v25 }
 0x405   : > { %v1106_v30 = vmul.f32 %v1104_v23, %v1102_v28 }
 0x407   : > { %v1109_v36 = vmul.f32 %v1108_v29, %v1106_v30 }
 0x409   : > { %v1110_v2 = vsel %vm280_vm6, %v1109_v36, -inf }
 0x40a   : > { %1111 = vmax.xlane.f32.xlu0 %v1110_v2 }
 0x412   : > { %973 = vmax.xlane.f32.xlu0 %v972_v0 }
 0x430   : > { %v1235_v42 = vpop.permute.xlu2 %1234 }
 0x431   : > { %v1237_v1 = vmul.f32 %v1235_v42, %v1196_v41 }
 0x433   : > { %v1241_v44 = vmul.f32 %v1239_v22, %v1237_v1 }
 0x435   : > { %v1244_v45 = vmul.f32 %v1243_v43, %v1241_v44 }
 0x437   : > { %v1245_v5 = vsel %vm280_vm6, %v1244_v45, -inf }
 0x438   : > { %1246 = vmax.xlane.f32.xlu1 %v1245_v5 }
 0x472   : > { %986 = vxpose.xlu1.b32.start.end [1/1] (short) (narrow) %v984_v46, 16 }
 0x47d   : > { %v1112_v48 = vpop.xlane.xlu0 %1111 }
 0x47e   : > { %v1113_v50 = vsub.f32 %v1109_v36, %v1112_v48 }
 0x480   : > { %v1114_v53 = vmul.f32 1.442695, %v1113_v50 }
 0x485   : > { %v974_v49 = vpop.xlane.xlu0 %973 }
 0x486   : > { %v975_v27 = vsub.f32 %v971_v8, %v974_v49 }
 0x488   : > { %v976_v52 = vmul.f32 1.442695, %v975_v27 }
 0x48a   : > { %1585 = vpow2.f32 %v976_v52 }
 0x48b   : > { %1587 = vpow2.f32 %v1114_v53 }
 0x490   : > { %v1586_v54 = vpop.eup %1585 }
 0x491   : > { %v978_v18 = vsel %vm280_vm6, %v1586_v54, 0.0  ;;  %v1588_v33 = vpop.eup %1587 }
 0x492   : > { %979 = vadd.xlane.f32.xlu0 %v978_v18  ;;  %v1116_v59 = vsel %vm280_vm6, %v1588_v33, 0.0 }
 0x49a   : > { %1117 = vadd.xlane.f32.xlu0 %v1116_v59 }
 0x4ab   : > { %v1247_v35 = vpop.xlane.xlu1 %1246 }
 0x4ac   : > { %v1248_v56 = vsub.f32 %v1244_v45, %v1247_v35 }
 0x4ae   : > { %v1249_v31 = vmul.f32 1.442695, %v1248_v56 }
 0x4b0   : > { %1589 = vpow2.f32 %v1249_v31 }
 0x4b6   : > { %v1590_v51 = vpop.eup %1589 }
 0x4b7   : > { %v1251_v55 = vsel %vm280_vm6, %v1590_v51, 0.0 }
 0x4b8   : > { %1252 = vadd.xlane.f32.xlu2 %v1251_v55 }
 0x4c3   : > { %1121 = vxpose.xlu0.b32.start.end [1/1] (short) (narrow) %v795_v57, 16 }
 0x4e1   : > { %1259 = vxpose.xlu2.b32.start.end [1/1] (short) (narrow) %v1257_v58, 16 }
 0x505   : > { %v980_v60 = vpop.xlane.xlu0 %979 }
 0x506   : > { %1591 = vrcp.f32 %v980_v60 }
 0x50c   : > { %v1592_v61 = vpop.eup %1591 }
 0x50d   : > { %v1118_v62 = vpop.xlane.xlu0 %1117  ;;  %v982_v63 = vmul.f32 %v1592_v61, %v1586_v54 }
 0x50e   : > { %1593 = vrcp.f32 %v1118_v62 }
 0x50f   : > { %1455 = vmatpush.msk.msrb.mxu1 %vm892_vm10, %v982_v63 }
 0x514   : > { %v1594_v4 = vpop.eup %1593 }
 0x515   : > { %v1120_v6 = vmul.f32 %v1594_v4, %v1588_v33 }
 0x516   : > { %v1002_v7 = vpop.trf.xlu1 }
 0x517   : > { %1459 = vmatpush.msk.msrb.mxu2 %vm892_vm10, %v1120_v6  ;;  %1456 = vmatmul.msk.f32.vlgmr.msrb.gmra.mxu1 %vm885_vm11, %v1002_v7 }
 0x51e   : > { %v1003_v15 = vpop.trf.xlu1 }
 0x51f   : > { %1457 = vmatmul.msk.f32.gmra.mxu1 %vm885_vm11, %v1003_v15 }
 0x52b   : > { %v1253_v9 = vpop.xlane.xlu2 %1252 }
 0x52c   : > { %1595 = vrcp.f32 %v1253_v9 }
 0x532   : > { %v1596_v10 = vpop.eup %1595 }
 0x533   : > { %v1255_v11 = vmul.f32 %v1596_v10, %v1590_v51 }
 0x535   : > { %1463 = vmatpush.msk.msrb.mxu3 %vm892_vm10, %v1255_v11 }
 0x567   : > { %v1137_v16 = vpop.trf.xlu0 }
 0x568   : > { %1460 = vmatmul.msk.f32.vlgmr.msrb.gmra.mxu2 %vm885_vm11, %v1137_v16 }
 0x56f   : > { %v1138_v17 = vpop.trf.xlu0 }
 0x570   : > { %1461 = vmatmul.msk.f32.gmra.mxu2 %vm885_vm11, %v1138_v17 }
 0x57a   : > { %v1275_v19 = vpop.trf.xlu2 }
 0x57b   : > { %1464 = vmatmul.msk.f32.vlgmr.msrb.gmra.mxu3 %vm885_vm11, %v1275_v19 }
 0x582   : > { %v1276_v12 = vpop.trf.xlu2 }
 0x583   : > { %1465 = vmatmul.msk.f32.gmra.mxu3 %vm885_vm11, %v1276_v12 }
 0x594   : > { %v1044_v14 = vpop.f32.mrf.mxu1 }
 0x595   : > { %1052 = vrot.lane.b32.xlu0 %v1044_v14, %s1646_s23 }
 0x59c   : > { %v1047_v47 = vpop.f32.mrf.mxu1 }
 0x59d   : > { %1054 = vrot.lane.b32.xlu1 %v1047_v47, %s1646_s23 }
 0x5eb   : > { %v1179_v20 = vpop.f32.mrf.mxu2 }
 0x5ec   : > { %1187 = vrot.lane.b32.xlu2 %v1179_v20, %s1647_s24 }
 0x5f3   : > { %v1182_v3 = vpop.f32.mrf.mxu2 }
 0x5f4   : > { %1189 = vrot.lane.b32.xlu1 %v1182_v3, %s1647_s24 }
 0x5fe   : > { %v1317_v21 = vpop.f32.mrf.mxu3 }
 0x5ff   : > { %1325 = vrot.lane.b32.xlu1 %v1317_v21, %s1648_s25 }
 0x606   : > { %v1320_v23 = vpop.f32.mrf.mxu3 }
 0x607   : > { %1327 = vrot.lane.b32.xlu0 %v1320_v23, %s1648_s25  ;;  %v1053_v22 = vpop.permute.xlu0 %1052 }
 0x608   : > { %1059 = vst.msk [vmem:[%s1967_s20] sm:$0xff] %vm1058_vm12, %v1053_v22 }
 0x60f   : > { %v1055_v24 = vpop.permute.xlu1 %1054 }
 0x610   : > { %1060 = vst.msk [vmem:[%s1967_s20 + $0x8] sm:$0xff] %vm1058_vm12, %v1055_v24 }
 0x646   : > { %v1188_v25 = vpop.permute.xlu2 %1187 }
 0x647   : > { %1194 = vst.msk [vmem:[%s1967_s20] sm:$0xff] %vm1193_vm13, %v1188_v25 }
 0x666   : > { %v1190_v26 = vpop.permute.xlu1 %1189 }
 0x667   : > { %1195 = vst.msk [vmem:[%s1967_s20 + $0x8] sm:$0xff] %vm1193_vm13, %v1190_v26 }
 0x671   : > { %v1326_v28 = vpop.permute.xlu1 %1325 }
 0x672   : > { %1332 = vst.msk [vmem:[%s1967_s20] sm:$0xff] %vm1331_vm14, %v1326_v28 }
 0x679   : > { %v1328_v29 = vpop.permute.xlu0 %1327 }
 0x67a   : > { %1333 = vst.msk [vmem:[%s1967_s20 + $0x8] sm:$0xff] %vm1331_vm14, %v1328_v29 }
 0x67b PF: > { %s15_s17 = sadd.s32 1, %s1638_s17   ;;  %s2010_s15 = smov %s1634_s16 }
 0x67c   : > { %p12_p8 = scmp.ge.s32.totalorder %s15_s17, 4   ;;  %s2011_s16 = smov %s2013_s19 }
 0x67e   :  { %14 = sbr.rel (!%p12_p8) target bundleno = 2 (0x2), region = 85 }
 0x683   :  { %1355 = vsyncpa [#allocation6], 1 }
 0x684   :  { %1357 = vsyncpa [#allocation6 + $0x1], 1 }

</bundles_post_ra>
